<compile_context>
chip_gen: v5e
topology: v5e:2x2
jax: 0.10.0
libtpu: 0.0.40
codegen_flags: <defaults>
</compile_context>

<pallas_src>
import math

import jax
import jax.numpy as jnp
from jax import lax
from jax.experimental import pallas as pl
from jax.experimental.pallas import tpu as pltpu

# ---- synthetic, scaled-down "bert-base-uncased" config -----------------
VOCAB = 100
SEN_LEN = 8            # SenLen
HIDDEN = 32            # dimC  (BERT hidden size)
N_HEADS = 4
HEAD_D = HIDDEN // N_HEADS
FFN = 64
N_LAYERS = 2
DIM_E = 5              # number of event classes (dimE)
ENCODED_DIM = 2 * HIDDEN
LN_EPS = 1e-12
OUT_LANES = 128        # lane-dense output slab width
# slab lane layout: [0,DIM_E)=scores, DIM_E=pred value, DIM_E+1=pred index,
#                   DIM_E+2=mean CE loss, rest zero padding.


# ======================= fused Pallas kernel =============================
def _layernorm(x, g, b):
    mu = jnp.mean(x, axis=-1, keepdims=True)
    var = jnp.mean(jnp.square(x - mu), axis=-1, keepdims=True)
    return (x - mu) * lax.rsqrt(var + LN_EPS) * g + b


def discriminator_kernel(emb_ref, inmask_ref, maskL_ref, maskR_ref, label_ref,
                         pt_ref, embln_ref, wqkv_ref, bqkv_ref, wo_ref,
                         vecs_ref, w1_ref, b1_ref, w2_ref, mw_ref, mb_ref,
                         out_ref):
    B, S, H = emb_ref.shape
    T = B * S
    N = N_HEADS
    D = HEAD_D

    # ---- embeddings: word + (position + token-type), then LayerNorm ----
    eln = embln_ref[...]                                     # (2, H)
    x = (emb_ref[...] + pt_ref[...][None, :, :]).reshape(T, H)
    x = _layernorm(x, eln[0:1, :], eln[1:2, :])

    # additive attention mask computed in-kernel; broadcast (no replication)
    amask_b = ((1.0 - inmask_ref[...]) * -10000.0)[:, None, :]   # (B, 1, S)

    # ---- BERT encoder layers (statically unrolled, VMEM resident) ----
    for l in range(N_LAYERS):
        vecs = vecs_ref[l]                                   # (6, H)
        bo, ln1g, ln1b = vecs[0:1, :], vecs[1:2, :], vecs[2:3, :]
        b2, ln2g, ln2b = vecs[3:4, :], vecs[4:5, :], vecs[5:6, :]

        # Per-head attention with weights pre-split at pack time: the head
        # axis comes straight out of the (T,H)@(H,D) matmuls -- no lane
        # slices, no concatenates, no transposes of activations.
        attn_out = bo                                        # (1, H) broadcast
        for h in range(N):
            q = (jnp.dot(x, wqkv_ref[l, h],
                         preferred_element_type=jnp.float32)
                 + bqkv_ref[l, h:h + 1, :]).reshape(B, S, D)
            k = (jnp.dot(x, wqkv_ref[l, N + h],
                         preferred_element_type=jnp.float32)
                 + bqkv_ref[l, N + h:N + h + 1, :]).reshape(B, S, D)
            v = (jnp.dot(x, wqkv_ref[l, 2 * N + h],
                         preferred_element_type=jnp.float32)
                 + bqkv_ref[l, 2 * N + h:2 * N + h + 1, :]).reshape(B, S, D)

            att = jnp.einsum('bqd,bkd->bqk', q, k,
                             preferred_element_type=jnp.float32) + amask_b
            mx = jnp.max(att, axis=-1, keepdims=True)
            ex = jnp.exp(att - mx)
            p = ex * pl.reciprocal(jnp.sum(ex, axis=-1, keepdims=True),
                                   approx=True)
            ctx = jnp.einsum('bqk,bkd->bqd', p, v,
                             preferred_element_type=jnp.float32).reshape(T, D)
            # output projection: sum over heads of (T,D) @ (D,H)
            attn_out = attn_out + jnp.dot(ctx, wo_ref[l, h],
                                          preferred_element_type=jnp.float32)

        x1 = _layernorm(x + attn_out, ln1g, ln1b)

        # FFN on flattened tokens
        ff = jnp.dot(x1, w1_ref[l], preferred_element_type=jnp.float32) + b1_ref[l]
        # TODO(synk): HF/PyTorch BERT uses exact erf GELU; tanh approx here.
        ff = jax.nn.gelu(ff, approximate=True)
        ff = jnp.dot(ff, w2_ref[l], preferred_element_type=jnp.float32) + b2
        x = _layernorm(x1 + ff, ln2g, ln2b)

    # ---- DMCNN dynamic multi-pooling + tanh (ref does max(h*m + 1) - 1) ----
    h3 = x.reshape(B, S, H)
    # TODO(synk): nn.Dropout(p=keepProb) treated as identity (inference mode).
    pL = jnp.max(h3 * maskL_ref[...][:, :, None] + 1.0, axis=1) - 1.0   # (B, H)
    pR = jnp.max(h3 * maskR_ref[...][:, :, None] + 1.0, axis=1) - 1.0
    repL = jnp.tanh(pL)
    repR = jnp.tanh(pR)

    # ---- classifier head: logits = repL @ W_L + repR @ W_R + b (no concat)
    logits = (jnp.dot(repL, mw_ref[0], preferred_element_type=jnp.float32)
              + jnp.dot(repR, mw_ref[1], preferred_element_type=jnp.float32)
              + mb_ref[...])                                            # (B, E)

    mlg = jnp.max(logits, axis=1, keepdims=True)
    eg = jnp.exp(logits - mlg)
    sg = jnp.sum(eg, axis=1, keepdims=True)
    scores = eg * pl.reciprocal(sg, approx=True)

    # CrossEntropyLoss (mean); one vectorized compare builds the one-hot
    classes = lax.broadcasted_iota(jnp.int32, (B, DIM_E), 1)
    onehot = classes == label_ref[...]                      # (B,E) vs (B,1)
    picked = jnp.sum(jnp.where(onehot, logits, 0.0), axis=1, keepdims=True)
    lse = mlg + jnp.log(sg)
    loss = jnp.sum(lse - picked, keepdims=True) * (1.0 / B)             # (1, 1)

    # preds = torch.max(scores, 1): values + first-max index
    pval = jnp.max(scores, axis=1, keepdims=True)                       # (B, 1)
    cand = jnp.where(logits == mlg, classes, DIM_E)
    pidx_f = jnp.min(cand, axis=1, keepdims=True).astype(jnp.float32)   # (B, 1)

    # ---- lane-dense (B, 128) output slab via direct sub-range stores ----
    out_ref[...] = jnp.zeros((B, OUT_LANES), jnp.float32)
    out_ref[:, 0:DIM_E] = scores
    out_ref[:, DIM_E:DIM_E + 1] = pval
    out_ref[:, DIM_E + 1:DIM_E + 2] = pidx_f
    out_ref[:, DIM_E + 2:DIM_E + 3] = jnp.broadcast_to(loss, (B, 1))


# ======================= parameters & packing ============================
def init_params(key):
    def nrm(k, shape, std=0.02):
        return std * jax.random.normal(k, shape, jnp.float32)

    keys = iter(jax.random.split(key, 8 + 8 * N_LAYERS))
    p = {
        'word_emb': nrm(next(keys), (VOCAB, HIDDEN)),
        'pos_emb': nrm(next(keys), (SEN_LEN, HIDDEN)),
        'type_emb': nrm(next(keys), (2, HIDDEN)),
        'emb_ln_g': jnp.ones((1, HIDDEN), jnp.float32),
        'emb_ln_b': jnp.zeros((1, HIDDEN), jnp.float32),
    }
    layers = []
    for _ in range(N_LAYERS):
        layers.append((
            nrm(next(keys), (HIDDEN, HIDDEN)), jnp.zeros((1, HIDDEN), jnp.float32),  # Wq, bq
            nrm(next(keys), (HIDDEN, HIDDEN)), jnp.zeros((1, HIDDEN), jnp.float32),  # Wk, bk
            nrm(next(keys), (HIDDEN, HIDDEN)), jnp.zeros((1, HIDDEN), jnp.float32),  # Wv, bv
            nrm(next(keys), (HIDDEN, HIDDEN)), jnp.zeros((1, HIDDEN), jnp.float32),  # Wo, bo
            jnp.ones((1, HIDDEN), jnp.float32), jnp.zeros((1, HIDDEN), jnp.float32), # LN1
            nrm(next(keys), (HIDDEN, FFN)), jnp.zeros((1, FFN), jnp.float32),        # W1, b1
            nrm(next(keys), (FFN, HIDDEN)), jnp.zeros((1, HIDDEN), jnp.float32),     # W2, b2
            jnp.ones((1, HIDDEN), jnp.float32), jnp.zeros((1, HIDDEN), jnp.float32), # LN2
        ))
    p['layers'] = layers
    p['M_w'] = nrm(next(keys), (ENCODED_DIM, DIM_E))   # nn.Linear(EncodedDim, dimE)
    p['M_b'] = jnp.zeros((1, DIM_E), jnp.float32)
    return p


def pack_params(p):
    """One-time packing: per-head weight split, layer stacking, vec packing."""
    scale = 1.0 / math.sqrt(HEAD_D)

    def heads_cols(W):      # (H, H) -> (N, H, D); head h = columns h*D:(h+1)*D
        return jnp.transpose(W.reshape(HIDDEN, N_HEADS, HEAD_D), (1, 0, 2))

    def heads_bias(bv):     # (1, H) -> (N, D)
        return bv.reshape(N_HEADS, HEAD_D)

    wqkv, bqkv, wo, vecs, w1, b1, w2 = [], [], [], [], [], [], []
    for (Wq, bq, Wk, bk, Wv, bv, Wo, bo, g1, be1,
         W1, B1, W2, B2, g2, be2) in p['layers']:
        # 1/sqrt(d) folded into the Q weight/bias once, at pack time
        wqkv.append(jnp.concatenate([heads_cols(Wq * scale),
                                     heads_cols(Wk),
                                     heads_cols(Wv)], axis=0))      # (3N, H, D)
        bqkv.append(jnp.concatenate([heads_bias(bq * scale),
                                     heads_bias(bk),
                                     heads_bias(bv)], axis=0))      # (3N, D)
        wo.append(Wo.reshape(N_HEADS, HEAD_D, HIDDEN))              # (N, D, H)
        vecs.append(jnp.concatenate([bo, g1, be1, B2, g2, be2], axis=0))  # (6, H)
        w1.append(W1); b1.append(B1); w2.append(W2)
    return {
        'word_emb': p['word_emb'],
        'pos_type': p['pos_emb'] + p['type_emb'][0][None, :],       # (S, H)
        'emb_ln': jnp.concatenate([p['emb_ln_g'], p['emb_ln_b']], axis=0),  # (2, H)
        'wqkv': jnp.stack(wqkv), 'bqkv': jnp.stack(bqkv), 'wo': jnp.stack(wo),
        'vecs': jnp.stack(vecs), 'w1': jnp.stack(w1), 'b1': jnp.stack(b1),
        'w2': jnp.stack(w2),
        'mw': jnp.stack([p['M_w'][:HIDDEN], p['M_w'][HIDDEN:]]),    # (2, H, E)
        'mb': p['M_b'],
    }


def _cost_estimate(B):
    T = B * SEN_LEN
    NB = N_HEADS * B
    per_layer = (2 * T * HIDDEN * 3 * HIDDEN                      # QKV projections
                 + 2 * 2 * NB * SEN_LEN * SEN_LEN * HEAD_D        # scores + ctx
                 + 2 * T * HIDDEN * HIDDEN                        # output proj
                 + 2 * T * HIDDEN * FFN + 2 * T * FFN * HIDDEN)   # FFN
    flops = N_LAYERS * per_layer + 2 * B * ENCODED_DIM * DIM_E
    transcendentals = (N_LAYERS * (NB * SEN_LEN * SEN_LEN + T * FFN)
                       + B * (DIM_E + ENCODED_DIM))
    return flops, transcendentals


# ============================ forward ====================================
def discriminator_forward(packed, inp, inMask, maskL, maskR, label):
    B, S = inp.shape

    # glue: token-id embedding gather only; pos/type adds, embedding LN and
    # the additive attention mask are all computed inside the fused kernel.
    emb = jnp.take(packed['word_emb'], inp, axis=0)                 # (B, S, H)

    operands = (emb, inMask.astype(jnp.float32),
                maskL.astype(jnp.float32), maskR.astype(jnp.float32),
                label.astype(jnp.int32).reshape(B, 1),
                packed['pos_type'], packed['emb_ln'],
                packed['wqkv'], packed['bqkv'], packed['wo'], packed['vecs'],
                packed['w1'], packed['b1'], packed['w2'],
                packed['mw'], packed['mb'])

    vmem = pl.BlockSpec(memory_space=pltpu.MemorySpace.VMEM)
    in_specs = [vmem] * len(operands)

    flops, transc = _cost_estimate(B)
    bytes_accessed = (sum(int(x.size) * x.dtype.itemsize for x in operands)
                      + B * OUT_LANES * 4)

    # NOTE: grid-less single program is intentional at B=2 (per-step grid
    # overhead would dominate); a batch grid with dimension_semantics=
    # ("parallel",) is the scaling path for v7x / large B.
    slab = pl.pallas_call(
        discriminator_kernel,
        out_shape=jax.ShapeDtypeStruct((B, OUT_LANES), jnp.float32),
        in_specs=in_specs,
        out_specs=vmem,
        compiler_params=pltpu.CompilerParams(vmem_limit_bytes=32 * 1024 * 1024),
        cost_estimate=pl.CostEstimate(flops=flops, transcendentals=transc,
                                      bytes_accessed=bytes_accessed),
    )(*operands)

    scores = slab[:, :DIM_E]
    pred_vals = slab[:, DIM_E]
    pred_idx = slab[:, DIM_E + 1].astype(jnp.int32)
    loss = slab[0, DIM_E + 2]
    return loss, scores, (pred_vals, pred_idx)


# ================================ main ===================================
if __name__ == "__main__":
    key = jax.random.PRNGKey(0)
    pkey, ikey, mkey, lkey = jax.random.split(key, 4)

    params = init_params(pkey)
    packed = pack_params(params)      # one-time weight packing (not per call)

    B = 2
    inp = jax.random.randint(ikey, (B, SEN_LEN), 0, VOCAB, dtype=jnp.int32)
    inMask = jnp.ones((B, SEN_LEN), jnp.float32)
    # dynamic-multi-pooling masks around a "trigger" position per example
    trig = jax.random.randint(mkey, (B, 1), 1, SEN_LEN - 1, dtype=jnp.int32)
    pos = jnp.arange(SEN_LEN, dtype=jnp.int32)[None, :]
    maskL = (pos <= trig).astype(jnp.float32)
    maskR = (pos >= trig).astype(jnp.float32)
    label = jax.random.randint(lkey, (B,), 0, DIM_E, dtype=jnp.int32)

    fwd = jax.jit(discriminator_forward)
    loss, scores, (pred_vals, pred_idx) = fwd(
        packed, inp, inMask, maskL, maskR, label)
    jax.block_until_ready((loss, scores, pred_vals, pred_idx))
    print("KERNEL_OK")
</pallas_src>

<mosaic_0001>
module attributes {stable_mosaic.version = 11 : i64} {
  func.func @discriminator_kernel(%arg0: memref<2x8x32xf32, #tpu.memory_space<vmem>>, %arg1: memref<2x8xf32, #tpu.memory_space<vmem>>, %arg2: memref<2x8xf32, #tpu.memory_space<vmem>>, %arg3: memref<2x8xf32, #tpu.memory_space<vmem>>, %arg4: memref<2x1xi32, #tpu.memory_space<vmem>>, %arg5: memref<8x32xf32, #tpu.memory_space<vmem>>, %arg6: memref<2x32xf32, #tpu.memory_space<vmem>>, %arg7: memref<2x12x32x8xf32, #tpu.memory_space<vmem>>, %arg8: memref<2x12x8xf32, #tpu.memory_space<vmem>>, %arg9: memref<2x4x8x32xf32, #tpu.memory_space<vmem>>, %arg10: memref<2x6x32xf32, #tpu.memory_space<vmem>>, %arg11: memref<2x32x64xf32, #tpu.memory_space<vmem>>, %arg12: memref<2x1x64xf32, #tpu.memory_space<vmem>>, %arg13: memref<2x64x32xf32, #tpu.memory_space<vmem>>, %arg14: memref<2x32x5xf32, #tpu.memory_space<vmem>>, %arg15: memref<1x5xf32, #tpu.memory_space<vmem>>, %arg16: memref<2x128xf32, #tpu.memory_space<vmem>>) attributes {dimension_semantics = [], scalar_prefetch = 0 : i64, scratch_operands = 0 : i64, tpu.core_type = #tpu.core_type<tc>} {
    %c0 = arith.constant 0 : index
    %c0_0 = arith.constant 0 : index
    %0 = vector.load %arg6[%c0, %c0_0] : memref<2x32xf32, #tpu.memory_space<vmem>>, vector<2x32xf32>
    %c0_1 = arith.constant 0 : index
    %c0_2 = arith.constant 0 : index
    %c0_3 = arith.constant 0 : index
    %1 = vector.load %arg0[%c0_1, %c0_2, %c0_3] : memref<2x8x32xf32, #tpu.memory_space<vmem>>, vector<2x8x32xf32>
    %c0_4 = arith.constant 0 : index
    %c0_5 = arith.constant 0 : index
    %2 = vector.load %arg5[%c0_4, %c0_5] : memref<8x32xf32, #tpu.memory_space<vmem>>, vector<8x32xf32>
    %3 = vector.shape_cast %2 : vector<8x32xf32> to vector<1x8x32xf32>
    %4 = vector.broadcast %3 : vector<1x8x32xf32> to vector<2x8x32xf32>
    %5 = arith.addf %1, %4 : vector<2x8x32xf32>
    %6 = vector.shape_cast %5 : vector<2x8x32xf32> to vector<16x32xf32>
    %7 = vector.extract_strided_slice %0 {offsets = [0, 0], sizes = [1, 32], strides = [1, 1]} : vector<2x32xf32> to vector<1x32xf32>
    %8 = vector.extract_strided_slice %0 {offsets = [1, 0], sizes = [1, 32], strides = [1, 1]} : vector<2x32xf32> to vector<1x32xf32>
    %cst = arith.constant dense<0.000000e+00> : vector<16xf32>
    %9 = vector.multi_reduction <add>, %6, %cst [1] : vector<16x32xf32> to vector<16xf32>
    %10 = vector.shape_cast %9 : vector<16xf32> to vector<16x1xf32>
    %cst_6 = arith.constant 3.200000e+01 : f32
    %11 = vector.broadcast %cst_6 : f32 to vector<16x1xf32>
    %12 = arith.divf %10, %11 : vector<16x1xf32>
    %13 = vector.broadcast %12 : vector<16x1xf32> to vector<16x32xf32>
    %14 = arith.subf %6, %13 : vector<16x32xf32>
    %15 = arith.mulf %14, %14 : vector<16x32xf32>
    %cst_7 = arith.constant dense<0.000000e+00> : vector<16xf32>
    %16 = vector.multi_reduction <add>, %15, %cst_7 [1] : vector<16x32xf32> to vector<16xf32>
    %17 = vector.shape_cast %16 : vector<16xf32> to vector<16x1xf32>
    %cst_8 = arith.constant 3.200000e+01 : f32
    %18 = vector.broadcast %cst_8 : f32 to vector<16x1xf32>
    %19 = arith.divf %17, %18 : vector<16x1xf32>
    %20 = vector.broadcast %12 : vector<16x1xf32> to vector<16x32xf32>
    %21 = arith.subf %6, %20 : vector<16x32xf32>
    %cst_9 = arith.constant 9.99999996E-13 : f32
    %22 = vector.broadcast %cst_9 : f32 to vector<16x1xf32>
    %23 = arith.addf %19, %22 : vector<16x1xf32>
    %24 = math.rsqrt %23 : vector<16x1xf32>
    %25 = vector.broadcast %24 : vector<16x1xf32> to vector<16x32xf32>
    %26 = arith.mulf %21, %25 : vector<16x32xf32>
    %27 = vector.broadcast %7 : vector<1x32xf32> to vector<16x32xf32>
    %28 = arith.mulf %26, %27 : vector<16x32xf32>
    %29 = vector.broadcast %8 : vector<1x32xf32> to vector<16x32xf32>
    %30 = arith.addf %28, %29 : vector<16x32xf32>
    %c0_10 = arith.constant 0 : index
    %c0_11 = arith.constant 0 : index
    %31 = vector.load %arg1[%c0_10, %c0_11] : memref<2x8xf32, #tpu.memory_space<vmem>>, vector<2x8xf32>
    %cst_12 = arith.constant 1.000000e+00 : f32
    %32 = vector.broadcast %cst_12 : f32 to vector<2x8xf32>
    %33 = arith.subf %32, %31 : vector<2x8xf32>
    %cst_13 = arith.constant -1.000000e+04 : f32
    %34 = vector.broadcast %cst_13 : f32 to vector<2x8xf32>
    %35 = arith.mulf %33, %34 : vector<2x8xf32>
    %36 = vector.shape_cast %35 : vector<2x8xf32> to vector<2x1x8xf32>
    %c0_14 = arith.constant 0 : index
    %c0_15 = arith.constant 0 : index
    %c0_16 = arith.constant 0 : index
    %37 = vector.load %arg10[%c0_14, %c0_15, %c0_16] : memref<2x6x32xf32, #tpu.memory_space<vmem>>, vector<1x6x32xf32>
    %38 = vector.shape_cast %37 : vector<1x6x32xf32> to vector<6x32xf32>
    %39 = vector.extract_strided_slice %38 {offsets = [0, 0], sizes = [1, 32], strides = [1, 1]} : vector<6x32xf32> to vector<1x32xf32>
    %40 = vector.extract_strided_slice %38 {offsets = [1, 0], sizes = [1, 32], strides = [1, 1]} : vector<6x32xf32> to vector<1x32xf32>
    %41 = vector.extract_strided_slice %38 {offsets = [2, 0], sizes = [1, 32], strides = [1, 1]} : vector<6x32xf32> to vector<1x32xf32>
    %42 = vector.extract_strided_slice %38 {offsets = [3, 0], sizes = [1, 32], strides = [1, 1]} : vector<6x32xf32> to vector<1x32xf32>
    %43 = vector.extract_strided_slice %38 {offsets = [4, 0], sizes = [1, 32], strides = [1, 1]} : vector<6x32xf32> to vector<1x32xf32>
    %44 = vector.extract_strided_slice %38 {offsets = [5, 0], sizes = [1, 32], strides = [1, 1]} : vector<6x32xf32> to vector<1x32xf32>
    %c0_17 = arith.constant 0 : index
    %c0_18 = arith.constant 0 : index
    %c0_19 = arith.constant 0 : index
    %c0_20 = arith.constant 0 : index
    %45 = vector.load %arg7[%c0_17, %c0_18, %c0_19, %c0_20] : memref<2x12x32x8xf32, #tpu.memory_space<vmem>>, vector<1x1x32x8xf32>
    %46 = vector.shape_cast %45 : vector<1x1x32x8xf32> to vector<32x8xf32>
    %cst_21 = arith.constant dense<0.000000e+00> : vector<16x8xf32>
    %47 = tpu.matmul %30, %46, %cst_21 {dimension_numbers = #tpu.dot_dimension_numbers<[1], [0], [0], [1], [0, 0, 1, 1], [], []>} : vector<16x32xf32>, vector<32x8xf32>, vector<16x8xf32> -> vector<16x8xf32>
    %c0_22 = arith.constant 0 : index
    %c0_23 = arith.constant 0 : index
    %c0_24 = arith.constant 0 : index
    %48 = vector.load %arg8[%c0_22, %c0_23, %c0_24] : memref<2x12x8xf32, #tpu.memory_space<vmem>>, vector<1x1x8xf32>
    %49 = vector.shape_cast %48 : vector<1x1x8xf32> to vector<1x8xf32>
    %50 = vector.broadcast %49 : vector<1x8xf32> to vector<16x8xf32>
    %51 = arith.addf %47, %50 : vector<16x8xf32>
    %52 = vector.shape_cast %51 : vector<16x8xf32> to vector<2x8x8xf32>
    %c0_25 = arith.constant 0 : index
    %c4 = arith.constant 4 : index
    %c0_26 = arith.constant 0 : index
    %c0_27 = arith.constant 0 : index
    %53 = vector.load %arg7[%c0_25, %c4, %c0_26, %c0_27] : memref<2x12x32x8xf32, #tpu.memory_space<vmem>>, vector<1x1x32x8xf32>
    %54 = vector.shape_cast %53 : vector<1x1x32x8xf32> to vector<32x8xf32>
    %cst_28 = arith.constant dense<0.000000e+00> : vector<16x8xf32>
    %55 = tpu.matmul %30, %54, %cst_28 {dimension_numbers = #tpu.dot_dimension_numbers<[1], [0], [0], [1], [0, 0, 1, 1], [], []>} : vector<16x32xf32>, vector<32x8xf32>, vector<16x8xf32> -> vector<16x8xf32>
    %c0_29 = arith.constant 0 : index
    %c4_30 = arith.constant 4 : index
    %c0_31 = arith.constant 0 : index
    %56 = vector.load %arg8[%c0_29, %c4_30, %c0_31] : memref<2x12x8xf32, #tpu.memory_space<vmem>>, vector<1x1x8xf32>
    %57 = vector.shape_cast %56 : vector<1x1x8xf32> to vector<1x8xf32>
    %58 = vector.broadcast %57 : vector<1x8xf32> to vector<16x8xf32>
    %59 = arith.addf %55, %58 : vector<16x8xf32>
    %60 = vector.shape_cast %59 : vector<16x8xf32> to vector<2x8x8xf32>
    %c0_32 = arith.constant 0 : index
    %c8 = arith.constant 8 : index
    %c0_33 = arith.constant 0 : index
    %c0_34 = arith.constant 0 : index
    %61 = vector.load %arg7[%c0_32, %c8, %c0_33, %c0_34] : memref<2x12x32x8xf32, #tpu.memory_space<vmem>>, vector<1x1x32x8xf32>
    %62 = vector.shape_cast %61 : vector<1x1x32x8xf32> to vector<32x8xf32>
    %cst_35 = arith.constant dense<0.000000e+00> : vector<16x8xf32>
    %63 = tpu.matmul %30, %62, %cst_35 {dimension_numbers = #tpu.dot_dimension_numbers<[1], [0], [0], [1], [0, 0, 1, 1], [], []>} : vector<16x32xf32>, vector<32x8xf32>, vector<16x8xf32> -> vector<16x8xf32>
    %c0_36 = arith.constant 0 : index
    %c8_37 = arith.constant 8 : index
    %c0_38 = arith.constant 0 : index
    %64 = vector.load %arg8[%c0_36, %c8_37, %c0_38] : memref<2x12x8xf32, #tpu.memory_space<vmem>>, vector<1x1x8xf32>
    %65 = vector.shape_cast %64 : vector<1x1x8xf32> to vector<1x8xf32>
    %66 = vector.broadcast %65 : vector<1x8xf32> to vector<16x8xf32>
    %67 = arith.addf %63, %66 : vector<16x8xf32>
    %68 = vector.shape_cast %67 : vector<16x8xf32> to vector<2x8x8xf32>
    "tpu.trace_start"() <{level = 10 : i32, message = "bqd,bkd->bqk"}> : () -> ()
    %cst_39 = arith.constant dense<0.000000e+00> : vector<2x8x8xf32>
    %69 = tpu.matmul %52, %60, %cst_39 {dimension_numbers = #tpu.dot_dimension_numbers<[2], [2], [1], [1], [0, 0, 0, 1, 1, 1], [0], [0]>} : vector<2x8x8xf32>, vector<2x8x8xf32>, vector<2x8x8xf32> -> vector<2x8x8xf32>
    "tpu.trace_stop"() : () -> ()
    %70 = vector.broadcast %36 : vector<2x1x8xf32> to vector<2x8x8xf32>
    %71 = arith.addf %69, %70 : vector<2x8x8xf32>
    %cst_40 = arith.constant dense<0xFF800000> : vector<2x8xf32>
    %72 = vector.multi_reduction <maximumf>, %71, %cst_40 [2] : vector<2x8x8xf32> to vector<2x8xf32>
    %73 = vector.shape_cast %72 : vector<2x8xf32> to vector<2x8x1xf32>
    %74 = vector.broadcast %73 : vector<2x8x1xf32> to vector<2x8x8xf32>
    %75 = arith.subf %71, %74 : vector<2x8x8xf32>
    %76 = math.exp %75 : vector<2x8x8xf32>
    %cst_41 = arith.constant dense<0.000000e+00> : vector<2x8xf32>
    %77 = vector.multi_reduction <add>, %76, %cst_41 [2] : vector<2x8x8xf32> to vector<2x8xf32>
    %78 = vector.shape_cast %77 : vector<2x8xf32> to vector<2x8x1xf32>
    %79 = tpu.reciprocal %78 {approx = true} : vector<2x8x1xf32> -> vector<2x8x1xf32>
    %80 = vector.broadcast %79 : vector<2x8x1xf32> to vector<2x8x8xf32>
    %81 = arith.mulf %76, %80 : vector<2x8x8xf32>
    "tpu.trace_start"() <{level = 10 : i32, message = "bqk,bkd->bqd"}> : () -> ()
    %cst_42 = arith.constant dense<0.000000e+00> : vector<2x8x8xf32>
    %82 = tpu.matmul %81, %68, %cst_42 {dimension_numbers = #tpu.dot_dimension_numbers<[2], [1], [1], [2], [0, 0, 0, 1, 1, 2], [0], [0]>} : vector<2x8x8xf32>, vector<2x8x8xf32>, vector<2x8x8xf32> -> vector<2x8x8xf32>
    "tpu.trace_stop"() : () -> ()
    %83 = vector.shape_cast %82 : vector<2x8x8xf32> to vector<16x8xf32>
    %c0_43 = arith.constant 0 : index
    %c0_44 = arith.constant 0 : index
    %c0_45 = arith.constant 0 : index
    %c0_46 = arith.constant 0 : index
    %84 = vector.load %arg9[%c0_43, %c0_44, %c0_45, %c0_46] : memref<2x4x8x32xf32, #tpu.memory_space<vmem>>, vector<1x1x8x32xf32>
    %85 = vector.shape_cast %84 : vector<1x1x8x32xf32> to vector<8x32xf32>
    %cst_47 = arith.constant dense<0.000000e+00> : vector<16x32xf32>
    %86 = tpu.matmul %83, %85, %cst_47 {dimension_numbers = #tpu.dot_dimension_numbers<[1], [0], [0], [1], [0, 0, 1, 1], [], []>} : vector<16x8xf32>, vector<8x32xf32>, vector<16x32xf32> -> vector<16x32xf32>
    %87 = vector.broadcast %39 : vector<1x32xf32> to vector<16x32xf32>
    %88 = arith.addf %87, %86 : vector<16x32xf32>
    %c0_48 = arith.constant 0 : index
    %c1 = arith.constant 1 : index
    %c0_49 = arith.constant 0 : index
    %c0_50 = arith.constant 0 : index
    %89 = vector.load %arg7[%c0_48, %c1, %c0_49, %c0_50] : memref<2x12x32x8xf32, #tpu.memory_space<vmem>>, vector<1x1x32x8xf32>
    %90 = vector.shape_cast %89 : vector<1x1x32x8xf32> to vector<32x8xf32>
    %cst_51 = arith.constant dense<0.000000e+00> : vector<16x8xf32>
    %91 = tpu.matmul %30, %90, %cst_51 {dimension_numbers = #tpu.dot_dimension_numbers<[1], [0], [0], [1], [0, 0, 1, 1], [], []>} : vector<16x32xf32>, vector<32x8xf32>, vector<16x8xf32> -> vector<16x8xf32>
    %c0_52 = arith.constant 0 : index
    %c1_53 = arith.constant 1 : index
    %c0_54 = arith.constant 0 : index
    %92 = vector.load %arg8[%c0_52, %c1_53, %c0_54] : memref<2x12x8xf32, #tpu.memory_space<vmem>>, vector<1x1x8xf32>
    %93 = vector.shape_cast %92 : vector<1x1x8xf32> to vector<1x8xf32>
    %94 = vector.broadcast %93 : vector<1x8xf32> to vector<16x8xf32>
    %95 = arith.addf %91, %94 : vector<16x8xf32>
    %96 = vector.shape_cast %95 : vector<16x8xf32> to vector<2x8x8xf32>
    %c0_55 = arith.constant 0 : index
    %c5 = arith.constant 5 : index
    %c0_56 = arith.constant 0 : index
    %c0_57 = arith.constant 0 : index
    %97 = vector.load %arg7[%c0_55, %c5, %c0_56, %c0_57] : memref<2x12x32x8xf32, #tpu.memory_space<vmem>>, vector<1x1x32x8xf32>
    %98 = vector.shape_cast %97 : vector<1x1x32x8xf32> to vector<32x8xf32>
    %cst_58 = arith.constant dense<0.000000e+00> : vector<16x8xf32>
    %99 = tpu.matmul %30, %98, %cst_58 {dimension_numbers = #tpu.dot_dimension_numbers<[1], [0], [0], [1], [0, 0, 1, 1], [], []>} : vector<16x32xf32>, vector<32x8xf32>, vector<16x8xf32> -> vector<16x8xf32>
    %c0_59 = arith.constant 0 : index
    %c5_60 = arith.constant 5 : index
    %c0_61 = arith.constant 0 : index
    %100 = vector.load %arg8[%c0_59, %c5_60, %c0_61] : memref<2x12x8xf32, #tpu.memory_space<vmem>>, vector<1x1x8xf32>
    %101 = vector.shape_cast %100 : vector<1x1x8xf32> to vector<1x8xf32>
    %102 = vector.broadcast %101 : vector<1x8xf32> to vector<16x8xf32>
    %103 = arith.addf %99, %102 : vector<16x8xf32>
    %104 = vector.shape_cast %103 : vector<16x8xf32> to vector<2x8x8xf32>
    %c0_62 = arith.constant 0 : index
    %c9 = arith.constant 9 : index
    %c0_63 = arith.constant 0 : index
    %c0_64 = arith.constant 0 : index
    %105 = vector.load %arg7[%c0_62, %c9, %c0_63, %c0_64] : memref<2x12x32x8xf32, #tpu.memory_space<vmem>>, vector<1x1x32x8xf32>
    %106 = vector.shape_cast %105 : vector<1x1x32x8xf32> to vector<32x8xf32>
    %cst_65 = arith.constant dense<0.000000e+00> : vector<16x8xf32>
    %107 = tpu.matmul %30, %106, %cst_65 {dimension_numbers = #tpu.dot_dimension_numbers<[1], [0], [0], [1], [0, 0, 1, 1], [], []>} : vector<16x32xf32>, vector<32x8xf32>, vector<16x8xf32> -> vector<16x8xf32>
    %c0_66 = arith.constant 0 : index
    %c9_67 = arith.constant 9 : index
    %c0_68 = arith.constant 0 : index
    %108 = vector.load %arg8[%c0_66, %c9_67, %c0_68] : memref<2x12x8xf32, #tpu.memory_space<vmem>>, vector<1x1x8xf32>
    %109 = vector.shape_cast %108 : vector<1x1x8xf32> to vector<1x8xf32>
    %110 = vector.broadcast %109 : vector<1x8xf32> to vector<16x8xf32>
    %111 = arith.addf %107, %110 : vector<16x8xf32>
    %112 = vector.shape_cast %111 : vector<16x8xf32> to vector<2x8x8xf32>
    "tpu.trace_start"() <{level = 10 : i32, message = "bqd,bkd->bqk"}> : () -> ()
    %cst_69 = arith.constant dense<0.000000e+00> : vector<2x8x8xf32>
    %113 = tpu.matmul %96, %104, %cst_69 {dimension_numbers = #tpu.dot_dimension_numbers<[2], [2], [1], [1], [0, 0, 0, 1, 1, 1], [0], [0]>} : vector<2x8x8xf32>, vector<2x8x8xf32>, vector<2x8x8xf32> -> vector<2x8x8xf32>
    "tpu.trace_stop"() : () -> ()
    %114 = vector.broadcast %36 : vector<2x1x8xf32> to vector<2x8x8xf32>
    %115 = arith.addf %113, %114 : vector<2x8x8xf32>
    %cst_70 = arith.constant dense<0xFF800000> : vector<2x8xf32>
    %116 = vector.multi_reduction <maximumf>, %115, %cst_70 [2] : vector<2x8x8xf32> to vector<2x8xf32>
    %117 = vector.shape_cast %116 : vector<2x8xf32> to vector<2x8x1xf32>
    %118 = vector.broadcast %117 : vector<2x8x1xf32> to vector<2x8x8xf32>
    %119 = arith.subf %115, %118 : vector<2x8x8xf32>
    %120 = math.exp %119 : vector<2x8x8xf32>
    %cst_71 = arith.constant dense<0.000000e+00> : vector<2x8xf32>
    %121 = vector.multi_reduction <add>, %120, %cst_71 [2] : vector<2x8x8xf32> to vector<2x8xf32>
    %122 = vector.shape_cast %121 : vector<2x8xf32> to vector<2x8x1xf32>
    %123 = tpu.reciprocal %122 {approx = true} : vector<2x8x1xf32> -> vector<2x8x1xf32>
    %124 = vector.broadcast %123 : vector<2x8x1xf32> to vector<2x8x8xf32>
    %125 = arith.mulf %120, %124 : vector<2x8x8xf32>
    "tpu.trace_start"() <{level = 10 : i32, message = "bqk,bkd->bqd"}> : () -> ()
    %cst_72 = arith.constant dense<0.000000e+00> : vector<2x8x8xf32>
    %126 = tpu.matmul %125, %112, %cst_72 {dimension_numbers = #tpu.dot_dimension_numbers<[2], [1], [1], [2], [0, 0, 0, 1, 1, 2], [0], [0]>} : vector<2x8x8xf32>, vector<2x8x8xf32>, vector<2x8x8xf32> -> vector<2x8x8xf32>
    "tpu.trace_stop"() : () -> ()
    %127 = vector.shape_cast %126 : vector<2x8x8xf32> to vector<16x8xf32>
    %c0_73 = arith.constant 0 : index
    %c1_74 = arith.constant 1 : index
    %c0_75 = arith.constant 0 : index
    %c0_76 = arith.constant 0 : index
    %128 = vector.load %arg9[%c0_73, %c1_74, %c0_75, %c0_76] : memref<2x4x8x32xf32, #tpu.memory_space<vmem>>, vector<1x1x8x32xf32>
    %129 = vector.shape_cast %128 : vector<1x1x8x32xf32> to vector<8x32xf32>
    %cst_77 = arith.constant dense<0.000000e+00> : vector<16x32xf32>
    %130 = tpu.matmul %127, %129, %cst_77 {dimension_numbers = #tpu.dot_dimension_numbers<[1], [0], [0], [1], [0, 0, 1, 1], [], []>} : vector<16x8xf32>, vector<8x32xf32>, vector<16x32xf32> -> vector<16x32xf32>
    %131 = arith.addf %88, %130 : vector<16x32xf32>
    %c0_78 = arith.constant 0 : index
    %c2 = arith.constant 2 : index
    %c0_79 = arith.constant 0 : index
    %c0_80 = arith.constant 0 : index
    %132 = vector.load %arg7[%c0_78, %c2, %c0_79, %c0_80] : memref<2x12x32x8xf32, #tpu.memory_space<vmem>>, vector<1x1x32x8xf32>
    %133 = vector.shape_cast %132 : vector<1x1x32x8xf32> to vector<32x8xf32>
    %cst_81 = arith.constant dense<0.000000e+00> : vector<16x8xf32>
    %134 = tpu.matmul %30, %133, %cst_81 {dimension_numbers = #tpu.dot_dimension_numbers<[1], [0], [0], [1], [0, 0, 1, 1], [], []>} : vector<16x32xf32>, vector<32x8xf32>, vector<16x8xf32> -> vector<16x8xf32>
    %c0_82 = arith.constant 0 : index
    %c2_83 = arith.constant 2 : index
    %c0_84 = arith.constant 0 : index
    %135 = vector.load %arg8[%c0_82, %c2_83, %c0_84] : memref<2x12x8xf32, #tpu.memory_space<vmem>>, vector<1x1x8xf32>
    %136 = vector.shape_cast %135 : vector<1x1x8xf32> to vector<1x8xf32>
    %137 = vector.broadcast %136 : vector<1x8xf32> to vector<16x8xf32>
    %138 = arith.addf %134, %137 : vector<16x8xf32>
    %139 = vector.shape_cast %138 : vector<16x8xf32> to vector<2x8x8xf32>
    %c0_85 = arith.constant 0 : index
    %c6 = arith.constant 6 : index
    %c0_86 = arith.constant 0 : index
    %c0_87 = arith.constant 0 : index
    %140 = vector.load %arg7[%c0_85, %c6, %c0_86, %c0_87] : memref<2x12x32x8xf32, #tpu.memory_space<vmem>>, vector<1x1x32x8xf32>
    %141 = vector.shape_cast %140 : vector<1x1x32x8xf32> to vector<32x8xf32>
    %cst_88 = arith.constant dense<0.000000e+00> : vector<16x8xf32>
    %142 = tpu.matmul %30, %141, %cst_88 {dimension_numbers = #tpu.dot_dimension_numbers<[1], [0], [0], [1], [0, 0, 1, 1], [], []>} : vector<16x32xf32>, vector<32x8xf32>, vector<16x8xf32> -> vector<16x8xf32>
    %c0_89 = arith.constant 0 : index
    %c6_90 = arith.constant 6 : index
    %c0_91 = arith.constant 0 : index
    %143 = vector.load %arg8[%c0_89, %c6_90, %c0_91] : memref<2x12x8xf32, #tpu.memory_space<vmem>>, vector<1x1x8xf32>
    %144 = vector.shape_cast %143 : vector<1x1x8xf32> to vector<1x8xf32>
    %145 = vector.broadcast %144 : vector<1x8xf32> to vector<16x8xf32>
    %146 = arith.addf %142, %145 : vector<16x8xf32>
    %147 = vector.shape_cast %146 : vector<16x8xf32> to vector<2x8x8xf32>
    %c0_92 = arith.constant 0 : index
    %c10 = arith.constant 10 : index
    %c0_93 = arith.constant 0 : index
    %c0_94 = arith.constant 0 : index
    %148 = vector.load %arg7[%c0_92, %c10, %c0_93, %c0_94] : memref<2x12x32x8xf32, #tpu.memory_space<vmem>>, vector<1x1x32x8xf32>
    %149 = vector.shape_cast %148 : vector<1x1x32x8xf32> to vector<32x8xf32>
    %cst_95 = arith.constant dense<0.000000e+00> : vector<16x8xf32>
    %150 = tpu.matmul %30, %149, %cst_95 {dimension_numbers = #tpu.dot_dimension_numbers<[1], [0], [0], [1], [0, 0, 1, 1], [], []>} : vector<16x32xf32>, vector<32x8xf32>, vector<16x8xf32> -> vector<16x8xf32>
    %c0_96 = arith.constant 0 : index
    %c10_97 = arith.constant 10 : index
    %c0_98 = arith.constant 0 : index
    %151 = vector.load %arg8[%c0_96, %c10_97, %c0_98] : memref<2x12x8xf32, #tpu.memory_space<vmem>>, vector<1x1x8xf32>
    %152 = vector.shape_cast %151 : vector<1x1x8xf32> to vector<1x8xf32>
    %153 = vector.broadcast %152 : vector<1x8xf32> to vector<16x8xf32>
    %154 = arith.addf %150, %153 : vector<16x8xf32>
    %155 = vector.shape_cast %154 : vector<16x8xf32> to vector<2x8x8xf32>
    "tpu.trace_start"() <{level = 10 : i32, message = "bqd,bkd->bqk"}> : () -> ()
    %cst_99 = arith.constant dense<0.000000e+00> : vector<2x8x8xf32>
    %156 = tpu.matmul %139, %147, %cst_99 {dimension_numbers = #tpu.dot_dimension_numbers<[2], [2], [1], [1], [0, 0, 0, 1, 1, 1], [0], [0]>} : vector<2x8x8xf32>, vector<2x8x8xf32>, vector<2x8x8xf32> -> vector<2x8x8xf32>
    "tpu.trace_stop"() : () -> ()
    %157 = vector.broadcast %36 : vector<2x1x8xf32> to vector<2x8x8xf32>
    %158 = arith.addf %156, %157 : vector<2x8x8xf32>
    %cst_100 = arith.constant dense<0xFF800000> : vector<2x8xf32>
    %159 = vector.multi_reduction <maximumf>, %158, %cst_100 [2] : vector<2x8x8xf32> to vector<2x8xf32>
    %160 = vector.shape_cast %159 : vector<2x8xf32> to vector<2x8x1xf32>
    %161 = vector.broadcast %160 : vector<2x8x1xf32> to vector<2x8x8xf32>
    %162 = arith.subf %158, %161 : vector<2x8x8xf32>
    %163 = math.exp %162 : vector<2x8x8xf32>
    %cst_101 = arith.constant dense<0.000000e+00> : vector<2x8xf32>
    %164 = vector.multi_reduction <add>, %163, %cst_101 [2] : vector<2x8x8xf32> to vector<2x8xf32>
    %165 = vector.shape_cast %164 : vector<2x8xf32> to vector<2x8x1xf32>
    %166 = tpu.reciprocal %165 {approx = true} : vector<2x8x1xf32> -> vector<2x8x1xf32>
    %167 = vector.broadcast %166 : vector<2x8x1xf32> to vector<2x8x8xf32>
    %168 = arith.mulf %163, %167 : vector<2x8x8xf32>
    "tpu.trace_start"() <{level = 10 : i32, message = "bqk,bkd->bqd"}> : () -> ()
    %cst_102 = arith.constant dense<0.000000e+00> : vector<2x8x8xf32>
    %169 = tpu.matmul %168, %155, %cst_102 {dimension_numbers = #tpu.dot_dimension_numbers<[2], [1], [1], [2], [0, 0, 0, 1, 1, 2], [0], [0]>} : vector<2x8x8xf32>, vector<2x8x8xf32>, vector<2x8x8xf32> -> vector<2x8x8xf32>
    "tpu.trace_stop"() : () -> ()
    %170 = vector.shape_cast %169 : vector<2x8x8xf32> to vector<16x8xf32>
    %c0_103 = arith.constant 0 : index
    %c2_104 = arith.constant 2 : index
    %c0_105 = arith.constant 0 : index
    %c0_106 = arith.constant 0 : index
    %171 = vector.load %arg9[%c0_103, %c2_104, %c0_105, %c0_106] : memref<2x4x8x32xf32, #tpu.memory_space<vmem>>, vector<1x1x8x32xf32>
    %172 = vector.shape_cast %171 : vector<1x1x8x32xf32> to vector<8x32xf32>
    %cst_107 = arith.constant dense<0.000000e+00> : vector<16x32xf32>
    %173 = tpu.matmul %170, %172, %cst_107 {dimension_numbers = #tpu.dot_dimension_numbers<[1], [0], [0], [1], [0, 0, 1, 1], [], []>} : vector<16x8xf32>, vector<8x32xf32>, vector<16x32xf32> -> vector<16x32xf32>
    %174 = arith.addf %131, %173 : vector<16x32xf32>
    %c0_108 = arith.constant 0 : index
    %c3 = arith.constant 3 : index
    %c0_109 = arith.constant 0 : index
    %c0_110 = arith.constant 0 : index
    %175 = vector.load %arg7[%c0_108, %c3, %c0_109, %c0_110] : memref<2x12x32x8xf32, #tpu.memory_space<vmem>>, vector<1x1x32x8xf32>
    %176 = vector.shape_cast %175 : vector<1x1x32x8xf32> to vector<32x8xf32>
    %cst_111 = arith.constant dense<0.000000e+00> : vector<16x8xf32>
    %177 = tpu.matmul %30, %176, %cst_111 {dimension_numbers = #tpu.dot_dimension_numbers<[1], [0], [0], [1], [0, 0, 1, 1], [], []>} : vector<16x32xf32>, vector<32x8xf32>, vector<16x8xf32> -> vector<16x8xf32>
    %c0_112 = arith.constant 0 : index
    %c3_113 = arith.constant 3 : index
    %c0_114 = arith.constant 0 : index
    %178 = vector.load %arg8[%c0_112, %c3_113, %c0_114] : memref<2x12x8xf32, #tpu.memory_space<vmem>>, vector<1x1x8xf32>
    %179 = vector.shape_cast %178 : vector<1x1x8xf32> to vector<1x8xf32>
    %180 = vector.broadcast %179 : vector<1x8xf32> to vector<16x8xf32>
    %181 = arith.addf %177, %180 : vector<16x8xf32>
    %182 = vector.shape_cast %181 : vector<16x8xf32> to vector<2x8x8xf32>
    %c0_115 = arith.constant 0 : index
    %c7 = arith.constant 7 : index
    %c0_116 = arith.constant 0 : index
    %c0_117 = arith.constant 0 : index
    %183 = vector.load %arg7[%c0_115, %c7, %c0_116, %c0_117] : memref<2x12x32x8xf32, #tpu.memory_space<vmem>>, vector<1x1x32x8xf32>
    %184 = vector.shape_cast %183 : vector<1x1x32x8xf32> to vector<32x8xf32>
    %cst_118 = arith.constant dense<0.000000e+00> : vector<16x8xf32>
    %185 = tpu.matmul %30, %184, %cst_118 {dimension_numbers = #tpu.dot_dimension_numbers<[1], [0], [0], [1], [0, 0, 1, 1], [], []>} : vector<16x32xf32>, vector<32x8xf32>, vector<16x8xf32> -> vector<16x8xf32>
    %c0_119 = arith.constant 0 : index
    %c7_120 = arith.constant 7 : index
    %c0_121 = arith.constant 0 : index
    %186 = vector.load %arg8[%c0_119, %c7_120, %c0_121] : memref<2x12x8xf32, #tpu.memory_space<vmem>>, vector<1x1x8xf32>
    %187 = vector.shape_cast %186 : vector<1x1x8xf32> to vector<1x8xf32>
    %188 = vector.broadcast %187 : vector<1x8xf32> to vector<16x8xf32>
    %189 = arith.addf %185, %188 : vector<16x8xf32>
    %190 = vector.shape_cast %189 : vector<16x8xf32> to vector<2x8x8xf32>
    %c0_122 = arith.constant 0 : index
    %c11 = arith.constant 11 : index
    %c0_123 = arith.constant 0 : index
    %c0_124 = arith.constant 0 : index
    %191 = vector.load %arg7[%c0_122, %c11, %c0_123, %c0_124] : memref<2x12x32x8xf32, #tpu.memory_space<vmem>>, vector<1x1x32x8xf32>
    %192 = vector.shape_cast %191 : vector<1x1x32x8xf32> to vector<32x8xf32>
    %cst_125 = arith.constant dense<0.000000e+00> : vector<16x8xf32>
    %193 = tpu.matmul %30, %192, %cst_125 {dimension_numbers = #tpu.dot_dimension_numbers<[1], [0], [0], [1], [0, 0, 1, 1], [], []>} : vector<16x32xf32>, vector<32x8xf32>, vector<16x8xf32> -> vector<16x8xf32>
    %c0_126 = arith.constant 0 : index
    %c11_127 = arith.constant 11 : index
    %c0_128 = arith.constant 0 : index
    %194 = vector.load %arg8[%c0_126, %c11_127, %c0_128] : memref<2x12x8xf32, #tpu.memory_space<vmem>>, vector<1x1x8xf32>
    %195 = vector.shape_cast %194 : vector<1x1x8xf32> to vector<1x8xf32>
    %196 = vector.broadcast %195 : vector<1x8xf32> to vector<16x8xf32>
    %197 = arith.addf %193, %196 : vector<16x8xf32>
    %198 = vector.shape_cast %197 : vector<16x8xf32> to vector<2x8x8xf32>
    "tpu.trace_start"() <{level = 10 : i32, message = "bqd,bkd->bqk"}> : () -> ()
    %cst_129 = arith.constant dense<0.000000e+00> : vector<2x8x8xf32>
    %199 = tpu.matmul %182, %190, %cst_129 {dimension_numbers = #tpu.dot_dimension_numbers<[2], [2], [1], [1], [0, 0, 0, 1, 1, 1], [0], [0]>} : vector<2x8x8xf32>, vector<2x8x8xf32>, vector<2x8x8xf32> -> vector<2x8x8xf32>
    "tpu.trace_stop"() : () -> ()
    %200 = vector.broadcast %36 : vector<2x1x8xf32> to vector<2x8x8xf32>
    %201 = arith.addf %199, %200 : vector<2x8x8xf32>
    %cst_130 = arith.constant dense<0xFF800000> : vector<2x8xf32>
    %202 = vector.multi_reduction <maximumf>, %201, %cst_130 [2] : vector<2x8x8xf32> to vector<2x8xf32>
    %203 = vector.shape_cast %202 : vector<2x8xf32> to vector<2x8x1xf32>
    %204 = vector.broadcast %203 : vector<2x8x1xf32> to vector<2x8x8xf32>
    %205 = arith.subf %201, %204 : vector<2x8x8xf32>
    %206 = math.exp %205 : vector<2x8x8xf32>
    %cst_131 = arith.constant dense<0.000000e+00> : vector<2x8xf32>
    %207 = vector.multi_reduction <add>, %206, %cst_131 [2] : vector<2x8x8xf32> to vector<2x8xf32>
    %208 = vector.shape_cast %207 : vector<2x8xf32> to vector<2x8x1xf32>
    %209 = tpu.reciprocal %208 {approx = true} : vector<2x8x1xf32> -> vector<2x8x1xf32>
    %210 = vector.broadcast %209 : vector<2x8x1xf32> to vector<2x8x8xf32>
    %211 = arith.mulf %206, %210 : vector<2x8x8xf32>
    "tpu.trace_start"() <{level = 10 : i32, message = "bqk,bkd->bqd"}> : () -> ()
    %cst_132 = arith.constant dense<0.000000e+00> : vector<2x8x8xf32>
    %212 = tpu.matmul %211, %198, %cst_132 {dimension_numbers = #tpu.dot_dimension_numbers<[2], [1], [1], [2], [0, 0, 0, 1, 1, 2], [0], [0]>} : vector<2x8x8xf32>, vector<2x8x8xf32>, vector<2x8x8xf32> -> vector<2x8x8xf32>
    "tpu.trace_stop"() : () -> ()
    %213 = vector.shape_cast %212 : vector<2x8x8xf32> to vector<16x8xf32>
    %c0_133 = arith.constant 0 : index
    %c3_134 = arith.constant 3 : index
    %c0_135 = arith.constant 0 : index
    %c0_136 = arith.constant 0 : index
    %214 = vector.load %arg9[%c0_133, %c3_134, %c0_135, %c0_136] : memref<2x4x8x32xf32, #tpu.memory_space<vmem>>, vector<1x1x8x32xf32>
    %215 = vector.shape_cast %214 : vector<1x1x8x32xf32> to vector<8x32xf32>
    %cst_137 = arith.constant dense<0.000000e+00> : vector<16x32xf32>
    %216 = tpu.matmul %213, %215, %cst_137 {dimension_numbers = #tpu.dot_dimension_numbers<[1], [0], [0], [1], [0, 0, 1, 1], [], []>} : vector<16x8xf32>, vector<8x32xf32>, vector<16x32xf32> -> vector<16x32xf32>
    %217 = arith.addf %174, %216 : vector<16x32xf32>
    %218 = arith.addf %30, %217 : vector<16x32xf32>
    %cst_138 = arith.constant dense<0.000000e+00> : vector<16xf32>
    %219 = vector.multi_reduction <add>, %218, %cst_138 [1] : vector<16x32xf32> to vector<16xf32>
    %220 = vector.shape_cast %219 : vector<16xf32> to vector<16x1xf32>
    %cst_139 = arith.constant 3.200000e+01 : f32
    %221 = vector.broadcast %cst_139 : f32 to vector<16x1xf32>
    %222 = arith.divf %220, %221 : vector<16x1xf32>
    %223 = vector.broadcast %222 : vector<16x1xf32> to vector<16x32xf32>
    %224 = arith.subf %218, %223 : vector<16x32xf32>
    %225 = arith.mulf %224, %224 : vector<16x32xf32>
    %cst_140 = arith.constant dense<0.000000e+00> : vector<16xf32>
    %226 = vector.multi_reduction <add>, %225, %cst_140 [1] : vector<16x32xf32> to vector<16xf32>
    %227 = vector.shape_cast %226 : vector<16xf32> to vector<16x1xf32>
    %cst_141 = arith.constant 3.200000e+01 : f32
    %228 = vector.broadcast %cst_141 : f32 to vector<16x1xf32>
    %229 = arith.divf %227, %228 : vector<16x1xf32>
    %230 = vector.broadcast %222 : vector<16x1xf32> to vector<16x32xf32>
    %231 = arith.subf %218, %230 : vector<16x32xf32>
    %cst_142 = arith.constant 9.99999996E-13 : f32
    %232 = vector.broadcast %cst_142 : f32 to vector<16x1xf32>
    %233 = arith.addf %229, %232 : vector<16x1xf32>
    %234 = math.rsqrt %233 : vector<16x1xf32>
    %235 = vector.broadcast %234 : vector<16x1xf32> to vector<16x32xf32>
    %236 = arith.mulf %231, %235 : vector<16x32xf32>
    %237 = vector.broadcast %40 : vector<1x32xf32> to vector<16x32xf32>
    %238 = arith.mulf %236, %237 : vector<16x32xf32>
    %239 = vector.broadcast %41 : vector<1x32xf32> to vector<16x32xf32>
    %240 = arith.addf %238, %239 : vector<16x32xf32>
    %c0_143 = arith.constant 0 : index
    %c0_144 = arith.constant 0 : index
    %c0_145 = arith.constant 0 : index
    %241 = vector.load %arg11[%c0_143, %c0_144, %c0_145] : memref<2x32x64xf32, #tpu.memory_space<vmem>>, vector<1x32x64xf32>
    %242 = vector.shape_cast %241 : vector<1x32x64xf32> to vector<32x64xf32>
    %cst_146 = arith.constant dense<0.000000e+00> : vector<16x64xf32>
    %243 = tpu.matmul %240, %242, %cst_146 {dimension_numbers = #tpu.dot_dimension_numbers<[1], [0], [0], [1], [0, 0, 1, 1], [], []>} : vector<16x32xf32>, vector<32x64xf32>, vector<16x64xf32> -> vector<16x64xf32>
    %c0_147 = arith.constant 0 : index
    %c0_148 = arith.constant 0 : index
    %c0_149 = arith.constant 0 : index
    %244 = vector.load %arg12[%c0_147, %c0_148, %c0_149] : memref<2x1x64xf32, #tpu.memory_space<vmem>>, vector<1x1x64xf32>
    %245 = vector.shape_cast %244 : vector<1x1x64xf32> to vector<1x64xf32>
    %246 = vector.broadcast %245 : vector<1x64xf32> to vector<16x64xf32>
    %247 = arith.addf %243, %246 : vector<16x64xf32>
    %248 = arith.mulf %247, %247 : vector<16x64xf32>
    %249 = arith.mulf %247, %248 : vector<16x64xf32>
    %cst_150 = arith.constant 4.471500e-02 : f32
    %250 = vector.broadcast %cst_150 : f32 to vector<16x64xf32>
    %251 = arith.mulf %250, %249 : vector<16x64xf32>
    %252 = arith.addf %247, %251 : vector<16x64xf32>
    %cst_151 = arith.constant 0.797884583 : f32
    %253 = vector.broadcast %cst_151 : f32 to vector<16x64xf32>
    %254 = arith.mulf %253, %252 : vector<16x64xf32>
    %255 = math.tanh %254 : vector<16x64xf32>
    %cst_152 = arith.constant 1.000000e+00 : f32
    %256 = vector.broadcast %cst_152 : f32 to vector<16x64xf32>
    %257 = arith.addf %256, %255 : vector<16x64xf32>
    %cst_153 = arith.constant 5.000000e-01 : f32
    %258 = vector.broadcast %cst_153 : f32 to vector<16x64xf32>
    %259 = arith.mulf %258, %257 : vector<16x64xf32>
    %260 = arith.mulf %247, %259 : vector<16x64xf32>
    %c0_154 = arith.constant 0 : index
    %c0_155 = arith.constant 0 : index
    %c0_156 = arith.constant 0 : index
    %261 = vector.load %arg13[%c0_154, %c0_155, %c0_156] : memref<2x64x32xf32, #tpu.memory_space<vmem>>, vector<1x64x32xf32>
    %262 = vector.shape_cast %261 : vector<1x64x32xf32> to vector<64x32xf32>
    %cst_157 = arith.constant dense<0.000000e+00> : vector<16x32xf32>
    %263 = tpu.matmul %260, %262, %cst_157 {dimension_numbers = #tpu.dot_dimension_numbers<[1], [0], [0], [1], [0, 0, 1, 1], [], []>} : vector<16x64xf32>, vector<64x32xf32>, vector<16x32xf32> -> vector<16x32xf32>
    %264 = vector.broadcast %42 : vector<1x32xf32> to vector<16x32xf32>
    %265 = arith.addf %263, %264 : vector<16x32xf32>
    %266 = arith.addf %240, %265 : vector<16x32xf32>
    %cst_158 = arith.constant dense<0.000000e+00> : vector<16xf32>
    %267 = vector.multi_reduction <add>, %266, %cst_158 [1] : vector<16x32xf32> to vector<16xf32>
    %268 = vector.shape_cast %267 : vector<16xf32> to vector<16x1xf32>
    %cst_159 = arith.constant 3.200000e+01 : f32
    %269 = vector.broadcast %cst_159 : f32 to vector<16x1xf32>
    %270 = arith.divf %268, %269 : vector<16x1xf32>
    %271 = vector.broadcast %270 : vector<16x1xf32> to vector<16x32xf32>
    %272 = arith.subf %266, %271 : vector<16x32xf32>
    %273 = arith.mulf %272, %272 : vector<16x32xf32>
    %cst_160 = arith.constant dense<0.000000e+00> : vector<16xf32>
    %274 = vector.multi_reduction <add>, %273, %cst_160 [1] : vector<16x32xf32> to vector<16xf32>
    %275 = vector.shape_cast %274 : vector<16xf32> to vector<16x1xf32>
    %cst_161 = arith.constant 3.200000e+01 : f32
    %276 = vector.broadcast %cst_161 : f32 to vector<16x1xf32>
    %277 = arith.divf %275, %276 : vector<16x1xf32>
    %278 = vector.broadcast %270 : vector<16x1xf32> to vector<16x32xf32>
    %279 = arith.subf %266, %278 : vector<16x32xf32>
    %cst_162 = arith.constant 9.99999996E-13 : f32
    %280 = vector.broadcast %cst_162 : f32 to vector<16x1xf32>
    %281 = arith.addf %277, %280 : vector<16x1xf32>
    %282 = math.rsqrt %281 : vector<16x1xf32>
    %283 = vector.broadcast %282 : vector<16x1xf32> to vector<16x32xf32>
    %284 = arith.mulf %279, %283 : vector<16x32xf32>
    %285 = vector.broadcast %43 : vector<1x32xf32> to vector<16x32xf32>
    %286 = arith.mulf %284, %285 : vector<16x32xf32>
    %287 = vector.broadcast %44 : vector<1x32xf32> to vector<16x32xf32>
    %288 = arith.addf %286, %287 : vector<16x32xf32>
    %c1_163 = arith.constant 1 : index
    %c0_164 = arith.constant 0 : index
    %c0_165 = arith.constant 0 : index
    %289 = vector.load %arg10[%c1_163, %c0_164, %c0_165] : memref<2x6x32xf32, #tpu.memory_space<vmem>>, vector<1x6x32xf32>
    %290 = vector.shape_cast %289 : vector<1x6x32xf32> to vector<6x32xf32>
    %291 = vector.extract_strided_slice %290 {offsets = [0, 0], sizes = [1, 32], strides = [1, 1]} : vector<6x32xf32> to vector<1x32xf32>
    %292 = vector.extract_strided_slice %290 {offsets = [1, 0], sizes = [1, 32], strides = [1, 1]} : vector<6x32xf32> to vector<1x32xf32>
    %293 = vector.extract_strided_slice %290 {offsets = [2, 0], sizes = [1, 32], strides = [1, 1]} : vector<6x32xf32> to vector<1x32xf32>
    %294 = vector.extract_strided_slice %290 {offsets = [3, 0], sizes = [1, 32], strides = [1, 1]} : vector<6x32xf32> to vector<1x32xf32>
    %295 = vector.extract_strided_slice %290 {offsets = [4, 0], sizes = [1, 32], strides = [1, 1]} : vector<6x32xf32> to vector<1x32xf32>
    %296 = vector.extract_strided_slice %290 {offsets = [5, 0], sizes = [1, 32], strides = [1, 1]} : vector<6x32xf32> to vector<1x32xf32>
    %c1_166 = arith.constant 1 : index
    %c0_167 = arith.constant 0 : index
    %c0_168 = arith.constant 0 : index
    %c0_169 = arith.constant 0 : index
    %297 = vector.load %arg7[%c1_166, %c0_167, %c0_168, %c0_169] : memref<2x12x32x8xf32, #tpu.memory_space<vmem>>, vector<1x1x32x8xf32>
    %298 = vector.shape_cast %297 : vector<1x1x32x8xf32> to vector<32x8xf32>
    %cst_170 = arith.constant dense<0.000000e+00> : vector<16x8xf32>
    %299 = tpu.matmul %288, %298, %cst_170 {dimension_numbers = #tpu.dot_dimension_numbers<[1], [0], [0], [1], [0, 0, 1, 1], [], []>} : vector<16x32xf32>, vector<32x8xf32>, vector<16x8xf32> -> vector<16x8xf32>
    %c1_171 = arith.constant 1 : index
    %c0_172 = arith.constant 0 : index
    %c0_173 = arith.constant 0 : index
    %300 = vector.load %arg8[%c1_171, %c0_172, %c0_173] : memref<2x12x8xf32, #tpu.memory_space<vmem>>, vector<1x1x8xf32>
    %301 = vector.shape_cast %300 : vector<1x1x8xf32> to vector<1x8xf32>
    %302 = vector.broadcast %301 : vector<1x8xf32> to vector<16x8xf32>
    %303 = arith.addf %299, %302 : vector<16x8xf32>
    %304 = vector.shape_cast %303 : vector<16x8xf32> to vector<2x8x8xf32>
    %c1_174 = arith.constant 1 : index
    %c4_175 = arith.constant 4 : index
    %c0_176 = arith.constant 0 : index
    %c0_177 = arith.constant 0 : index
    %305 = vector.load %arg7[%c1_174, %c4_175, %c0_176, %c0_177] : memref<2x12x32x8xf32, #tpu.memory_space<vmem>>, vector<1x1x32x8xf32>
    %306 = vector.shape_cast %305 : vector<1x1x32x8xf32> to vector<32x8xf32>
    %cst_178 = arith.constant dense<0.000000e+00> : vector<16x8xf32>
    %307 = tpu.matmul %288, %306, %cst_178 {dimension_numbers = #tpu.dot_dimension_numbers<[1], [0], [0], [1], [0, 0, 1, 1], [], []>} : vector<16x32xf32>, vector<32x8xf32>, vector<16x8xf32> -> vector<16x8xf32>
    %c1_179 = arith.constant 1 : index
    %c4_180 = arith.constant 4 : index
    %c0_181 = arith.constant 0 : index
    %308 = vector.load %arg8[%c1_179, %c4_180, %c0_181] : memref<2x12x8xf32, #tpu.memory_space<vmem>>, vector<1x1x8xf32>
    %309 = vector.shape_cast %308 : vector<1x1x8xf32> to vector<1x8xf32>
    %310 = vector.broadcast %309 : vector<1x8xf32> to vector<16x8xf32>
    %311 = arith.addf %307, %310 : vector<16x8xf32>
    %312 = vector.shape_cast %311 : vector<16x8xf32> to vector<2x8x8xf32>
    %c1_182 = arith.constant 1 : index
    %c8_183 = arith.constant 8 : index
    %c0_184 = arith.constant 0 : index
    %c0_185 = arith.constant 0 : index
    %313 = vector.load %arg7[%c1_182, %c8_183, %c0_184, %c0_185] : memref<2x12x32x8xf32, #tpu.memory_space<vmem>>, vector<1x1x32x8xf32>
    %314 = vector.shape_cast %313 : vector<1x1x32x8xf32> to vector<32x8xf32>
    %cst_186 = arith.constant dense<0.000000e+00> : vector<16x8xf32>
    %315 = tpu.matmul %288, %314, %cst_186 {dimension_numbers = #tpu.dot_dimension_numbers<[1], [0], [0], [1], [0, 0, 1, 1], [], []>} : vector<16x32xf32>, vector<32x8xf32>, vector<16x8xf32> -> vector<16x8xf32>
    %c1_187 = arith.constant 1 : index
    %c8_188 = arith.constant 8 : index
    %c0_189 = arith.constant 0 : index
    %316 = vector.load %arg8[%c1_187, %c8_188, %c0_189] : memref<2x12x8xf32, #tpu.memory_space<vmem>>, vector<1x1x8xf32>
    %317 = vector.shape_cast %316 : vector<1x1x8xf32> to vector<1x8xf32>
    %318 = vector.broadcast %317 : vector<1x8xf32> to vector<16x8xf32>
    %319 = arith.addf %315, %318 : vector<16x8xf32>
    %320 = vector.shape_cast %319 : vector<16x8xf32> to vector<2x8x8xf32>
    "tpu.trace_start"() <{level = 10 : i32, message = "bqd,bkd->bqk"}> : () -> ()
    %cst_190 = arith.constant dense<0.000000e+00> : vector<2x8x8xf32>
    %321 = tpu.matmul %304, %312, %cst_190 {dimension_numbers = #tpu.dot_dimension_numbers<[2], [2], [1], [1], [0, 0, 0, 1, 1, 1], [0], [0]>} : vector<2x8x8xf32>, vector<2x8x8xf32>, vector<2x8x8xf32> -> vector<2x8x8xf32>
    "tpu.trace_stop"() : () -> ()
    %322 = vector.broadcast %36 : vector<2x1x8xf32> to vector<2x8x8xf32>
    %323 = arith.addf %321, %322 : vector<2x8x8xf32>
    %cst_191 = arith.constant dense<0xFF800000> : vector<2x8xf32>
    %324 = vector.multi_reduction <maximumf>, %323, %cst_191 [2] : vector<2x8x8xf32> to vector<2x8xf32>
    %325 = vector.shape_cast %324 : vector<2x8xf32> to vector<2x8x1xf32>
    %326 = vector.broadcast %325 : vector<2x8x1xf32> to vector<2x8x8xf32>
    %327 = arith.subf %323, %326 : vector<2x8x8xf32>
    %328 = math.exp %327 : vector<2x8x8xf32>
    %cst_192 = arith.constant dense<0.000000e+00> : vector<2x8xf32>
    %329 = vector.multi_reduction <add>, %328, %cst_192 [2] : vector<2x8x8xf32> to vector<2x8xf32>
    %330 = vector.shape_cast %329 : vector<2x8xf32> to vector<2x8x1xf32>
    %331 = tpu.reciprocal %330 {approx = true} : vector<2x8x1xf32> -> vector<2x8x1xf32>
    %332 = vector.broadcast %331 : vector<2x8x1xf32> to vector<2x8x8xf32>
    %333 = arith.mulf %328, %332 : vector<2x8x8xf32>
    "tpu.trace_start"() <{level = 10 : i32, message = "bqk,bkd->bqd"}> : () -> ()
    %cst_193 = arith.constant dense<0.000000e+00> : vector<2x8x8xf32>
    %334 = tpu.matmul %333, %320, %cst_193 {dimension_numbers = #tpu.dot_dimension_numbers<[2], [1], [1], [2], [0, 0, 0, 1, 1, 2], [0], [0]>} : vector<2x8x8xf32>, vector<2x8x8xf32>, vector<2x8x8xf32> -> vector<2x8x8xf32>
    "tpu.trace_stop"() : () -> ()
    %335 = vector.shape_cast %334 : vector<2x8x8xf32> to vector<16x8xf32>
    %c1_194 = arith.constant 1 : index
    %c0_195 = arith.constant 0 : index
    %c0_196 = arith.constant 0 : index
    %c0_197 = arith.constant 0 : index
    %336 = vector.load %arg9[%c1_194, %c0_195, %c0_196, %c0_197] : memref<2x4x8x32xf32, #tpu.memory_space<vmem>>, vector<1x1x8x32xf32>
    %337 = vector.shape_cast %336 : vector<1x1x8x32xf32> to vector<8x32xf32>
    %cst_198 = arith.constant dense<0.000000e+00> : vector<16x32xf32>
    %338 = tpu.matmul %335, %337, %cst_198 {dimension_numbers = #tpu.dot_dimension_numbers<[1], [0], [0], [1], [0, 0, 1, 1], [], []>} : vector<16x8xf32>, vector<8x32xf32>, vector<16x32xf32> -> vector<16x32xf32>
    %339 = vector.broadcast %291 : vector<1x32xf32> to vector<16x32xf32>
    %340 = arith.addf %339, %338 : vector<16x32xf32>
    %c1_199 = arith.constant 1 : index
    %c1_200 = arith.constant 1 : index
    %c0_201 = arith.constant 0 : index
    %c0_202 = arith.constant 0 : index
    %341 = vector.load %arg7[%c1_199, %c1_200, %c0_201, %c0_202] : memref<2x12x32x8xf32, #tpu.memory_space<vmem>>, vector<1x1x32x8xf32>
    %342 = vector.shape_cast %341 : vector<1x1x32x8xf32> to vector<32x8xf32>
    %cst_203 = arith.constant dense<0.000000e+00> : vector<16x8xf32>
    %343 = tpu.matmul %288, %342, %cst_203 {dimension_numbers = #tpu.dot_dimension_numbers<[1], [0], [0], [1], [0, 0, 1, 1], [], []>} : vector<16x32xf32>, vector<32x8xf32>, vector<16x8xf32> -> vector<16x8xf32>
    %c1_204 = arith.constant 1 : index
    %c1_205 = arith.constant 1 : index
    %c0_206 = arith.constant 0 : index
    %344 = vector.load %arg8[%c1_204, %c1_205, %c0_206] : memref<2x12x8xf32, #tpu.memory_space<vmem>>, vector<1x1x8xf32>
    %345 = vector.shape_cast %344 : vector<1x1x8xf32> to vector<1x8xf32>
    %346 = vector.broadcast %345 : vector<1x8xf32> to vector<16x8xf32>
    %347 = arith.addf %343, %346 : vector<16x8xf32>
    %348 = vector.shape_cast %347 : vector<16x8xf32> to vector<2x8x8xf32>
    %c1_207 = arith.constant 1 : index
    %c5_208 = arith.constant 5 : index
    %c0_209 = arith.constant 0 : index
    %c0_210 = arith.constant 0 : index
    %349 = vector.load %arg7[%c1_207, %c5_208, %c0_209, %c0_210] : memref<2x12x32x8xf32, #tpu.memory_space<vmem>>, vector<1x1x32x8xf32>
    %350 = vector.shape_cast %349 : vector<1x1x32x8xf32> to vector<32x8xf32>
    %cst_211 = arith.constant dense<0.000000e+00> : vector<16x8xf32>
    %351 = tpu.matmul %288, %350, %cst_211 {dimension_numbers = #tpu.dot_dimension_numbers<[1], [0], [0], [1], [0, 0, 1, 1], [], []>} : vector<16x32xf32>, vector<32x8xf32>, vector<16x8xf32> -> vector<16x8xf32>
    %c1_212 = arith.constant 1 : index
    %c5_213 = arith.constant 5 : index
    %c0_214 = arith.constant 0 : index
    %352 = vector.load %arg8[%c1_212, %c5_213, %c0_214] : memref<2x12x8xf32, #tpu.memory_space<vmem>>, vector<1x1x8xf32>
    %353 = vector.shape_cast %352 : vector<1x1x8xf32> to vector<1x8xf32>
    %354 = vector.broadcast %353 : vector<1x8xf32> to vector<16x8xf32>
    %355 = arith.addf %351, %354 : vector<16x8xf32>
    %356 = vector.shape_cast %355 : vector<16x8xf32> to vector<2x8x8xf32>
    %c1_215 = arith.constant 1 : index
    %c9_216 = arith.constant 9 : index
    %c0_217 = arith.constant 0 : index
    %c0_218 = arith.constant 0 : index
    %357 = vector.load %arg7[%c1_215, %c9_216, %c0_217, %c0_218] : memref<2x12x32x8xf32, #tpu.memory_space<vmem>>, vector<1x1x32x8xf32>
    %358 = vector.shape_cast %357 : vector<1x1x32x8xf32> to vector<32x8xf32>
    %cst_219 = arith.constant dense<0.000000e+00> : vector<16x8xf32>
    %359 = tpu.matmul %288, %358, %cst_219 {dimension_numbers = #tpu.dot_dimension_numbers<[1], [0], [0], [1], [0, 0, 1, 1], [], []>} : vector<16x32xf32>, vector<32x8xf32>, vector<16x8xf32> -> vector<16x8xf32>
    %c1_220 = arith.constant 1 : index
    %c9_221 = arith.constant 9 : index
    %c0_222 = arith.constant 0 : index
    %360 = vector.load %arg8[%c1_220, %c9_221, %c0_222] : memref<2x12x8xf32, #tpu.memory_space<vmem>>, vector<1x1x8xf32>
    %361 = vector.shape_cast %360 : vector<1x1x8xf32> to vector<1x8xf32>
    %362 = vector.broadcast %361 : vector<1x8xf32> to vector<16x8xf32>
    %363 = arith.addf %359, %362 : vector<16x8xf32>
    %364 = vector.shape_cast %363 : vector<16x8xf32> to vector<2x8x8xf32>
    "tpu.trace_start"() <{level = 10 : i32, message = "bqd,bkd->bqk"}> : () -> ()
    %cst_223 = arith.constant dense<0.000000e+00> : vector<2x8x8xf32>
    %365 = tpu.matmul %348, %356, %cst_223 {dimension_numbers = #tpu.dot_dimension_numbers<[2], [2], [1], [1], [0, 0, 0, 1, 1, 1], [0], [0]>} : vector<2x8x8xf32>, vector<2x8x8xf32>, vector<2x8x8xf32> -> vector<2x8x8xf32>
    "tpu.trace_stop"() : () -> ()
    %366 = vector.broadcast %36 : vector<2x1x8xf32> to vector<2x8x8xf32>
    %367 = arith.addf %365, %366 : vector<2x8x8xf32>
    %cst_224 = arith.constant dense<0xFF800000> : vector<2x8xf32>
    %368 = vector.multi_reduction <maximumf>, %367, %cst_224 [2] : vector<2x8x8xf32> to vector<2x8xf32>
    %369 = vector.shape_cast %368 : vector<2x8xf32> to vector<2x8x1xf32>
    %370 = vector.broadcast %369 : vector<2x8x1xf32> to vector<2x8x8xf32>
    %371 = arith.subf %367, %370 : vector<2x8x8xf32>
    %372 = math.exp %371 : vector<2x8x8xf32>
    %cst_225 = arith.constant dense<0.000000e+00> : vector<2x8xf32>
    %373 = vector.multi_reduction <add>, %372, %cst_225 [2] : vector<2x8x8xf32> to vector<2x8xf32>
    %374 = vector.shape_cast %373 : vector<2x8xf32> to vector<2x8x1xf32>
    %375 = tpu.reciprocal %374 {approx = true} : vector<2x8x1xf32> -> vector<2x8x1xf32>
    %376 = vector.broadcast %375 : vector<2x8x1xf32> to vector<2x8x8xf32>
    %377 = arith.mulf %372, %376 : vector<2x8x8xf32>
    "tpu.trace_start"() <{level = 10 : i32, message = "bqk,bkd->bqd"}> : () -> ()
    %cst_226 = arith.constant dense<0.000000e+00> : vector<2x8x8xf32>
    %378 = tpu.matmul %377, %364, %cst_226 {dimension_numbers = #tpu.dot_dimension_numbers<[2], [1], [1], [2], [0, 0, 0, 1, 1, 2], [0], [0]>} : vector<2x8x8xf32>, vector<2x8x8xf32>, vector<2x8x8xf32> -> vector<2x8x8xf32>
    "tpu.trace_stop"() : () -> ()
    %379 = vector.shape_cast %378 : vector<2x8x8xf32> to vector<16x8xf32>
    %c1_227 = arith.constant 1 : index
    %c1_228 = arith.constant 1 : index
    %c0_229 = arith.constant 0 : index
    %c0_230 = arith.constant 0 : index
    %380 = vector.load %arg9[%c1_227, %c1_228, %c0_229, %c0_230] : memref<2x4x8x32xf32, #tpu.memory_space<vmem>>, vector<1x1x8x32xf32>
    %381 = vector.shape_cast %380 : vector<1x1x8x32xf32> to vector<8x32xf32>
    %cst_231 = arith.constant dense<0.000000e+00> : vector<16x32xf32>
    %382 = tpu.matmul %379, %381, %cst_231 {dimension_numbers = #tpu.dot_dimension_numbers<[1], [0], [0], [1], [0, 0, 1, 1], [], []>} : vector<16x8xf32>, vector<8x32xf32>, vector<16x32xf32> -> vector<16x32xf32>
    %383 = arith.addf %340, %382 : vector<16x32xf32>
    %c1_232 = arith.constant 1 : index
    %c2_233 = arith.constant 2 : index
    %c0_234 = arith.constant 0 : index
    %c0_235 = arith.constant 0 : index
    %384 = vector.load %arg7[%c1_232, %c2_233, %c0_234, %c0_235] : memref<2x12x32x8xf32, #tpu.memory_space<vmem>>, vector<1x1x32x8xf32>
    %385 = vector.shape_cast %384 : vector<1x1x32x8xf32> to vector<32x8xf32>
    %cst_236 = arith.constant dense<0.000000e+00> : vector<16x8xf32>
    %386 = tpu.matmul %288, %385, %cst_236 {dimension_numbers = #tpu.dot_dimension_numbers<[1], [0], [0], [1], [0, 0, 1, 1], [], []>} : vector<16x32xf32>, vector<32x8xf32>, vector<16x8xf32> -> vector<16x8xf32>
    %c1_237 = arith.constant 1 : index
    %c2_238 = arith.constant 2 : index
    %c0_239 = arith.constant 0 : index
    %387 = vector.load %arg8[%c1_237, %c2_238, %c0_239] : memref<2x12x8xf32, #tpu.memory_space<vmem>>, vector<1x1x8xf32>
    %388 = vector.shape_cast %387 : vector<1x1x8xf32> to vector<1x8xf32>
    %389 = vector.broadcast %388 : vector<1x8xf32> to vector<16x8xf32>
    %390 = arith.addf %386, %389 : vector<16x8xf32>
    %391 = vector.shape_cast %390 : vector<16x8xf32> to vector<2x8x8xf32>
    %c1_240 = arith.constant 1 : index
    %c6_241 = arith.constant 6 : index
    %c0_242 = arith.constant 0 : index
    %c0_243 = arith.constant 0 : index
    %392 = vector.load %arg7[%c1_240, %c6_241, %c0_242, %c0_243] : memref<2x12x32x8xf32, #tpu.memory_space<vmem>>, vector<1x1x32x8xf32>
    %393 = vector.shape_cast %392 : vector<1x1x32x8xf32> to vector<32x8xf32>
    %cst_244 = arith.constant dense<0.000000e+00> : vector<16x8xf32>
    %394 = tpu.matmul %288, %393, %cst_244 {dimension_numbers = #tpu.dot_dimension_numbers<[1], [0], [0], [1], [0, 0, 1, 1], [], []>} : vector<16x32xf32>, vector<32x8xf32>, vector<16x8xf32> -> vector<16x8xf32>
    %c1_245 = arith.constant 1 : index
    %c6_246 = arith.constant 6 : index
    %c0_247 = arith.constant 0 : index
    %395 = vector.load %arg8[%c1_245, %c6_246, %c0_247] : memref<2x12x8xf32, #tpu.memory_space<vmem>>, vector<1x1x8xf32>
    %396 = vector.shape_cast %395 : vector<1x1x8xf32> to vector<1x8xf32>
    %397 = vector.broadcast %396 : vector<1x8xf32> to vector<16x8xf32>
    %398 = arith.addf %394, %397 : vector<16x8xf32>
    %399 = vector.shape_cast %398 : vector<16x8xf32> to vector<2x8x8xf32>
    %c1_248 = arith.constant 1 : index
    %c10_249 = arith.constant 10 : index
    %c0_250 = arith.constant 0 : index
    %c0_251 = arith.constant 0 : index
    %400 = vector.load %arg7[%c1_248, %c10_249, %c0_250, %c0_251] : memref<2x12x32x8xf32, #tpu.memory_space<vmem>>, vector<1x1x32x8xf32>
    %401 = vector.shape_cast %400 : vector<1x1x32x8xf32> to vector<32x8xf32>
    %cst_252 = arith.constant dense<0.000000e+00> : vector<16x8xf32>
    %402 = tpu.matmul %288, %401, %cst_252 {dimension_numbers = #tpu.dot_dimension_numbers<[1], [0], [0], [1], [0, 0, 1, 1], [], []>} : vector<16x32xf32>, vector<32x8xf32>, vector<16x8xf32> -> vector<16x8xf32>
    %c1_253 = arith.constant 1 : index
    %c10_254 = arith.constant 10 : index
    %c0_255 = arith.constant 0 : index
    %403 = vector.load %arg8[%c1_253, %c10_254, %c0_255] : memref<2x12x8xf32, #tpu.memory_space<vmem>>, vector<1x1x8xf32>
    %404 = vector.shape_cast %403 : vector<1x1x8xf32> to vector<1x8xf32>
    %405 = vector.broadcast %404 : vector<1x8xf32> to vector<16x8xf32>
    %406 = arith.addf %402, %405 : vector<16x8xf32>
    %407 = vector.shape_cast %406 : vector<16x8xf32> to vector<2x8x8xf32>
    "tpu.trace_start"() <{level = 10 : i32, message = "bqd,bkd->bqk"}> : () -> ()
    %cst_256 = arith.constant dense<0.000000e+00> : vector<2x8x8xf32>
    %408 = tpu.matmul %391, %399, %cst_256 {dimension_numbers = #tpu.dot_dimension_numbers<[2], [2], [1], [1], [0, 0, 0, 1, 1, 1], [0], [0]>} : vector<2x8x8xf32>, vector<2x8x8xf32>, vector<2x8x8xf32> -> vector<2x8x8xf32>
    "tpu.trace_stop"() : () -> ()
    %409 = vector.broadcast %36 : vector<2x1x8xf32> to vector<2x8x8xf32>
    %410 = arith.addf %408, %409 : vector<2x8x8xf32>
    %cst_257 = arith.constant dense<0xFF800000> : vector<2x8xf32>
    %411 = vector.multi_reduction <maximumf>, %410, %cst_257 [2] : vector<2x8x8xf32> to vector<2x8xf32>
    %412 = vector.shape_cast %411 : vector<2x8xf32> to vector<2x8x1xf32>
    %413 = vector.broadcast %412 : vector<2x8x1xf32> to vector<2x8x8xf32>
    %414 = arith.subf %410, %413 : vector<2x8x8xf32>
    %415 = math.exp %414 : vector<2x8x8xf32>
    %cst_258 = arith.constant dense<0.000000e+00> : vector<2x8xf32>
    %416 = vector.multi_reduction <add>, %415, %cst_258 [2] : vector<2x8x8xf32> to vector<2x8xf32>
    %417 = vector.shape_cast %416 : vector<2x8xf32> to vector<2x8x1xf32>
    %418 = tpu.reciprocal %417 {approx = true} : vector<2x8x1xf32> -> vector<2x8x1xf32>
    %419 = vector.broadcast %418 : vector<2x8x1xf32> to vector<2x8x8xf32>
    %420 = arith.mulf %415, %419 : vector<2x8x8xf32>
    "tpu.trace_start"() <{level = 10 : i32, message = "bqk,bkd->bqd"}> : () -> ()
    %cst_259 = arith.constant dense<0.000000e+00> : vector<2x8x8xf32>
    %421 = tpu.matmul %420, %407, %cst_259 {dimension_numbers = #tpu.dot_dimension_numbers<[2], [1], [1], [2], [0, 0, 0, 1, 1, 2], [0], [0]>} : vector<2x8x8xf32>, vector<2x8x8xf32>, vector<2x8x8xf32> -> vector<2x8x8xf32>
    "tpu.trace_stop"() : () -> ()
    %422 = vector.shape_cast %421 : vector<2x8x8xf32> to vector<16x8xf32>
    %c1_260 = arith.constant 1 : index
    %c2_261 = arith.constant 2 : index
    %c0_262 = arith.constant 0 : index
    %c0_263 = arith.constant 0 : index
    %423 = vector.load %arg9[%c1_260, %c2_261, %c0_262, %c0_263] : memref<2x4x8x32xf32, #tpu.memory_space<vmem>>, vector<1x1x8x32xf32>
    %424 = vector.shape_cast %423 : vector<1x1x8x32xf32> to vector<8x32xf32>
    %cst_264 = arith.constant dense<0.000000e+00> : vector<16x32xf32>
    %425 = tpu.matmul %422, %424, %cst_264 {dimension_numbers = #tpu.dot_dimension_numbers<[1], [0], [0], [1], [0, 0, 1, 1], [], []>} : vector<16x8xf32>, vector<8x32xf32>, vector<16x32xf32> -> vector<16x32xf32>
    %426 = arith.addf %383, %425 : vector<16x32xf32>
    %c1_265 = arith.constant 1 : index
    %c3_266 = arith.constant 3 : index
    %c0_267 = arith.constant 0 : index
    %c0_268 = arith.constant 0 : index
    %427 = vector.load %arg7[%c1_265, %c3_266, %c0_267, %c0_268] : memref<2x12x32x8xf32, #tpu.memory_space<vmem>>, vector<1x1x32x8xf32>
    %428 = vector.shape_cast %427 : vector<1x1x32x8xf32> to vector<32x8xf32>
    %cst_269 = arith.constant dense<0.000000e+00> : vector<16x8xf32>
    %429 = tpu.matmul %288, %428, %cst_269 {dimension_numbers = #tpu.dot_dimension_numbers<[1], [0], [0], [1], [0, 0, 1, 1], [], []>} : vector<16x32xf32>, vector<32x8xf32>, vector<16x8xf32> -> vector<16x8xf32>
    %c1_270 = arith.constant 1 : index
    %c3_271 = arith.constant 3 : index
    %c0_272 = arith.constant 0 : index
    %430 = vector.load %arg8[%c1_270, %c3_271, %c0_272] : memref<2x12x8xf32, #tpu.memory_space<vmem>>, vector<1x1x8xf32>
    %431 = vector.shape_cast %430 : vector<1x1x8xf32> to vector<1x8xf32>
    %432 = vector.broadcast %431 : vector<1x8xf32> to vector<16x8xf32>
    %433 = arith.addf %429, %432 : vector<16x8xf32>
    %434 = vector.shape_cast %433 : vector<16x8xf32> to vector<2x8x8xf32>
    %c1_273 = arith.constant 1 : index
    %c7_274 = arith.constant 7 : index
    %c0_275 = arith.constant 0 : index
    %c0_276 = arith.constant 0 : index
    %435 = vector.load %arg7[%c1_273, %c7_274, %c0_275, %c0_276] : memref<2x12x32x8xf32, #tpu.memory_space<vmem>>, vector<1x1x32x8xf32>
    %436 = vector.shape_cast %435 : vector<1x1x32x8xf32> to vector<32x8xf32>
    %cst_277 = arith.constant dense<0.000000e+00> : vector<16x8xf32>
    %437 = tpu.matmul %288, %436, %cst_277 {dimension_numbers = #tpu.dot_dimension_numbers<[1], [0], [0], [1], [0, 0, 1, 1], [], []>} : vector<16x32xf32>, vector<32x8xf32>, vector<16x8xf32> -> vector<16x8xf32>
    %c1_278 = arith.constant 1 : index
    %c7_279 = arith.constant 7 : index
    %c0_280 = arith.constant 0 : index
    %438 = vector.load %arg8[%c1_278, %c7_279, %c0_280] : memref<2x12x8xf32, #tpu.memory_space<vmem>>, vector<1x1x8xf32>
    %439 = vector.shape_cast %438 : vector<1x1x8xf32> to vector<1x8xf32>
    %440 = vector.broadcast %439 : vector<1x8xf32> to vector<16x8xf32>
    %441 = arith.addf %437, %440 : vector<16x8xf32>
    %442 = vector.shape_cast %441 : vector<16x8xf32> to vector<2x8x8xf32>
    %c1_281 = arith.constant 1 : index
    %c11_282 = arith.constant 11 : index
    %c0_283 = arith.constant 0 : index
    %c0_284 = arith.constant 0 : index
    %443 = vector.load %arg7[%c1_281, %c11_282, %c0_283, %c0_284] : memref<2x12x32x8xf32, #tpu.memory_space<vmem>>, vector<1x1x32x8xf32>
    %444 = vector.shape_cast %443 : vector<1x1x32x8xf32> to vector<32x8xf32>
    %cst_285 = arith.constant dense<0.000000e+00> : vector<16x8xf32>
    %445 = tpu.matmul %288, %444, %cst_285 {dimension_numbers = #tpu.dot_dimension_numbers<[1], [0], [0], [1], [0, 0, 1, 1], [], []>} : vector<16x32xf32>, vector<32x8xf32>, vector<16x8xf32> -> vector<16x8xf32>
    %c1_286 = arith.constant 1 : index
    %c11_287 = arith.constant 11 : index
    %c0_288 = arith.constant 0 : index
    %446 = vector.load %arg8[%c1_286, %c11_287, %c0_288] : memref<2x12x8xf32, #tpu.memory_space<vmem>>, vector<1x1x8xf32>
    %447 = vector.shape_cast %446 : vector<1x1x8xf32> to vector<1x8xf32>
    %448 = vector.broadcast %447 : vector<1x8xf32> to vector<16x8xf32>
    %449 = arith.addf %445, %448 : vector<16x8xf32>
    %450 = vector.shape_cast %449 : vector<16x8xf32> to vector<2x8x8xf32>
    "tpu.trace_start"() <{level = 10 : i32, message = "bqd,bkd->bqk"}> : () -> ()
    %cst_289 = arith.constant dense<0.000000e+00> : vector<2x8x8xf32>
    %451 = tpu.matmul %434, %442, %cst_289 {dimension_numbers = #tpu.dot_dimension_numbers<[2], [2], [1], [1], [0, 0, 0, 1, 1, 1], [0], [0]>} : vector<2x8x8xf32>, vector<2x8x8xf32>, vector<2x8x8xf32> -> vector<2x8x8xf32>
    "tpu.trace_stop"() : () -> ()
    %452 = vector.broadcast %36 : vector<2x1x8xf32> to vector<2x8x8xf32>
    %453 = arith.addf %451, %452 : vector<2x8x8xf32>
    %cst_290 = arith.constant dense<0xFF800000> : vector<2x8xf32>
    %454 = vector.multi_reduction <maximumf>, %453, %cst_290 [2] : vector<2x8x8xf32> to vector<2x8xf32>
    %455 = vector.shape_cast %454 : vector<2x8xf32> to vector<2x8x1xf32>
    %456 = vector.broadcast %455 : vector<2x8x1xf32> to vector<2x8x8xf32>
    %457 = arith.subf %453, %456 : vector<2x8x8xf32>
    %458 = math.exp %457 : vector<2x8x8xf32>
    %cst_291 = arith.constant dense<0.000000e+00> : vector<2x8xf32>
    %459 = vector.multi_reduction <add>, %458, %cst_291 [2] : vector<2x8x8xf32> to vector<2x8xf32>
    %460 = vector.shape_cast %459 : vector<2x8xf32> to vector<2x8x1xf32>
    %461 = tpu.reciprocal %460 {approx = true} : vector<2x8x1xf32> -> vector<2x8x1xf32>
    %462 = vector.broadcast %461 : vector<2x8x1xf32> to vector<2x8x8xf32>
    %463 = arith.mulf %458, %462 : vector<2x8x8xf32>
    "tpu.trace_start"() <{level = 10 : i32, message = "bqk,bkd->bqd"}> : () -> ()
    %cst_292 = arith.constant dense<0.000000e+00> : vector<2x8x8xf32>
    %464 = tpu.matmul %463, %450, %cst_292 {dimension_numbers = #tpu.dot_dimension_numbers<[2], [1], [1], [2], [0, 0, 0, 1, 1, 2], [0], [0]>} : vector<2x8x8xf32>, vector<2x8x8xf32>, vector<2x8x8xf32> -> vector<2x8x8xf32>
    "tpu.trace_stop"() : () -> ()
    %465 = vector.shape_cast %464 : vector<2x8x8xf32> to vector<16x8xf32>
    %c1_293 = arith.constant 1 : index
    %c3_294 = arith.constant 3 : index
    %c0_295 = arith.constant 0 : index
    %c0_296 = arith.constant 0 : index
    %466 = vector.load %arg9[%c1_293, %c3_294, %c0_295, %c0_296] : memref<2x4x8x32xf32, #tpu.memory_space<vmem>>, vector<1x1x8x32xf32>
    %467 = vector.shape_cast %466 : vector<1x1x8x32xf32> to vector<8x32xf32>
    %cst_297 = arith.constant dense<0.000000e+00> : vector<16x32xf32>
    %468 = tpu.matmul %465, %467, %cst_297 {dimension_numbers = #tpu.dot_dimension_numbers<[1], [0], [0], [1], [0, 0, 1, 1], [], []>} : vector<16x8xf32>, vector<8x32xf32>, vector<16x32xf32> -> vector<16x32xf32>
    %469 = arith.addf %426, %468 : vector<16x32xf32>
    %470 = arith.addf %288, %469 : vector<16x32xf32>
    %cst_298 = arith.constant dense<0.000000e+00> : vector<16xf32>
    %471 = vector.multi_reduction <add>, %470, %cst_298 [1] : vector<16x32xf32> to vector<16xf32>
    %472 = vector.shape_cast %471 : vector<16xf32> to vector<16x1xf32>
    %cst_299 = arith.constant 3.200000e+01 : f32
    %473 = vector.broadcast %cst_299 : f32 to vector<16x1xf32>
    %474 = arith.divf %472, %473 : vector<16x1xf32>
    %475 = vector.broadcast %474 : vector<16x1xf32> to vector<16x32xf32>
    %476 = arith.subf %470, %475 : vector<16x32xf32>
    %477 = arith.mulf %476, %476 : vector<16x32xf32>
    %cst_300 = arith.constant dense<0.000000e+00> : vector<16xf32>
    %478 = vector.multi_reduction <add>, %477, %cst_300 [1] : vector<16x32xf32> to vector<16xf32>
    %479 = vector.shape_cast %478 : vector<16xf32> to vector<16x1xf32>
    %cst_301 = arith.constant 3.200000e+01 : f32
    %480 = vector.broadcast %cst_301 : f32 to vector<16x1xf32>
    %481 = arith.divf %479, %480 : vector<16x1xf32>
    %482 = vector.broadcast %474 : vector<16x1xf32> to vector<16x32xf32>
    %483 = arith.subf %470, %482 : vector<16x32xf32>
    %cst_302 = arith.constant 9.99999996E-13 : f32
    %484 = vector.broadcast %cst_302 : f32 to vector<16x1xf32>
    %485 = arith.addf %481, %484 : vector<16x1xf32>
    %486 = math.rsqrt %485 : vector<16x1xf32>
    %487 = vector.broadcast %486 : vector<16x1xf32> to vector<16x32xf32>
    %488 = arith.mulf %483, %487 : vector<16x32xf32>
    %489 = vector.broadcast %292 : vector<1x32xf32> to vector<16x32xf32>
    %490 = arith.mulf %488, %489 : vector<16x32xf32>
    %491 = vector.broadcast %293 : vector<1x32xf32> to vector<16x32xf32>
    %492 = arith.addf %490, %491 : vector<16x32xf32>
    %c1_303 = arith.constant 1 : index
    %c0_304 = arith.constant 0 : index
    %c0_305 = arith.constant 0 : index
    %493 = vector.load %arg11[%c1_303, %c0_304, %c0_305] : memref<2x32x64xf32, #tpu.memory_space<vmem>>, vector<1x32x64xf32>
    %494 = vector.shape_cast %493 : vector<1x32x64xf32> to vector<32x64xf32>
    %cst_306 = arith.constant dense<0.000000e+00> : vector<16x64xf32>
    %495 = tpu.matmul %492, %494, %cst_306 {dimension_numbers = #tpu.dot_dimension_numbers<[1], [0], [0], [1], [0, 0, 1, 1], [], []>} : vector<16x32xf32>, vector<32x64xf32>, vector<16x64xf32> -> vector<16x64xf32>
    %c1_307 = arith.constant 1 : index
    %c0_308 = arith.constant 0 : index
    %c0_309 = arith.constant 0 : index
    %496 = vector.load %arg12[%c1_307, %c0_308, %c0_309] : memref<2x1x64xf32, #tpu.memory_space<vmem>>, vector<1x1x64xf32>
    %497 = vector.shape_cast %496 : vector<1x1x64xf32> to vector<1x64xf32>
    %498 = vector.broadcast %497 : vector<1x64xf32> to vector<16x64xf32>
    %499 = arith.addf %495, %498 : vector<16x64xf32>
    %500 = arith.mulf %499, %499 : vector<16x64xf32>
    %501 = arith.mulf %499, %500 : vector<16x64xf32>
    %cst_310 = arith.constant 4.471500e-02 : f32
    %502 = vector.broadcast %cst_310 : f32 to vector<16x64xf32>
    %503 = arith.mulf %502, %501 : vector<16x64xf32>
    %504 = arith.addf %499, %503 : vector<16x64xf32>
    %cst_311 = arith.constant 0.797884583 : f32
    %505 = vector.broadcast %cst_311 : f32 to vector<16x64xf32>
    %506 = arith.mulf %505, %504 : vector<16x64xf32>
    %507 = math.tanh %506 : vector<16x64xf32>
    %cst_312 = arith.constant 1.000000e+00 : f32
    %508 = vector.broadcast %cst_312 : f32 to vector<16x64xf32>
    %509 = arith.addf %508, %507 : vector<16x64xf32>
    %cst_313 = arith.constant 5.000000e-01 : f32
    %510 = vector.broadcast %cst_313 : f32 to vector<16x64xf32>
    %511 = arith.mulf %510, %509 : vector<16x64xf32>
    %512 = arith.mulf %499, %511 : vector<16x64xf32>
    %c1_314 = arith.constant 1 : index
    %c0_315 = arith.constant 0 : index
    %c0_316 = arith.constant 0 : index
    %513 = vector.load %arg13[%c1_314, %c0_315, %c0_316] : memref<2x64x32xf32, #tpu.memory_space<vmem>>, vector<1x64x32xf32>
    %514 = vector.shape_cast %513 : vector<1x64x32xf32> to vector<64x32xf32>
    %cst_317 = arith.constant dense<0.000000e+00> : vector<16x32xf32>
    %515 = tpu.matmul %512, %514, %cst_317 {dimension_numbers = #tpu.dot_dimension_numbers<[1], [0], [0], [1], [0, 0, 1, 1], [], []>} : vector<16x64xf32>, vector<64x32xf32>, vector<16x32xf32> -> vector<16x32xf32>
    %516 = vector.broadcast %294 : vector<1x32xf32> to vector<16x32xf32>
    %517 = arith.addf %515, %516 : vector<16x32xf32>
    %518 = arith.addf %492, %517 : vector<16x32xf32>
    %cst_318 = arith.constant dense<0.000000e+00> : vector<16xf32>
    %519 = vector.multi_reduction <add>, %518, %cst_318 [1] : vector<16x32xf32> to vector<16xf32>
    %520 = vector.shape_cast %519 : vector<16xf32> to vector<16x1xf32>
    %cst_319 = arith.constant 3.200000e+01 : f32
    %521 = vector.broadcast %cst_319 : f32 to vector<16x1xf32>
    %522 = arith.divf %520, %521 : vector<16x1xf32>
    %523 = vector.broadcast %522 : vector<16x1xf32> to vector<16x32xf32>
    %524 = arith.subf %518, %523 : vector<16x32xf32>
    %525 = arith.mulf %524, %524 : vector<16x32xf32>
    %cst_320 = arith.constant dense<0.000000e+00> : vector<16xf32>
    %526 = vector.multi_reduction <add>, %525, %cst_320 [1] : vector<16x32xf32> to vector<16xf32>
    %527 = vector.shape_cast %526 : vector<16xf32> to vector<16x1xf32>
    %cst_321 = arith.constant 3.200000e+01 : f32
    %528 = vector.broadcast %cst_321 : f32 to vector<16x1xf32>
    %529 = arith.divf %527, %528 : vector<16x1xf32>
    %530 = vector.broadcast %522 : vector<16x1xf32> to vector<16x32xf32>
    %531 = arith.subf %518, %530 : vector<16x32xf32>
    %cst_322 = arith.constant 9.99999996E-13 : f32
    %532 = vector.broadcast %cst_322 : f32 to vector<16x1xf32>
    %533 = arith.addf %529, %532 : vector<16x1xf32>
    %534 = math.rsqrt %533 : vector<16x1xf32>
    %535 = vector.broadcast %534 : vector<16x1xf32> to vector<16x32xf32>
    %536 = arith.mulf %531, %535 : vector<16x32xf32>
    %537 = vector.broadcast %295 : vector<1x32xf32> to vector<16x32xf32>
    %538 = arith.mulf %536, %537 : vector<16x32xf32>
    %539 = vector.broadcast %296 : vector<1x32xf32> to vector<16x32xf32>
    %540 = arith.addf %538, %539 : vector<16x32xf32>
    %541 = vector.shape_cast %540 : vector<16x32xf32> to vector<2x8x32xf32>
    %c0_323 = arith.constant 0 : index
    %c0_324 = arith.constant 0 : index
    %542 = vector.load %arg2[%c0_323, %c0_324] : memref<2x8xf32, #tpu.memory_space<vmem>>, vector<2x8xf32>
    %543 = vector.shape_cast %542 : vector<2x8xf32> to vector<2x8x1xf32>
    %544 = vector.broadcast %543 : vector<2x8x1xf32> to vector<2x8x32xf32>
    %545 = arith.mulf %541, %544 : vector<2x8x32xf32>
    %cst_325 = arith.constant 1.000000e+00 : f32
    %546 = vector.broadcast %cst_325 : f32 to vector<2x8x32xf32>
    %547 = arith.addf %545, %546 : vector<2x8x32xf32>
    %cst_326 = arith.constant dense<0xFF800000> : vector<2x32xf32>
    %548 = vector.multi_reduction <maximumf>, %547, %cst_326 [1] : vector<2x8x32xf32> to vector<2x32xf32>
    %cst_327 = arith.constant 1.000000e+00 : f32
    %549 = vector.broadcast %cst_327 : f32 to vector<2x32xf32>
    %550 = arith.subf %548, %549 : vector<2x32xf32>
    %c0_328 = arith.constant 0 : index
    %c0_329 = arith.constant 0 : index
    %551 = vector.load %arg3[%c0_328, %c0_329] : memref<2x8xf32, #tpu.memory_space<vmem>>, vector<2x8xf32>
    %552 = vector.shape_cast %551 : vector<2x8xf32> to vector<2x8x1xf32>
    %553 = vector.broadcast %552 : vector<2x8x1xf32> to vector<2x8x32xf32>
    %554 = arith.mulf %541, %553 : vector<2x8x32xf32>
    %cst_330 = arith.constant 1.000000e+00 : f32
    %555 = vector.broadcast %cst_330 : f32 to vector<2x8x32xf32>
    %556 = arith.addf %554, %555 : vector<2x8x32xf32>
    %cst_331 = arith.constant dense<0xFF800000> : vector<2x32xf32>
    %557 = vector.multi_reduction <maximumf>, %556, %cst_331 [1] : vector<2x8x32xf32> to vector<2x32xf32>
    %cst_332 = arith.constant 1.000000e+00 : f32
    %558 = vector.broadcast %cst_332 : f32 to vector<2x32xf32>
    %559 = arith.subf %557, %558 : vector<2x32xf32>
    %560 = math.tanh %550 : vector<2x32xf32>
    %561 = math.tanh %559 : vector<2x32xf32>
    %c0_333 = arith.constant 0 : index
    %c0_334 = arith.constant 0 : index
    %c0_335 = arith.constant 0 : index
    %562 = vector.load %arg14[%c0_333, %c0_334, %c0_335] : memref<2x32x5xf32, #tpu.memory_space<vmem>>, vector<1x32x5xf32>
    %563 = vector.shape_cast %562 : vector<1x32x5xf32> to vector<32x5xf32>
    %cst_336 = arith.constant dense<0.000000e+00> : vector<2x5xf32>
    %564 = tpu.matmul %560, %563, %cst_336 {dimension_numbers = #tpu.dot_dimension_numbers<[1], [0], [0], [1], [0, 0, 1, 1], [], []>} : vector<2x32xf32>, vector<32x5xf32>, vector<2x5xf32> -> vector<2x5xf32>
    %c1_337 = arith.constant 1 : index
    %c0_338 = arith.constant 0 : index
    %c0_339 = arith.constant 0 : index
    %565 = vector.load %arg14[%c1_337, %c0_338, %c0_339] : memref<2x32x5xf32, #tpu.memory_space<vmem>>, vector<1x32x5xf32>
    %566 = vector.shape_cast %565 : vector<1x32x5xf32> to vector<32x5xf32>
    %cst_340 = arith.constant dense<0.000000e+00> : vector<2x5xf32>
    %567 = tpu.matmul %561, %566, %cst_340 {dimension_numbers = #tpu.dot_dimension_numbers<[1], [0], [0], [1], [0, 0, 1, 1], [], []>} : vector<2x32xf32>, vector<32x5xf32>, vector<2x5xf32> -> vector<2x5xf32>
    %568 = arith.addf %564, %567 : vector<2x5xf32>
    %c0_341 = arith.constant 0 : index
    %c0_342 = arith.constant 0 : index
    %569 = vector.load %arg15[%c0_341, %c0_342] : memref<1x5xf32, #tpu.memory_space<vmem>>, vector<1x5xf32>
    %570 = vector.broadcast %569 : vector<1x5xf32> to vector<2x5xf32>
    %571 = arith.addf %568, %570 : vector<2x5xf32>
    %cst_343 = arith.constant dense<0xFF800000> : vector<2xf32>
    %572 = vector.multi_reduction <maximumf>, %571, %cst_343 [1] : vector<2x5xf32> to vector<2xf32>
    %573 = vector.shape_cast %572 : vector<2xf32> to vector<2x1xf32>
    %574 = vector.broadcast %573 : vector<2x1xf32> to vector<2x5xf32>
    %575 = arith.subf %571, %574 : vector<2x5xf32>
    %576 = math.exp %575 : vector<2x5xf32>
    %cst_344 = arith.constant dense<0.000000e+00> : vector<2xf32>
    %577 = vector.multi_reduction <add>, %576, %cst_344 [1] : vector<2x5xf32> to vector<2xf32>
    %578 = vector.shape_cast %577 : vector<2xf32> to vector<2x1xf32>
    %579 = tpu.reciprocal %578 {approx = true} : vector<2x1xf32> -> vector<2x1xf32>
    %580 = vector.broadcast %579 : vector<2x1xf32> to vector<2x5xf32>
    %581 = arith.mulf %576, %580 : vector<2x5xf32>
    %582 = tpu.iota {dimensions = array<i32: 1>} : vector<2x5xi32>
    %c0_345 = arith.constant 0 : index
    %c0_346 = arith.constant 0 : index
    %583 = vector.load %arg4[%c0_345, %c0_346] : memref<2x1xi32, #tpu.memory_space<vmem>>, vector<2x1xi32>
    %584 = vector.broadcast %583 : vector<2x1xi32> to vector<2x5xi32>
    %585 = arith.cmpi eq, %582, %584 : vector<2x5xi32>
    %cst_347 = arith.constant 0.000000e+00 : f32
    %586 = vector.broadcast %cst_347 : f32 to vector<2x5xf32>
    %587 = arith.select %585, %571, %586 : vector<2x5xi1>, vector<2x5xf32>
    %cst_348 = arith.constant dense<0.000000e+00> : vector<2xf32>
    %588 = vector.multi_reduction <add>, %587, %cst_348 [1] : vector<2x5xf32> to vector<2xf32>
    %589 = vector.shape_cast %588 : vector<2xf32> to vector<2x1xf32>
    %590 = math.log %578 : vector<2x1xf32>
    %591 = arith.addf %573, %590 : vector<2x1xf32>
    %592 = arith.subf %591, %589 : vector<2x1xf32>
    %593 = vector.shape_cast %592 : vector<2x1xf32> to vector<1x2x1xf32>
    %cst_349 = arith.constant dense<0.000000e+00> : vector<1xf32>
    %594 = vector.multi_reduction <add>, %593, %cst_349 [1, 2] : vector<1x2x1xf32> to vector<1xf32>
    %595 = vector.shape_cast %594 : vector<1xf32> to vector<1x1x1xf32>
    %596 = vector.extract %595[0, 0, 0] : f32 from vector<1x1x1xf32>
    %597 = vector.broadcast %596 : f32 to vector<1x1xf32>
    %cst_350 = arith.constant 5.000000e-01 : f32
    %598 = vector.broadcast %cst_350 : f32 to vector<1x1xf32>
    %599 = arith.mulf %597, %598 : vector<1x1xf32>
    %cst_351 = arith.constant dense<0xFF800000> : vector<2xf32>
    %600 = vector.multi_reduction <maximumf>, %581, %cst_351 [1] : vector<2x5xf32> to vector<2xf32>
    %601 = vector.shape_cast %600 : vector<2xf32> to vector<2x1xf32>
    %602 = vector.broadcast %573 : vector<2x1xf32> to vector<2x5xf32>
    %603 = arith.cmpf oeq, %571, %602 : vector<2x5xf32>
    %c5_i32 = arith.constant 5 : i32
    %604 = vector.broadcast %c5_i32 : i32 to vector<2x5xi32>
    %605 = arith.select %603, %582, %604 : vector<2x5xi1>, vector<2x5xi32>
    %cst_352 = arith.constant dense<2147483647> : vector<2xi32>
    %606 = vector.multi_reduction <minsi>, %605, %cst_352 [1] : vector<2x5xi32> to vector<2xi32>
    %607 = vector.shape_cast %606 : vector<2xi32> to vector<2x1xi32>
    %608 = arith.sitofp %607 : vector<2x1xi32> to vector<2x1xf32>
    %cst_353 = arith.constant 0.000000e+00 : f32
    %609 = vector.broadcast %cst_353 : f32 to vector<2x128xf32>
    %c0_354 = arith.constant 0 : index
    %c0_355 = arith.constant 0 : index
    %610 = vector.load %arg16[%c0_354, %c0_355] : memref<2x128xf32, #tpu.memory_space<vmem>>, vector<2x128xf32>
    tpu.vector_store %arg16[%c0_354, %c0_355], %609 {strides = array<i32>} : memref<2x128xf32, #tpu.memory_space<vmem>>, vector<2x128xf32>,
    %c0_356 = arith.constant 0 : index
    %c0_357 = arith.constant 0 : index
    %611 = vector.load %arg16[%c0_356, %c0_357] : memref<2x128xf32, #tpu.memory_space<vmem>>, vector<2x5xf32>
    tpu.vector_store %arg16[%c0_356, %c0_357], %581 {strides = array<i32>} : memref<2x128xf32, #tpu.memory_space<vmem>>, vector<2x5xf32>,
    %c0_358 = arith.constant 0 : index
    %c5_359 = arith.constant 5 : index
    %612 = vector.load %arg16[%c0_358, %c5_359] : memref<2x128xf32, #tpu.memory_space<vmem>>, vector<2x1xf32>
    tpu.vector_store %arg16[%c0_358, %c5_359], %601 {strides = array<i32>} : memref<2x128xf32, #tpu.memory_space<vmem>>, vector<2x1xf32>,
    %c0_360 = arith.constant 0 : index
    %c6_361 = arith.constant 6 : index
    %613 = vector.load %arg16[%c0_360, %c6_361] : memref<2x128xf32, #tpu.memory_space<vmem>>, vector<2x1xf32>
    tpu.vector_store %arg16[%c0_360, %c6_361], %608 {strides = array<i32>} : memref<2x128xf32, #tpu.memory_space<vmem>>, vector<2x1xf32>,
    %614 = vector.shape_cast %599 : vector<1x1xf32> to vector<1x1xf32>
    %615 = vector.broadcast %614 : vector<1x1xf32> to vector<2x1xf32>
    %c0_362 = arith.constant 0 : index
    %c7_363 = arith.constant 7 : index
    %616 = vector.load %arg16[%c0_362, %c7_363] : memref<2x128xf32, #tpu.memory_space<vmem>>, vector<2x1xf32>
    tpu.vector_store %arg16[%c0_362, %c7_363], %615 {strides = array<i32>} : memref<2x128xf32, #tpu.memory_space<vmem>>, vector<2x1xf32>,
    return
  }
}

</mosaic_0001>

<bundles_post_ra>
// kernel: discriminator_forward.1
= control target key start
LH: loop header
LB: loop body
LE: loop exit
PB: predicated region body
PF: predicated region fallthrough
CT: control target
= control target key end

     0   :  { %vm59_vm0 = vcmask 261120   ;;  %v3101_v7 = vmov 32.0   ;;  %vm222_vm8 = vcmask 64512   ;;  %vm1221_vm15 = vcmask 523264   ;;  %s4077_s0 = inlined_call_operand.vmem [shape: f32[2,8,32], index: 0, kind: input, shape index: {}]   ;;  %s4078_s5 = inlined_call_operand.vmem [shape: f32[8,32], index: 5, kind: input, shape index: {}]   ;;  %s4079_s8 = inlined_call_operand.vmem [shape: f32[2,12,8], index: 8, kind: input, shape index: {}]   ;;  %s4080_s7 = inlined_call_operand.vmem [shape: f32[2,12,32,8], index: 7, kind: input, shape index: {}]   ;;  %s4081_s6 = inlined_call_operand.vmem [shape: f32[2,32], index: 6, kind: input, shape index: {}]   ;;  %s4082_s1 = inlined_call_operand.vmem [shape: f32[2,8], index: 1, kind: input, shape index: {}]   ;;  %s4083_s9 = inlined_call_operand.vmem [shape: f32[2,4,8,32], index: 9, kind: input, shape index: {}]   ;;  %s4084_s10 = inlined_call_operand.vmem [shape: f32[2,6,32], index: 10, kind: input, shape index: {}]   ;;  %s4085_s12 = inlined_call_operand.vmem [shape: f32[2,1,64], index: 12, kind: input, shape index: {}]   ;;  %s4086_s11 = inlined_call_operand.vmem [shape: f32[2,32,64], index: 11, kind: input, shape index: {}]   ;;  %s4087_s13 = inlined_call_operand.vmem [shape: f32[2,64,32], index: 13, kind: input, shape index: {}]   ;;  %s4088_s3 = inlined_call_operand.vmem [shape: f32[2,8], index: 3, kind: input, shape index: {}]   ;;  %s4089_s2 = inlined_call_operand.vmem [shape: f32[2,8], index: 2, kind: input, shape index: {}]   ;;  %s4090_s14 = inlined_call_operand.vmem [shape: f32[2,32,5], index: 14, kind: input, shape index: {}]   ;;  %s4091_s4 = inlined_call_operand.vmem [shape: s32[2,1], index: 4, kind: input, shape index: {}]   ;;  %s4092_s15 = inlined_call_operand.vmem [shape: f32[1,5], index: 15, kind: input, shape index: {}]   ;;  %s4093_s16 = inlined_call_operand.vmem [shape: f32[2,128], index: 16, kind: output, shape index: {}]  }
   0x1   :  { %4095 = sst [smem:[#allocation2_spill]] %s4077_s0  ;;  %v56_v1 = vld [vmem:[%s4078_s5] sm:$0xff]  ;;  %2993 = vrcp.f32 %v3101_v7  ;;  %v126_v24 = vld [vmem:[%s4080_s7 + $0x18] sm:$0xff]  ;;  %v125_v26 = vld [vmem:[%s4080_s7 + $0x10] sm:$0xff] }
   0x2   :  { %s4096_s23 = sld [smem:[#allocation2_spill]]  ;;  %v2702_v25 = vld [vmem:[%s4080_s7 + $0x98] sm:$0xff]  ;;  %147 = vmatpush.msra.mxu0 %v126_v24  ;;  %v2701_v27 = vld [vmem:[%s4080_s7 + $0x90] sm:$0xff]  ;;  %2952 = vmatpush.msra.mxu2 %v126_v24  ;;  %v124_v28 = vld [vmem:[%s4080_s7 + $0x8] sm:$0xff] }
   0x3   :  { %177 = vmatpush.msra.mxu1 %v2702_v25  ;;  %v2700_v29 = vld [vmem:[%s4080_s7 + $0x88] sm:$0xff]  ;;  %v123_v30 = vld [vmem:[%s4080_s7] sm:$0xff]  ;;  %v2708_v35 = vld [vmem:[%s4080_s7 + $0x118] sm:$0xff] }
   0x4   :  { %148 = vmatpush.msra.mxu0 %v125_v26  ;;  %2953 = vmatpush.msra.mxu2 %v125_v26  ;;  %v2699_v31 = vld [vmem:[%s4080_s7 + $0x80] sm:$0xff]  ;;  %v2707_v36 = vld [vmem:[%s4080_s7 + $0x110] sm:$0xff]  ;;  %v2706_v37 = vld [vmem:[%s4080_s7 + $0x108] sm:$0xff] }
   0x5   :  { %178 = vmatpush.msra.mxu1 %v2701_v27  ;;  %v2705_v40 = vld [vmem:[%s4080_s7 + $0x100] sm:$0xff] }
   0x6   :  { %149 = vmatpush.msra.mxu0 %v124_v28  ;;  %2954 = vmatpush.msra.mxu2 %v124_v28  ;;  %v53_v46 = vld [vmem:[%s4081_s6] sm:$0x3] }
   0x7   :  { %v2994_v8 = vpop.eup %2993  ;;  %179 = vmatpush.msra.mxu1 %v2700_v29  ;;  %v111_v51 = vperm.slane %v53_v46, 0  ;;  %v114_v54 = vperm.slane %v53_v46, 1  ;;  %v2725_v46 = vld [vmem:[%s4080_s7 + $0xa0] sm:$0xff] }
   0x8   :  { %v54_v0 = vld [vmem:[%s4096_s23] sm:$0xff]  ;;  %v55_v3 = vld [vmem:[%s4096_s23 + $0x8] sm:$0xff]  ;;  %v67_v9 = vmul.f32 32.0, %v2994_v8  ;;  %vm71_vm1 = vweird.f32 %v2994_v8  ;;  %150 = vmatpush.msra.mxu0 %v123_v30  ;;  %2955 = vmatpush.msra.mxu2 %v123_v30 }
   0x9   :  { %v57_v2 = vadd.f32 %v56_v1, %v54_v0  ;;  %v58_v5 = vadd.f32 %v56_v1, %v55_v3  ;;  %180 = vmatpush.msra.mxu1 %v2699_v31  ;;  %v2722_v1 = vld [vmem:[%s4080_s7 + $0x38] sm:$0xff]  ;;  %v2720_v3 = vld [vmem:[%s4080_s7 + $0x28] sm:$0xff] }
   0xa   :  { %v68_v10 = vsub.f32 1.0, %v67_v9  ;;  %207 = vmatpush.msrb.mxu2 %v2708_v35 }
   0xb   :  { %v60_v4 = vsel %vm59_vm0, %v57_v2, 0.0  ;;  %v63_v6 = vsel %vm59_vm0, %v58_v5, 0.0 }
   0xc   :  { %61 = vadd.xlane.f32.xlu0 %v60_v4  ;;  %v69_v11 = vmul.f32 %v2994_v8, %v68_v10  ;;  %208 = vmatpush.msrb.mxu2 %v2707_v36  ;;  %v2719_v4 = vld [vmem:[%s4080_s7 + $0x20] sm:$0xff] }
   0xe   :  { %v70_v12 = vadd.f32 %v2994_v8, %v69_v11  ;;  %209 = vmatpush.msrb.mxu2 %v2706_v37 }
  0x10   :  { %v3200_v13 = vsel %vm71_vm1, %v2994_v8, %v70_v12  ;;  %210 = vmatpush.msrb.mxu2 %v2705_v40 }
  0x14   :  { %64 = vadd.xlane.f32.xlu0 %v63_v6  ;;  %v2966_v6 = vld [vmem:[%s4079_s8] ss:$0 sm:$0xff] }
  0x7f   :  { %v62_v14 = vpop.xlane.xlu0 %61 }
  0x80   :  { %v73_v15 = vmul.f32 %v3200_v13, %v62_v14 }
  0x82   :  { %v3203_v16 = vsub.f32 %v57_v2, %v73_v15  ;;  %v2721_v2 = vld [vmem:[%s4080_s7 + $0x30] sm:$0xff] }
  0x84   :  { %v77_v17 = vmul.f32 %v3203_v16, %v3203_v16 }
  0x86   :  { %v79_v18 = vsel %vm59_vm0, %v77_v17, 0.0 }
  0x87   :  { %80 = vadd.xlane.f32.xlu1 %v79_v18  ;;  %v65_v19 = vpop.xlane.xlu0 %64 }
  0x88   :  { %v74_v20 = vmul.f32 %v3200_v13, %v65_v19 }
  0x8a   :  { %v3209_v21 = vsub.f32 %v58_v5, %v74_v20  ;;  %v2967_v5 = vld [vmem:[%s4079_s8 + $0x4] ss:$0 sm:$0xff] }
  0x8c   :  { %v78_v22 = vmul.f32 %v3209_v21, %v3209_v21 }
  0x8e   :  { %v82_v23 = vsel %vm59_vm0, %v78_v22, 0.0 }
  0x8f   :  { %83 = vadd.xlane.f32.xlu1 %v82_v23 }
  0xfa   :  { %v81_v32 = vpop.xlane.xlu1 %80 }
  0xfb   :  { %v85_v33 = vmul.f32 %v81_v32, %v3200_v13 }
  0xfd   :  { %v87_v34 = vadd.f32 1e-12, %v85_v33 }
  0xff   :  { %2995 = vrsqrt.f32 %v87_v34  ;;  %vm95_vm3 = vweird.f32 %v87_v34 }
 0x102   :  { %v84_v38 = vpop.xlane.xlu1 %83 }
 0x103   :  { %v86_v39 = vmul.f32 %v84_v38, %v3200_v13 }
 0x105   :  { %v2996_v41 = vpop.eup %2995  ;;  %v88_v42 = vadd.f32 1e-12, %v86_v39 }
 0x106   :  { %v90_v43 = vmul.f32 %v2996_v41, %v87_v34  ;;  %vm96_vm2 = vweird.f32 %v2996_v41 }
 0x107   :  { %2997 = vrsqrt.f32 %v88_v42  ;;  %vm97_vm4 = vmor %vm95_vm3, %vm96_vm2  ;;  %vm105_vm6 = vweird.f32 %v88_v42 }
 0x108   :  { %v91_v44 = vmul.f32 %v2996_v41, %v90_v43  ;;  %v2728_v43 = vld [vmem:[%s4080_s7 + $0xb8] sm:$0xff] }
 0x10a   :  { %v92_v45 = vmul.f32 0.5, %v91_v44  ;;  %v2727_v44 = vld [vmem:[%s4080_s7 + $0xb0] sm:$0xff] }
 0x10c   :  { %v93_v47 = vsub.f32 1.5, %v92_v45  ;;  %v2726_v45 = vld [vmem:[%s4080_s7 + $0xa8] sm:$0xff] }
 0x10d   :  { %v2998_v48 = vpop.eup %2997 }
 0x10e   :  { %v94_v49 = vmul.f32 %v2996_v41, %v93_v47  ;;  %v100_v50 = vmul.f32 %v2998_v48, %v88_v42  ;;  %vm106_vm5 = vweird.f32 %v2998_v48  ;;  %v2734_v47 = vld [vmem:[%s4080_s7 + $0x138] sm:$0xff] }
 0x10f   :  { %vm107_vm7 = vmor %vm105_vm6, %vm106_vm5 }
 0x110   :  { %v98_v52 = vsel %vm97_vm4, %v2996_v41, %v94_v49  ;;  %v101_v53 = vmul.f32 %v2998_v48, %v100_v50  ;;  %v2732_v49 = vld [vmem:[%s4080_s7 + $0x128] sm:$0xff]  ;;  %v2731_v50 = vld [vmem:[%s4080_s7 + $0x120] sm:$0xff] }
 0x111   :  { %v109_v55 = vmul.f32 %v98_v52, %v3203_v16  ;;  %v2968_v16 = vld [vmem:[%s4079_s8 + $0x8] ss:$0 sm:$0xff]  ;;  %v343_v52 = vld [vmem:[%s4083_s9] sm:$0xff] }
 0x112   :  { %v102_v56 = vmul.f32 0.5, %v101_v53  ;;  %365 = vmatpush.msrb.mxu1 %v343_v52  ;;  %v2743_v52 = vld [vmem:[%s4083_s9 + $0x8] sm:$0xff] }
 0x113   :  { %v112_v57 = vmul.f32 %v111_v51, %v109_v55 }
 0x114   :  { %v103_v58 = vsub.f32 1.5, %v102_v56 }
 0x115   :  { %v3256_v59 = vadd.f32 %v114_v54, %v112_v57 }
 0x116   :  { %v104_v60 = vmul.f32 %v2998_v48, %v103_v58 }
 0x117   :  { %2697 = vmatmul.msk.f32.vlgmr.msra.gmra.mxu0 %vm59_vm0, %v3256_v59  ;;  %2703 = vmatmul.msk.f32.vlgmr.msra.gmra.mxu1 %vm59_vm0, %v3256_v59 }
 0x118   :  { %v108_v61 = vsel %vm107_vm7, %v2998_v48, %v104_v60  ;;  %v2733_v48 = vld [vmem:[%s4080_s7 + $0x130] sm:$0xff] }
 0x119   :  { %v110_v62 = vmul.f32 %v108_v61, %v3209_v21  ;;  %v117_v21 = vld [vmem:[%s4082_s1] sm:$0x3]  ;;  %v2970_v61 = vld [vmem:[%s4079_s8 + $0x5] ss:$0 sm:$0xff] }
 0x11a   :  { %v118_v22 = vsub.f32 1.0, %v117_v21 }
 0x11b   :  { %v113_v63 = vmul.f32 %v111_v51, %v110_v62 }
 0x11c   :  { %v119_v23 = vmul.f32 -10000.0, %v118_v22 }
 0x11d   :  { %v3263_v0 = vadd.f32 %v114_v54, %v113_v63 }
 0x11e   :  { %v3305_v24 = vperm.slane %v119_v23, 0  ;;  %v121_v28 = vrot.slane %v119_v23, 1 }
 0x11f   :  { %2698 = vmatmul.msk.f32.vlgmr.msra.gmra.mxu2 %vm59_vm0, %v3263_v0  ;;  %2704 = vmatmul.msk.f32.gmra.mxu1 %vm59_vm0, %v3263_v0 }
 0x120   :  { %395 = vmatpush.msra.mxu2 %v2722_v1  ;;  %v3309_v29 = vperm.slane %v121_v28, 0 }
 0x122   :  { %396 = vmatpush.msra.mxu2 %v2721_v2  ;;  %v2971_v2 = vld [vmem:[%s4079_s8 + $0x9] ss:$0 sm:$0xff] }
 0x124   :  { %397 = vmatpush.msra.mxu2 %v2720_v3  ;;  %v2969_v3 = vld [vmem:[%s4079_s8 + $0x1] ss:$0 sm:$0xff] }
 0x126   :  { %398 = vmatpush.msra.mxu2 %v2719_v4 }
 0x127   :  { %2709 = vmatmul.msk.f32.vlgmr.msrb.gmra.mxu2 %vm59_vm0, %v3256_v59 }
 0x12f   :  { %2710 = vmatmul.msk.f32.gmra.mxu2 %vm59_vm0, %v3263_v0 }
 0x137   :  { %2723 = vmatmul.msk.f32.vlgmr.msra.gmra.mxu2 %vm59_vm0, %v3256_v59 }
 0x13f   :  { %2724 = vmatmul.msk.f32.gmra.mxu2 %vm59_vm0, %v3263_v0 }
 0x194   :  { %v182_v7 = vpop.f32.mrf.mxu1  ;;  %v152_v8 = vpop.f32.mrf.mxu0 }
 0x195   :  { %v183_v9 = vadd.f32 %v2967_v5, %v182_v7  ;;  %v153_v10 = vadd.f32 %v2966_v6, %v152_v8 }
 0x197   :  { %2711 = vmatpush.xpose.msk.msra.mxu3 %vm222_vm8, %v183_v9 }
 0x19a   :  { %2712 = vmatmul.msk.f32.vlgmr.msra.gmra.mxu3 %vm222_vm8, %v153_v10  ;;  %v2749_v10 = vld [vmem:[%s4080_s7 + $0x58] sm:$0xff] }
 0x19c   :  { %v185_v11 = vpop.f32.mrf.mxu1 }
 0x19d   :  { %v186_v12 = vadd.f32 %v2967_v5, %v185_v11 }
 0x19f   :  { %2713 = vmatpush.xpose.msk.msrb.mxu3 %vm222_vm8, %v186_v12  ;;  %v2748_v12 = vld [vmem:[%s4080_s7 + $0x50] sm:$0xff] }
 0x1a2   :  { %v155_v14 = vpop.f32.mrf.mxu2 }
 0x1a3   :  { %v156_v15 = vadd.f32 %v2966_v6, %v155_v14 }
 0x1a5   :  { %2714 = vmatmul.msk.f32.vlgmr.msrb.gmra.mxu3 %vm222_vm8, %v156_v15 }
 0x1aa   :  { %v212_v17 = vpop.f32.mrf.mxu2 }
 0x1ab   :  { %v213_v18 = vadd.f32 %v2968_v16, %v212_v17  ;;  %v2746_v17 = vld [vmem:[%s4080_s7 + $0x40] sm:$0xff] }
 0x1ad   :  { %315 = vmatpush.msra.mxu3 %v213_v18 }
 0x1af   :  { %425 = vmatpush.msrb.mxu3 %v2728_v43  ;;  %v2760_v43 = vld [vmem:[%s4080_s7 + $0x150] sm:$0xff] }
 0x1b1   :  { %426 = vmatpush.msrb.mxu3 %v2727_v44  ;;  %v2759_v44 = vld [vmem:[%s4080_s7 + $0x148] sm:$0xff] }
 0x1b2   :  { %v215_v19 = vpop.f32.mrf.mxu2 }
 0x1b3   :  { %v216_v20 = vadd.f32 %v2968_v16, %v215_v19  ;;  %427 = vmatpush.msrb.mxu3 %v2726_v45  ;;  %v2747_v16 = vld [vmem:[%s4080_s7 + $0x48] sm:$0xff]  ;;  %v2758_v45 = vld [vmem:[%s4080_s7 + $0x140] sm:$0xff] }
 0x1b5   :  { %338 = vmatpush.msrb.mxu0 %v216_v20  ;;  %428 = vmatpush.msrb.mxu3 %v2725_v46 }
 0x1b7   :  { %455 = vmatpush.msra.mxu0 %v2734_v47 }
 0x1b9   :  { %456 = vmatpush.msra.mxu0 %v2733_v48 }
 0x1ba   :  { %v400_v62 = vpop.f32.mrf.mxu2 }
 0x1bb   :  { %457 = vmatpush.msra.mxu0 %v2732_v49  ;;  %v401_v6 = vadd.f32 %v2969_v3, %v400_v62 }
 0x1bd   :  { %458 = vmatpush.msra.mxu0 %v2731_v50 }
 0x1c2   :  { %v403_v8 = vpop.f32.mrf.mxu2 }
 0x1c3   :  { %v404_v11 = vadd.f32 %v2969_v3, %v403_v8 }
 0x21d   :  { %v246_v25 = vpop.f32.mrf.mxu3 }
 0x21e   :  { %v247_v26 = vadd.f32 %v246_v25, %v3305_v24 }
 0x220   :  { %v275_v27 = vsel %vm222_vm8, %v247_v26, -inf }
 0x221   :  { %276 = vmax.xlane.f32.xlu2 %v275_v27 }
 0x228   :  { %v272_v30 = vpop.f32.mrf.mxu3 }
 0x229   :  { %v273_v31 = vadd.f32 %v272_v30, %v3309_v29 }
 0x22b   :  { %v278_v32 = vsel %vm222_vm8, %v273_v31, -inf }
 0x22c   :  { %279 = vmax.xlane.f32.xlu2 %v278_v32 }
 0x294   :  { %v277_v33 = vpop.xlane.xlu2 %276 }
 0x295   :  { %v281_v34 = vsub.f32 %v247_v26, %v277_v33 }
 0x297   :  { %v283_v35 = vmul.f32 1.442695, %v281_v34 }
 0x299   :  { %2999 = vpow2.f32 %v283_v35 }
 0x29f   :  { %v3000_v36 = vpop.eup %2999  ;;  %v280_v37 = vpop.xlane.xlu2 %279 }
 0x2a0   :  { %v282_v38 = vsub.f32 %v273_v31, %v280_v37  ;;  %v287_v39 = vsel %vm222_vm8, %v3000_v36, 0.0 }
 0x2a1   :  { %288 = vadd.xlane.f32.xlu0 %v287_v39  ;;  %v2754_v39 = vld [vmem:[%s4080_s7 + $0xd0] sm:$0xff] }
 0x2a2   :  { %v285_v40 = vmul.f32 1.442695, %v282_v38  ;;  %v2755_v38 = vld [vmem:[%s4080_s7 + $0xd8] sm:$0xff] }
 0x2a4   :  { %3001 = vpow2.f32 %v285_v40  ;;  %v2753_v40 = vld [vmem:[%s4080_s7 + $0xc8] sm:$0xff] }
 0x2aa   :  { %v3002_v41 = vpop.eup %3001 }
 0x2ab   :  { %v290_v42 = vsel %vm222_vm8, %v3002_v41, 0.0 }
 0x2ac   :  { %291 = vadd.xlane.f32.xlu1 %v290_v42  ;;  %v2761_v42 = vld [vmem:[%s4080_s7 + $0x158] sm:$0xff] }
 0x314   :  { %v289_v51 = vpop.xlane.xlu0 %288 }
 0x315   :  { %3003 = vrcp.f32 %v289_v51 }
 0x31b   :  { %v3004_v53 = vpop.eup %3003 }
 0x31c   :  { %v295_v54 = vmul.f32 %v3004_v53, %v3000_v36 }
 0x31e   :  { %2715 = vmatmul.msk.f32.vlgmr.msra.gmra.mxu3 %vm222_vm8, %v295_v54 }
 0x31f   :  { %v292_v55 = vpop.xlane.xlu1 %291 }
 0x320   :  { %3005 = vrcp.f32 %v292_v55  ;;  %v2973_v55 = vld [vmem:[%s4079_s8 + $0x6] ss:$0 sm:$0xff] }
 0x326   :  { %v3006_v56 = vpop.eup %3005  ;;  %2729 = vmatmul.msk.f32.vlgmr.msrb.gmra.mxu3 %vm59_vm0, %v3256_v59 }
 0x327   :  { %v296_v57 = vmul.f32 %v3006_v56, %v3002_v41  ;;  %v2752_v41 = vld [vmem:[%s4080_s7 + $0xc0] sm:$0xff] }
 0x329   :  { %2716 = vmatmul.msk.f32.vlgmr.msrb.gmra.mxu0 %vm222_vm8, %v296_v57 }
 0x32e   :  { %2730 = vmatmul.msk.f32.gmra.mxu3 %vm59_vm0, %v3263_v0 }
 0x331   :  { %2735 = vmatmul.msk.f32.vlgmr.msra.gmra.mxu0 %vm59_vm0, %v3256_v59 }
 0x339   :  { %2736 = vmatmul.msk.f32.gmra.mxu0 %vm59_vm0, %v3263_v0 }
 0x3a1   :  { %v317_v58 = vpop.f32.mrf.mxu3 }
 0x3a2   :  { %2717 = vmatmul.msk.f32.vlgmr.msrb.gmra.mxu1 %vm222_vm8, %v317_v58 }
 0x3a6   :  { %v340_v60 = vpop.f32.mrf.mxu0 }
 0x3a9   :  { %v430_v63 = vpop.f32.mrf.mxu3 }
 0x3aa   :  { %v431_v1 = vadd.f32 %v2970_v61, %v430_v63  ;;  %2718 = vmatmul.msk.f32.gmra.mxu1 %vm222_vm8, %v340_v60  ;;  %v2974_v60 = vld [vmem:[%s4079_s8 + $0xa] ss:$0 sm:$0xff] }
 0x3ac   :  { %2737 = vmatpush.xpose.msk.msra.mxu1 %vm222_vm8, %v431_v1 }
 0x3ae   :  { %v460_v4 = vpop.f32.mrf.mxu0 }
 0x3af   :  { %v461_v5 = vadd.f32 %v2971_v2, %v460_v4 }
 0x3b0   :  { %609 = vmatpush.msrb.mxu1 %v2743_v52  ;;  %v2770_v52 = vld [vmem:[%s4083_s9 + $0x10] sm:$0xff] }
 0x3b1   :  { %v433_v7 = vpop.f32.mrf.mxu3  ;;  %558 = vmatpush.msra.mxu3 %v461_v5  ;;  %v2776_v5 = vld [vmem:[%s4080_s7 + $0x78] sm:$0xff] }
 0x3b2   :  { %v434_v9 = vadd.f32 %v2970_v61, %v433_v7  ;;  %2738 = vmatmul.msk.f32.vlgmr.msra.gmra.mxu1 %vm222_vm8, %v401_v6  ;;  %v2972_v61 = vld [vmem:[%s4079_s8 + $0x2] ss:$0 sm:$0xff]  ;;  %v2775_v7 = vld [vmem:[%s4080_s7 + $0x70] sm:$0xff] }
 0x3b3   :  { %668 = vmatpush.msrb.mxu3 %v2755_v38  ;;  %v2782_v38 = vld [vmem:[%s4080_s7 + $0xf8] sm:$0xff] }
 0x3b4   :  { %2739 = vmatpush.xpose.msk.msrb.mxu2 %vm222_vm8, %v434_v9 }
 0x3b5   :  { %669 = vmatpush.msrb.mxu3 %v2754_v39  ;;  %v2781_v39 = vld [vmem:[%s4080_s7 + $0xf0] sm:$0xff] }
 0x3b6   :  { %v463_v14 = vpop.f32.mrf.mxu0 }
 0x3b7   :  { %v464_v15 = vadd.f32 %v2971_v2, %v463_v14  ;;  %2740 = vmatmul.msk.f32.vlgmr.msrb.gmra.mxu2 %vm222_vm8, %v404_v11  ;;  %670 = vmatpush.msrb.mxu3 %v2753_v40  ;;  %v2773_v11 = vld [vmem:[%s4080_s7 + $0x60] sm:$0xff]  ;;  %v2780_v40 = vld [vmem:[%s4080_s7 + $0xe8] sm:$0xff] }
 0x3b8   :  { %638 = vmatpush.msra.mxu2 %v2749_v10  ;;  %v2774_v10 = vld [vmem:[%s4080_s7 + $0x68] sm:$0xff]  ;;  %v3466_v14 = vld [vmem:[%s4084_s10] sm:$0x3f] }
 0x3b9   :  { %581 = vmatpush.msrb.mxu0 %v464_v15  ;;  %671 = vmatpush.msrb.mxu3 %v2752_v41  ;;  %v373_v15 = vperm.slane %v3466_v14, 0  ;;  %v2779_v41 = vld [vmem:[%s4080_s7 + $0xe0] sm:$0xff] }
 0x3ba   :  { %639 = vmatpush.msra.mxu2 %v2748_v12 }
 0x3bb   :  { %698 = vmatpush.msra.mxu0 %v2761_v42  ;;  %v2788_v42 = vld [vmem:[%s4080_s7 + $0x178] sm:$0xff] }
 0x3bc   :  { %640 = vmatpush.msra.mxu2 %v2747_v16 }
 0x3bd   :  { %699 = vmatpush.msra.mxu0 %v2760_v43  ;;  %v2787_v43 = vld [vmem:[%s4080_s7 + $0x170] sm:$0xff] }
 0x3be   :  { %641 = vmatpush.msra.mxu2 %v2746_v17 }
 0x3bf   :  { %2750 = vmatmul.msk.f32.vlgmr.msra.gmra.mxu2 %vm59_vm0, %v3256_v59  ;;  %700 = vmatpush.msra.mxu0 %v2759_v44  ;;  %v2786_v44 = vld [vmem:[%s4080_s7 + $0x168] sm:$0xff] }
 0x3c1   :  { %701 = vmatpush.msra.mxu0 %v2758_v45  ;;  %v2785_v45 = vld [vmem:[%s4080_s7 + $0x160] sm:$0xff] }
 0x3c7   :  { %2751 = vmatmul.msk.f32.gmra.mxu2 %vm59_vm0, %v3263_v0 }
 0x41f   :  { %v3383_v18 = vpop.f32.mrf.mxu1 }
 0x427   :  { %v3385_v19 = vpop.f32.mrf.mxu1 }
 0x428   :  { %v375_v16 = vadd.f32 %v373_v15, %v3385_v19 }
 0x42f   :  { %v489_v20 = vpop.f32.mrf.mxu1 }
 0x430   :  { %v490_v21 = vadd.f32 %v489_v20, %v3305_v24 }
 0x432   :  { %v518_v22 = vsel %vm222_vm8, %v490_v21, -inf }
 0x433   :  { %519 = vmax.xlane.f32.xlu2 %v518_v22 }
 0x43a   :  { %v515_v23 = vpop.f32.mrf.mxu2 }
 0x43b   :  { %v516_v25 = vadd.f32 %v515_v23, %v3309_v29 }
 0x43d   :  { %v521_v26 = vsel %vm222_vm8, %v516_v25, -inf }
 0x43e   :  { %522 = vmax.xlane.f32.xlu0 %v521_v26 }
 0x442   :  { %v643_v56 = vpop.f32.mrf.mxu2 }
 0x443   :  { %v644_v1 = vadd.f32 %v2972_v61, %v643_v56 }
 0x44a   :  { %v646_v3 = vpop.f32.mrf.mxu2 }
 0x44b   :  { %v647_v6 = vadd.f32 %v2972_v61, %v646_v3  ;;  %v2975_v61 = vld [vmem:[%s4079_s8 + $0x3] ss:$0 sm:$0xff] }
 0x4a6   :  { %v520_v27 = vpop.xlane.xlu2 %519 }
 0x4a7   :  { %v524_v28 = vsub.f32 %v490_v21, %v520_v27 }
 0x4a9   :  { %v526_v30 = vmul.f32 1.442695, %v524_v28 }
 0x4ab   :  { %3007 = vpow2.f32 %v526_v30 }
 0x4b1   :  { %v3008_v31 = vpop.eup %3007  ;;  %v523_v32 = vpop.xlane.xlu0 %522 }
 0x4b2   :  { %v525_v33 = vsub.f32 %v516_v25, %v523_v32  ;;  %v530_v34 = vsel %vm222_vm8, %v3008_v31, 0.0 }
 0x4b3   :  { %531 = vadd.xlane.f32.xlu1 %v530_v34 }
 0x4b4   :  { %v528_v35 = vmul.f32 1.442695, %v525_v33 }
 0x4b6   :  { %3009 = vpow2.f32 %v528_v35 }
 0x4bc   :  { %v3010_v36 = vpop.eup %3009 }
 0x4bd   :  { %v533_v37 = vsel %vm222_vm8, %v3010_v36, 0.0 }
 0x4be   :  { %534 = vadd.xlane.f32.xlu2 %v533_v37 }
 0x526   :  { %v532_v46 = vpop.xlane.xlu1 %531 }
 0x527   :  { %3011 = vrcp.f32 %v532_v46 }
 0x52d   :  { %v3012_v47 = vpop.eup %3011 }
 0x52e   :  { %v538_v48 = vmul.f32 %v3012_v47, %v3008_v31 }
 0x530   :  { %2741 = vmatmul.msk.f32.vlgmr.msra.gmra.mxu3 %vm222_vm8, %v538_v48 }
 0x531   :  { %v535_v49 = vpop.xlane.xlu2 %534 }
 0x532   :  { %3013 = vrcp.f32 %v535_v49 }
 0x538   :  { %v3014_v50 = vpop.eup %3013  ;;  %2756 = vmatmul.msk.f32.vlgmr.msrb.gmra.mxu3 %vm59_vm0, %v3256_v59 }
 0x539   :  { %v539_v51 = vmul.f32 %v3014_v50, %v3010_v36 }
 0x53b   :  { %2742 = vmatmul.msk.f32.vlgmr.msrb.gmra.mxu0 %vm222_vm8, %v539_v51 }
 0x540   :  { %2757 = vmatmul.msk.f32.gmra.mxu3 %vm59_vm0, %v3263_v0 }
 0x543   :  { %2762 = vmatmul.msk.f32.vlgmr.msra.gmra.mxu0 %vm59_vm0, %v3256_v59 }
 0x54b   :  { %2763 = vmatmul.msk.f32.gmra.mxu0 %vm59_vm0, %v3263_v0 }
 0x5b3   :  { %v560_v53 = vpop.f32.mrf.mxu3 }
 0x5b4   :  { %2744 = vmatmul.msk.f32.vlgmr.msrb.gmra.mxu1 %vm222_vm8, %v560_v53 }
 0x5b8   :  { %v583_v54 = vpop.f32.mrf.mxu0 }
 0x5bb   :  { %v673_v57 = vpop.f32.mrf.mxu3 }
 0x5bc   :  { %v674_v58 = vadd.f32 %v2973_v55, %v673_v57  ;;  %2745 = vmatmul.msk.f32.gmra.mxu1 %vm222_vm8, %v583_v54 }
 0x5be   :  { %2764 = vmatpush.xpose.msk.msra.mxu1 %vm222_vm8, %v674_v58 }
 0x5c0   :  { %v703_v62 = vpop.f32.mrf.mxu0 }
 0x5c1   :  { %v704_v63 = vadd.f32 %v2974_v60, %v703_v62 }
 0x5c2   :  { %852 = vmatpush.msrb.mxu1 %v2770_v52 }
 0x5c3   :  { %v676_v2 = vpop.f32.mrf.mxu3  ;;  %801 = vmatpush.msra.mxu3 %v704_v63 }
 0x5c4   :  { %v677_v4 = vadd.f32 %v2973_v55, %v676_v2  ;;  %2765 = vmatmul.msk.f32.vlgmr.msra.gmra.mxu1 %vm222_vm8, %v644_v1  ;;  %v2976_v55 = vld [vmem:[%s4079_s8 + $0x7] ss:$0 sm:$0xff] }
 0x5c5   :  { %911 = vmatpush.msrb.mxu3 %v2782_v38 }
 0x5c6   :  { %2766 = vmatpush.xpose.msk.msrb.mxu2 %vm222_vm8, %v677_v4 }
 0x5c7   :  { %912 = vmatpush.msrb.mxu3 %v2781_v39 }
 0x5c8   :  { %v706_v8 = vpop.f32.mrf.mxu0 }
 0x5c9   :  { %v707_v9 = vadd.f32 %v2974_v60, %v706_v8  ;;  %2767 = vmatmul.msk.f32.vlgmr.msrb.gmra.mxu2 %vm222_vm8, %v647_v6  ;;  %913 = vmatpush.msrb.mxu3 %v2780_v40  ;;  %v2977_v60 = vld [vmem:[%s4079_s8 + $0xb] ss:$0 sm:$0xff]  ;;  %v374_v8 = vadd.f32 %v373_v15, %v3383_v18  ;;  %v2797_v40 = vld [vmem:[%s4083_s9 + $0x18] sm:$0xff] }
 0x5ca   :  { %881 = vmatpush.msra.mxu2 %v2776_v5 }
 0x5cb   :  { %824 = vmatpush.msrb.mxu0 %v707_v9  ;;  %914 = vmatpush.msrb.mxu3 %v2779_v41 }
 0x5cc   :  { %882 = vmatpush.msra.mxu2 %v2775_v7 }
 0x5cd   :  { %941 = vmatpush.msra.mxu0 %v2788_v42 }
 0x5ce   :  { %883 = vmatpush.msra.mxu2 %v2774_v10 }
 0x5cf   :  { %942 = vmatpush.msra.mxu0 %v2787_v43 }
 0x5d0   :  { %884 = vmatpush.msra.mxu2 %v2773_v11 }
 0x5d1   :  { %2777 = vmatmul.msk.f32.vlgmr.msra.gmra.mxu2 %vm59_vm0, %v3256_v59  ;;  %943 = vmatpush.msra.mxu0 %v2786_v44 }
 0x5d3   :  { %944 = vmatpush.msra.mxu0 %v2785_v45 }
 0x5d9   :  { %2778 = vmatmul.msk.f32.gmra.mxu2 %vm59_vm0, %v3263_v0 }
 0x631   :  { %v3461_v12 = vpop.f32.mrf.mxu1 }
 0x632   :  { %v617_v9 = vadd.f32 %v3461_v12, %v374_v8 }
 0x639   :  { %v614_v17 = vpop.f32.mrf.mxu1 }
 0x63a   :  { %v3472_v20 = vadd.f32 %v614_v17, %v375_v16 }
 0x641   :  { %v732_v21 = vpop.f32.mrf.mxu1 }
 0x642   :  { %v733_v22 = vadd.f32 %v732_v21, %v3305_v24 }
 0x644   :  { %v761_v23 = vsel %vm222_vm8, %v733_v22, -inf }
 0x645   :  { %762 = vmax.xlane.f32.xlu0 %v761_v23 }
 0x64c   :  { %v758_v25 = vpop.f32.mrf.mxu2 }
 0x64d   :  { %v759_v26 = vadd.f32 %v758_v25, %v3309_v29 }
 0x64f   :  { %v764_v27 = vsel %vm222_vm8, %v759_v26, -inf }
 0x650   :  { %765 = vmax.xlane.f32.xlu1 %v764_v27 }
 0x654   :  { %v886_v56 = vpop.f32.mrf.mxu2 }
 0x655   :  { %v887_v1 = vadd.f32 %v2975_v61, %v886_v56 }
 0x65c   :  { %v889_v3 = vpop.f32.mrf.mxu2 }
 0x65d   :  { %v890_v5 = vadd.f32 %v2975_v61, %v889_v3  ;;  %v1159_v61 = vld [vmem:[%s4086_s11 + $0x10] sm:$0xff] }
 0x6b8   :  { %v763_v28 = vpop.xlane.xlu0 %762 }
 0x6b9   :  { %v767_v30 = vsub.f32 %v733_v22, %v763_v28 }
 0x6bb   :  { %v769_v31 = vmul.f32 1.442695, %v767_v30 }
 0x6bd   :  { %3015 = vpow2.f32 %v769_v31 }
 0x6c3   :  { %v3016_v19 = vpop.eup %3015  ;;  %v766_v32 = vpop.xlane.xlu1 %765 }
 0x6c4   :  { %v768_v33 = vsub.f32 %v759_v26, %v766_v32  ;;  %v773_v34 = vsel %vm222_vm8, %v3016_v19, 0.0 }
 0x6c5   :  { %774 = vadd.xlane.f32.xlu2 %v773_v34 }
 0x6c6   :  { %v771_v35 = vmul.f32 1.442695, %v768_v33 }
 0x6c8   :  { %3017 = vpow2.f32 %v771_v35 }
 0x6ce   :  { %v3018_v36 = vpop.eup %3017 }
 0x6cf   :  { %v776_v37 = vsel %vm222_vm8, %v3018_v36, 0.0 }
 0x6d0   :  { %777 = vadd.xlane.f32.xlu0 %v776_v37 }
 0x738   :  { %v775_v46 = vpop.xlane.xlu2 %774 }
 0x739   :  { %3019 = vrcp.f32 %v775_v46 }
 0x73f   :  { %v3020_v47 = vpop.eup %3019 }
 0x740   :  { %v781_v48 = vmul.f32 %v3020_v47, %v3016_v19 }
 0x742   :  { %2768 = vmatmul.msk.f32.vlgmr.msra.gmra.mxu3 %vm222_vm8, %v781_v48 }
 0x743   :  { %v778_v49 = vpop.xlane.xlu0 %777 }
 0x744   :  { %3021 = vrcp.f32 %v778_v49 }
 0x74a   :  { %v3022_v50 = vpop.eup %3021  ;;  %2783 = vmatmul.msk.f32.vlgmr.msrb.gmra.mxu3 %vm59_vm0, %v3256_v59 }
 0x74b   :  { %v782_v51 = vmul.f32 %v3022_v50, %v3018_v36 }
 0x74d   :  { %2769 = vmatmul.msk.f32.vlgmr.msrb.gmra.mxu0 %vm222_vm8, %v782_v51 }
 0x752   :  { %2784 = vmatmul.msk.f32.gmra.mxu3 %vm59_vm0, %v3263_v0 }
 0x755   :  { %2789 = vmatmul.msk.f32.vlgmr.msra.gmra.mxu0 %vm59_vm0, %v3256_v59 }
 0x75d   :  { %2790 = vmatmul.msk.f32.gmra.mxu0 %vm59_vm0, %v3263_v0 }
 0x7c5   :  { %v803_v53 = vpop.f32.mrf.mxu3 }
 0x7c6   :  { %2771 = vmatmul.msk.f32.vlgmr.msrb.gmra.mxu1 %vm222_vm8, %v803_v53 }
 0x7ca   :  { %v826_v54 = vpop.f32.mrf.mxu0 }
 0x7cd   :  { %v916_v57 = vpop.f32.mrf.mxu3 }
 0x7ce   :  { %v917_v58 = vadd.f32 %v2976_v55, %v916_v57  ;;  %2772 = vmatmul.msk.f32.gmra.mxu1 %vm222_vm8, %v826_v54 }
 0x7d0   :  { %2791 = vmatpush.xpose.msk.msra.mxu1 %vm222_vm8, %v917_v58 }
 0x7d2   :  { %v946_v62 = vpop.f32.mrf.mxu0 }
 0x7d3   :  { %v947_v63 = vadd.f32 %v2977_v60, %v946_v62  ;;  %v1158_v62 = vld [vmem:[%s4086_s11 + $0x8] sm:$0xff] }
 0x7d4   :  { %1095 = vmatpush.msrb.mxu1 %v2797_v40  ;;  %v1212_v40 = vld [vmem:[%s4087_s13] sm:$0xff] }
 0x7d5   :  { %v919_v2 = vpop.f32.mrf.mxu3  ;;  %1044 = vmatpush.msra.mxu3 %v947_v63  ;;  %v1157_v63 = vld [vmem:[%s4086_s11] sm:$0xff] }
 0x7d6   :  { %v920_v4 = vadd.f32 %v2976_v55, %v919_v2  ;;  %2792 = vmatmul.msk.f32.vlgmr.msra.gmra.mxu1 %vm222_vm8, %v887_v1 }
 0x7d8   :  { %2793 = vmatpush.xpose.msk.msrb.mxu2 %vm222_vm8, %v920_v4 }
 0x7da   :  { %v949_v6 = vpop.f32.mrf.mxu0 }
 0x7db   :  { %v950_v7 = vadd.f32 %v2977_v60, %v949_v6  ;;  %2794 = vmatmul.msk.f32.vlgmr.msrb.gmra.mxu2 %vm222_vm8, %v890_v5 }
 0x7dd   :  { %1067 = vmatpush.msrb.mxu0 %v950_v7 }
 0x843   :  { %v854_v10 = vpop.f32.mrf.mxu1 }
 0x844   :  { %v860_v11 = vadd.f32 %v854_v10, %v617_v9 }
 0x84b   :  { %v857_v16 = vpop.f32.mrf.mxu1 }
 0x84c   :  { %v861_v17 = vadd.f32 %v857_v16, %v3472_v20 }
 0x853   :  { %v975_v21 = vpop.f32.mrf.mxu1 }
 0x854   :  { %v976_v22 = vadd.f32 %v975_v21, %v3305_v24 }
 0x856   :  { %v1004_v23 = vsel %vm222_vm8, %v976_v22, -inf }
 0x857   :  { %1005 = vmax.xlane.f32.xlu1 %v1004_v23 }
 0x85e   :  { %v1001_v25 = vpop.f32.mrf.mxu2 }
 0x85f   :  { %v1002_v26 = vadd.f32 %v1001_v25, %v3309_v29 }
 0x861   :  { %v1007_v27 = vsel %vm222_vm8, %v1002_v26, -inf }
 0x862   :  { %1008 = vmax.xlane.f32.xlu2 %v1007_v27  ;;  %v1154_v27 = vperm.slane %v3466_v14, 2 }
 0x8ca   :  { %v1006_v18 = vpop.xlane.xlu1 %1005 }
 0x8cb   :  { %v1010_v15 = vsub.f32 %v976_v22, %v1006_v18  ;;  %v1151_v22 = vperm.slane %v3466_v14, 1 }
 0x8cd   :  { %v1012_v12 = vmul.f32 1.442695, %v1010_v15 }
 0x8cf   :  { %3023 = vpow2.f32 %v1012_v12 }
 0x8d5   :  { %v3024_v28 = vpop.eup %3023  ;;  %v1009_v30 = vpop.xlane.xlu2 %1008 }
 0x8d6   :  { %v1011_v31 = vsub.f32 %v1002_v26, %v1009_v30  ;;  %v1016_v20 = vsel %vm222_vm8, %v3024_v28, 0.0 }
 0x8d7   :  { %1017 = vadd.xlane.f32.xlu0 %v1016_v20 }
 0x8d8   :  { %v1014_v19 = vmul.f32 1.442695, %v1011_v31 }
 0x8da   :  { %3025 = vpow2.f32 %v1014_v19 }
 0x8e0   :  { %v3026_v32 = vpop.eup %3025 }
 0x8e1   :  { %v1019_v33 = vsel %vm222_vm8, %v3026_v32, 0.0 }
 0x8e2   :  { %1020 = vadd.xlane.f32.xlu1 %v1019_v33  ;;  %v1219_v33 = vld [vmem:[%s4087_s13 + $0x38] sm:$0xff] }
 0x8e3   :  { %1236 = vmatpush.msrb.mxu3 %v1219_v33  ;;  %v2812_v33 = vld [vmem:[%s4080_s7 + $0x200] sm:$0xff] }
 0x94a   :  { %v1018_v34 = vpop.xlane.xlu0 %1017 }
 0x94b   :  { %3027 = vrcp.f32 %v1018_v34  ;;  %v1218_v34 = vld [vmem:[%s4087_s13 + $0x30] sm:$0xff] }
 0x94c   :  { %1237 = vmatpush.msrb.mxu3 %v1218_v34  ;;  %v2819_v34 = vld [vmem:[%s4080_s7 + $0x280] sm:$0xff] }
 0x951   :  { %v3028_v35 = vpop.eup %3027 }
 0x952   :  { %v1024_v36 = vmul.f32 %v3028_v35, %v3024_v28  ;;  %v1217_v35 = vld [vmem:[%s4087_s13 + $0x28] sm:$0xff] }
 0x953   :  { %1238 = vmatpush.msrb.mxu3 %v1217_v35 }
 0x954   :  { %2795 = vmatmul.msk.f32.vlgmr.msra.gmra.mxu3 %vm222_vm8, %v1024_v36  ;;  %v1216_v36 = vld [vmem:[%s4087_s13 + $0x20] sm:$0xff] }
 0x955   :  { %v1021_v37 = vpop.xlane.xlu1 %1020  ;;  %1239 = vmatpush.msrb.mxu3 %v1216_v36 }
 0x956   :  { %3029 = vrcp.f32 %v1021_v37  ;;  %v1215_v37 = vld [vmem:[%s4087_s13 + $0x18] sm:$0xff] }
 0x957   :  { %1240 = vmatpush.msrb.mxu3 %v1215_v37 }
 0x95c   :  { %v3030_v38 = vpop.eup %3029 }
 0x95d   :  { %v1025_v39 = vmul.f32 %v3030_v38, %v3026_v32  ;;  %v1214_v38 = vld [vmem:[%s4087_s13 + $0x10] sm:$0xff] }
 0x95e   :  { %1241 = vmatpush.msrb.mxu3 %v1214_v38 }
 0x95f   :  { %2796 = vmatmul.msk.f32.vlgmr.msrb.gmra.mxu0 %vm222_vm8, %v1025_v39  ;;  %v1213_v39 = vld [vmem:[%s4087_s13 + $0x8] sm:$0xff] }
 0x960   :  { %1242 = vmatpush.msrb.mxu3 %v1213_v39 }
 0x962   :  { %1243 = vmatpush.msrb.mxu3 %v1212_v40 }
 0x9d7   :  { %v1046_v41 = vpop.f32.mrf.mxu3 }
 0x9d8   :  { %2798 = vmatmul.msk.f32.vlgmr.msrb.gmra.mxu1 %vm222_vm8, %v1046_v41  ;;  %v2978_v41 = vld [vmem:[%s4085_s12] ss:$0 sm:$0xff] }
 0x9dc   :  { %v1069_v42 = vpop.f32.mrf.mxu0 }
 0x9e0   :  { %2799 = vmatmul.msk.f32.gmra.mxu1 %vm222_vm8, %v1069_v42 }
 0xa55   :  { %v1097_v43 = vpop.f32.mrf.mxu1 }
 0xa56   :  { %v1103_v44 = vadd.f32 %v1097_v43, %v860_v11 }
 0xa58   :  { %v1105_v45 = vadd.f32 %v1103_v44, %v3256_v59 }
 0xa5a   :  { %v1107_v46 = vsel %vm59_vm0, %v1105_v45, 0.0 }
 0xa5b   :  { %1108 = vadd.xlane.f32.xlu2 %v1107_v46 }
 0xa5d   :  { %v1100_v47 = vpop.f32.mrf.mxu1 }
 0xa5e   :  { %v1104_v48 = vadd.f32 %v1100_v47, %v861_v17 }
 0xa60   :  { %v1106_v49 = vadd.f32 %v1104_v48, %v3263_v0  ;;  %v1160_v0 = vld [vmem:[%s4086_s11 + $0x18] sm:$0xff] }
 0xa61   :  { %1183 = vmatpush.msra.mxu2 %v1160_v0 }
 0xa62   :  { %v1110_v50 = vsel %vm59_vm0, %v1106_v49, 0.0 }
 0xa63   :  { %1111 = vadd.xlane.f32.xlu0 %v1110_v50  ;;  %1184 = vmatpush.msra.mxu2 %v1159_v61 }
 0xa65   :  { %1185 = vmatpush.msra.mxu2 %v1158_v62 }
 0xa67   :  { %1186 = vmatpush.msra.mxu2 %v1157_v63  ;;  %v1220_v63 = vperm.slane %v3466_v14, 3 }
 0xace   :  { %v1109_v51 = vpop.xlane.xlu2 %1108 }
 0xacf   :  { %v1113_v52 = vmul.f32 %v1109_v51, %v3200_v13 }
 0xad1   :  { %v1115_v53 = vsub.f32 %v1105_v45, %v1113_v52 }
 0xad3   :  { %v1117_v54 = vmul.f32 %v1115_v53, %v1115_v53 }
 0xad5   :  { %v1119_v55 = vsel %vm59_vm0, %v1117_v54, 0.0 }
 0xad6   :  { %1120 = vadd.xlane.f32.xlu1 %v1119_v55  ;;  %v1112_v56 = vpop.xlane.xlu0 %1111 }
 0xad7   :  { %v1114_v59 = vmul.f32 %v1112_v56, %v3200_v13 }
 0xad9   :  { %v1116_v57 = vsub.f32 %v1106_v49, %v1114_v59 }
 0xadb   :  { %v1118_v58 = vmul.f32 %v1116_v57, %v1116_v57 }
 0xadd   :  { %v1122_v60 = vsel %vm59_vm0, %v1118_v58, 0.0 }
 0xade   :  { %1123 = vadd.xlane.f32.xlu2 %v1122_v60 }
 0xb49   :  { %v1121_v1 = vpop.xlane.xlu1 %1120 }
 0xb4a   :  { %v1125_v2 = vmul.f32 %v1121_v1, %v3200_v13 }
 0xb4c   :  { %v1127_v3 = vadd.f32 1e-12, %v1125_v2 }
 0xb4e   :  { %3031 = vrsqrt.f32 %v1127_v3  ;;  %vm1135_vm10 = vweird.f32 %v1127_v3 }
 0xb51   :  { %v1124_v4 = vpop.xlane.xlu2 %1123 }
 0xb52   :  { %v1126_v5 = vmul.f32 %v1124_v4, %v3200_v13 }
 0xb54   :  { %v3032_v6 = vpop.eup %3031  ;;  %v1128_v7 = vadd.f32 1e-12, %v1126_v5 }
 0xb55   :  { %v1130_v8 = vmul.f32 %v3032_v6, %v1127_v3  ;;  %vm1136_vm9 = vweird.f32 %v3032_v6 }
 0xb56   :  { %3033 = vrsqrt.f32 %v1128_v7  ;;  %vm1137_vm11 = vmor %vm1135_vm10, %vm1136_vm9  ;;  %vm1145_vm13 = vweird.f32 %v1128_v7 }
 0xb57   :  { %v1131_v9 = vmul.f32 %v3032_v6, %v1130_v8 }
 0xb59   :  { %v1132_v10 = vmul.f32 0.5, %v1131_v9 }
 0xb5b   :  { %v1133_v11 = vsub.f32 1.5, %v1132_v10 }
 0xb5c   :  { %v3034_v16 = vpop.eup %3033 }
 0xb5d   :  { %v1134_v17 = vmul.f32 %v3032_v6, %v1133_v11  ;;  %v1140_v21 = vmul.f32 %v3034_v16, %v1128_v7  ;;  %vm1146_vm12 = vweird.f32 %v3034_v16 }
 0xb5e   :  { %vm1147_vm14 = vmor %vm1145_vm13, %vm1146_vm12 }
 0xb5f   :  { %v1138_v23 = vsel %vm1137_vm11, %v3032_v6, %v1134_v17  ;;  %v1141_v25 = vmul.f32 %v3034_v16, %v1140_v21 }
 0xb60   :  { %v1149_v26 = vmul.f32 %v1138_v23, %v1115_v53 }
 0xb61   :  { %v1142_v18 = vmul.f32 0.5, %v1141_v25 }
 0xb62   :  { %v1152_v15 = vmul.f32 %v1151_v22, %v1149_v26 }
 0xb63   :  { %v1143_v12 = vsub.f32 1.5, %v1142_v18  ;;  %v2815_v18 = vld [vmem:[%s4080_s7 + $0x218] sm:$0xff] }
 0xb64   :  { %v1155_v28 = vadd.f32 %v1154_v27, %v1152_v15  ;;  %v2822_v15 = vld [vmem:[%s4080_s7 + $0x298] sm:$0xff]  ;;  %1361 = vmatpush.msra.mxu1 %v2815_v18 }
 0xb65   :  { %v1144_v30 = vmul.f32 %v3034_v16, %v1143_v12  ;;  %1391 = vmatpush.msrb.mxu2 %v2822_v15  ;;  %v2807_v12 = vld [vmem:[%s4080_s7 + $0x190] sm:$0xff] }
 0xb66   :  { %2800 = vmatmul.msk.f32.vlgmr.msra.gmra.mxu2 %vm59_vm0, %v1155_v28 }
 0xb67   :  { %v1148_v31 = vsel %vm1147_vm14, %v3034_v16, %v1144_v30  ;;  %v2821_v30 = vld [vmem:[%s4080_s7 + $0x290] sm:$0xff] }
 0xb68   :  { %v1150_v20 = vmul.f32 %v1148_v31, %v1116_v57  ;;  %1392 = vmatpush.msrb.mxu2 %v2821_v30  ;;  %v2806_v31 = vld [vmem:[%s4080_s7 + $0x188] sm:$0xff] }
 0xb6a   :  { %v1153_v19 = vmul.f32 %v1151_v22, %v1150_v20  ;;  %v2813_v20 = vld [vmem:[%s4080_s7 + $0x208] sm:$0xff] }
 0xb6c   :  { %v1156_v32 = vadd.f32 %v1154_v27, %v1153_v19  ;;  %v2808_v27 = vld [vmem:[%s4080_s7 + $0x198] sm:$0xff]  ;;  %v2820_v19 = vld [vmem:[%s4080_s7 + $0x288] sm:$0xff] }
 0xb6d   :  { %1331 = vmatpush.msra.mxu0 %v2808_v27  ;;  %1393 = vmatpush.msrb.mxu2 %v2820_v19 }
 0xb6e   :  { %2801 = vmatmul.msk.f32.gmra.mxu2 %vm59_vm0, %v1156_v32 }
 0xb6f   :  { %1332 = vmatpush.msra.mxu0 %v2807_v12  ;;  %1394 = vmatpush.msrb.mxu2 %v2819_v34 }
 0xb71   :  { %1333 = vmatpush.msra.mxu0 %v2806_v31 }
 0xbe9   :  { %v1188_v42 = vpop.f32.mrf.mxu2 }
 0xbea   :  { %v1189_v43 = vadd.f32 %v2978_v41, %v1188_v42 }
 0xbec   :  { %v1194_v44 = vmul.f32 %v1189_v43, %v1189_v43 }
 0xbee   :  { %v1196_v45 = vmul.f32 %v1194_v44, %v1189_v43 }
 0xbf0   :  { %v1198_v46 = vmul.f32 0.044715, %v1196_v45 }
 0xbf1   :  { %v1191_v47 = vpop.f32.mrf.mxu2 }
 0xbf2   :  { %v1200_v48 = vadd.f32 %v1198_v46, %v1189_v43  ;;  %v1192_v49 = vadd.f32 %v2978_v41, %v1191_v47 }
 0xbf4   :  { %v1202_v50 = vmul.f32 0.7978846, %v1200_v48  ;;  %v1195_v51 = vmul.f32 %v1192_v49, %v1192_v49 }
 0xbf6   :  { %3035 = vtanh.f32 %v1202_v50  ;;  %v1197_v52 = vmul.f32 %v1195_v51, %v1192_v49 }
 0xbf8   :  { %v1199_v53 = vmul.f32 0.044715, %v1197_v52  ;;  %v1300_v52 = vperm.slane %v3466_v14, 5 }
 0xbfa   :  { %v1201_v54 = vadd.f32 %v1199_v53, %v1192_v49 }
 0xbfc   :  { %v3036_v55 = vpop.eup %3035  ;;  %v1203_v56 = vmul.f32 0.7978846, %v1201_v54 }
 0xbfd   :  { %v1206_v59 = vadd.f32 1.0, %v3036_v55 }
 0xbfe   :  { %3037 = vtanh.f32 %v1203_v56 }
 0xbff   :  { %v1208_v57 = vmul.f32 0.5, %v1206_v59 }
 0xc01   :  { %v1210_v58 = vmul.f32 %v1208_v57, %v1189_v43 }
 0xc03   :  { %2802 = vmatmul.msk.f32.vlgmr.msrb.gmra.mxu3 %vm1221_vm15, %v1210_v58 }
 0xc04   :  { %v3038_v60 = vpop.eup %3037 }
 0xc05   :  { %v1207_v0 = vadd.f32 1.0, %v3038_v60 }
 0xc07   :  { %v1209_v61 = vmul.f32 0.5, %v1207_v0 }
 0xc09   :  { %v1211_v62 = vmul.f32 %v1209_v61, %v1192_v49  ;;  %v1297_v49 = vperm.slane %v3466_v14, 4  ;;  %v2980_v61 = vld [vmem:[%s4079_s8 + $0x14] ss:$0 sm:$0xff] }
 0xc0b   :  { %2803 = vmatmul.msk.f32.gmra.mxu3 %vm1221_vm15, %v1211_v62  ;;  %v2979_v62 = vld [vmem:[%s4079_s8 + $0x10] ss:$0 sm:$0xff] }
 0xc86   :  { %v1245_v1 = vpop.f32.mrf.mxu3 }
 0xc87   :  { %v1246_v2 = vadd.f32 %v1245_v1, %v1220_v63 }
 0xc89   :  { %v1251_v3 = vadd.f32 %v1246_v2, %v1155_v28  ;;  %v2814_v28 = vld [vmem:[%s4080_s7 + $0x210] sm:$0xff] }
 0xc8a   :  { %1362 = vmatpush.msra.mxu1 %v2814_v28 }
 0xc8b   :  { %v1253_v4 = vsel %vm59_vm0, %v1251_v3, 0.0 }
 0xc8c   :  { %1254 = vadd.xlane.f32.xlu0 %v1253_v4  ;;  %1363 = vmatpush.msra.mxu1 %v2813_v20  ;;  %v2981_v4 = vld [vmem:[%s4079_s8 + $0x18] ss:$0 sm:$0xff] }
 0xc8e   :  { %v1248_v5 = vpop.f32.mrf.mxu3  ;;  %1364 = vmatpush.msra.mxu1 %v2812_v33 }
 0xc8f   :  { %v1249_v6 = vadd.f32 %v1248_v5, %v1220_v63 }
 0xc91   :  { %v1252_v7 = vadd.f32 %v1249_v6, %v1156_v32  ;;  %v2805_v32 = vld [vmem:[%s4080_s7 + $0x180] sm:$0xff] }
 0xc92   :  { %1334 = vmatpush.msra.mxu0 %v2805_v32 }
 0xc93   :  { %v1256_v8 = vsel %vm59_vm0, %v1252_v7, 0.0 }
 0xc94   :  { %1257 = vadd.xlane.f32.xlu1 %v1256_v8 }
 0xcff   :  { %v1255_v9 = vpop.xlane.xlu0 %1254 }
 0xd00   :  { %v1259_v10 = vmul.f32 %v1255_v9, %v3200_v13 }
 0xd02   :  { %v1261_v11 = vsub.f32 %v1251_v3, %v1259_v10  ;;  %v2838_v10 = vld [vmem:[%s4080_s7 + $0x1b8] sm:$0xff] }
 0xd04   :  { %v1263_v16 = vmul.f32 %v1261_v11, %v1261_v11 }
 0xd06   :  { %v1265_v17 = vsel %vm59_vm0, %v1263_v16, 0.0  ;;  %v2837_v16 = vld [vmem:[%s4080_s7 + $0x1b0] sm:$0xff] }
 0xd07   :  { %v1258_v21 = vpop.xlane.xlu1 %1257  ;;  %1266 = vadd.xlane.f32.xlu2 %v1265_v17  ;;  %v2836_v17 = vld [vmem:[%s4080_s7 + $0x1a8] sm:$0xff] }
 0xd08   :  { %v1260_v22 = vmul.f32 %v1258_v21, %v3200_v13 }
 0xd0a   :  { %v3611_v23 = vsub.f32 %v1252_v7, %v1260_v22 }
 0xd0c   :  { %v1264_v25 = vmul.f32 %v3611_v23, %v3611_v23 }
 0xd0e   :  { %v1268_v26 = vsel %vm59_vm0, %v1264_v25, 0.0 }
 0xd0f   :  { %1269 = vadd.xlane.f32.xlu0 %v1268_v26 }
 0xd7a   :  { %v1267_v35 = vpop.xlane.xlu2 %1266 }
 0xd7b   :  { %v1271_v36 = vmul.f32 %v1267_v35, %v3200_v13 }
 0xd7d   :  { %v1273_v37 = vadd.f32 1e-12, %v1271_v36 }
 0xd7f   :  { %3039 = vrsqrt.f32 %v1273_v37  ;;  %vm1281_vm2 = vweird.f32 %v1273_v37 }
 0xd82   :  { %v1270_v38 = vpop.xlane.xlu0 %1269 }
 0xd83   :  { %v1272_v39 = vmul.f32 %v1270_v38, %v3200_v13  ;;  %v2844_v38 = vld [vmem:[%s4080_s7 + $0x230] sm:$0xff] }
 0xd85   :  { %v3040_v40 = vpop.eup %3039  ;;  %v1274_v41 = vadd.f32 1e-12, %v1272_v39  ;;  %v2843_v39 = vld [vmem:[%s4080_s7 + $0x228] sm:$0xff] }
 0xd86   :  { %v1276_v42 = vmul.f32 %v3040_v40, %v1273_v37  ;;  %vm1282_vm1 = vweird.f32 %v3040_v40  ;;  %v2845_v37 = vld [vmem:[%s4080_s7 + $0x238] sm:$0xff] }
 0xd87   :  { %3041 = vrsqrt.f32 %v1274_v41  ;;  %vm1283_vm3 = vmor %vm1281_vm2, %vm1282_vm1  ;;  %vm1291_vm5 = vweird.f32 %v1274_v41 }
 0xd88   :  { %v1277_v43 = vmul.f32 %v3040_v40, %v1276_v42  ;;  %v2851_v42 = vld [vmem:[%s4080_s7 + $0x2b0] sm:$0xff] }
 0xd8a   :  { %v1278_v44 = vmul.f32 0.5, %v1277_v43  ;;  %v2850_v43 = vld [vmem:[%s4080_s7 + $0x2a8] sm:$0xff] }
 0xd8c   :  { %v1279_v45 = vsub.f32 1.5, %v1278_v44  ;;  %v2849_v44 = vld [vmem:[%s4080_s7 + $0x2a0] sm:$0xff] }
 0xd8d   :  { %v3042_v46 = vpop.eup %3041 }
 0xd8e   :  { %v1280_v47 = vmul.f32 %v3040_v40, %v1279_v45  ;;  %v1286_v48 = vmul.f32 %v3042_v46, %v1274_v41  ;;  %vm1292_vm4 = vweird.f32 %v3042_v46  ;;  %v2852_v41 = vld [vmem:[%s4080_s7 + $0x2b8] sm:$0xff] }
 0xd8f   :  { %vm1293_vm6 = vmor %vm1291_vm5, %vm1292_vm4  ;;  %vm2570_vm4 = vcmask 1041409  }
 0xd90   :  { %v1284_v50 = vsel %vm1283_vm3, %v3040_v40, %v1280_v47  ;;  %v1287_v51 = vmul.f32 %v3042_v46, %v1286_v48  ;;  %v2842_v40 = vld [vmem:[%s4080_s7 + $0x220] sm:$0xff] }
 0xd91   :  { %v1295_v53 = vmul.f32 %v1284_v50, %v1261_v11 }
 0xd92   :  { %v1288_v54 = vmul.f32 0.5, %v1287_v51  ;;  %v2832_v51 = vld [vmem:[%s4083_s9 + $0x20] sm:$0xff] }
 0xd93   :  { %v1298_v55 = vmul.f32 %v1297_v49, %v1295_v53  ;;  %1545 = vmatpush.msra.mxu2 %v2832_v51  ;;  %v2983_v53 = vld [vmem:[%s4079_s8 + $0x15] ss:$0 sm:$0xff] }
 0xd94   :  { %v1289_v56 = vsub.f32 1.5, %v1288_v54 }
 0xd95   :  { %v3656_v59 = vadd.f32 %v1300_v52, %v1298_v55 }
 0xd96   :  { %v1290_v57 = vmul.f32 %v3042_v46, %v1289_v56 }
 0xd97   :  { %2810 = vmatmul.msk.f32.vlgmr.msra.gmra.mxu0 %vm59_vm0, %v3656_v59  ;;  %2817 = vmatmul.msk.f32.vlgmr.msra.gmra.mxu1 %vm59_vm0, %v3656_v59 }
 0xd98   :  { %v1294_v58 = vsel %vm1293_vm6, %v3042_v46, %v1290_v57  ;;  %2824 = vmatmul.msk.f32.vlgmr.msrb.gmra.mxu2 %vm59_vm0, %v3656_v59  ;;  %vm2624_vm6 = vcmask 33792  }
 0xd99   :  { %v1296_v14 = vmul.f32 %v1294_v58, %v3611_v23  ;;  %v2835_v23 = vld [vmem:[%s4080_s7 + $0x1a0] sm:$0xff] }
 0xd9b   :  { %v1299_v60 = vmul.f32 %v1297_v49, %v1296_v14  ;;  %v2982_v14 = vld [vmem:[%s4079_s8 + $0x11] ss:$0 sm:$0xff] }
 0xd9d   :  { %v3665_v0 = vadd.f32 %v1300_v52, %v1299_v60 }
 0xd9f   :  { %2811 = vmatmul.msk.f32.gmra.mxu0 %vm59_vm0, %v3665_v0  ;;  %2818 = vmatmul.msk.f32.gmra.mxu1 %vm59_vm0, %v3665_v0 }
 0xda0   :  { %2825 = vmatmul.msk.f32.gmra.mxu2 %vm59_vm0, %v3665_v0 }
 0xe14   :  { %v1336_v63 = vpop.f32.mrf.mxu0  ;;  %v1366_v1 = vpop.f32.mrf.mxu1 }
 0xe15   :  { %v1367_v2 = vadd.f32 %v2980_v61, %v1366_v1  ;;  %v1337_v3 = vadd.f32 %v2979_v62, %v1336_v63  ;;  %v2984_v63 = vld [vmem:[%s4079_s8 + $0x19] ss:$0 sm:$0xff] }
 0xe17   :  { %2826 = vmatpush.xpose.msk.msrb.mxu0 %vm222_vm8, %v1367_v2  ;;  %v2867_v2 = vld [vmem:[%s4080_s7 + $0x1d0] sm:$0xff] }
 0xe1a   :  { %2827 = vmatmul.msk.f32.vlgmr.msrb.gmra.mxu0 %vm222_vm8, %v1337_v3 }
 0xe1b   :  { %v1396_v5 = vpop.f32.mrf.mxu2 }
 0xe1c   :  { %v1397_v6 = vadd.f32 %v2981_v4, %v1396_v5  ;;  %v1369_v7 = vpop.f32.mrf.mxu1  ;;  %v1339_v8 = vpop.f32.mrf.mxu0  ;;  %v2866_v5 = vld [vmem:[%s4080_s7 + $0x1c8] sm:$0xff] }
 0xe1d   :  { %v1370_v9 = vadd.f32 %v2980_v61, %v1369_v7  ;;  %v1340_v11 = vadd.f32 %v2979_v62, %v1339_v8  ;;  %v2868_v62 = vld [vmem:[%s4080_s7 + $0x1d8] sm:$0xff]  ;;  %v2865_v7 = vld [vmem:[%s4080_s7 + $0x1c0] sm:$0xff] }
 0xe1e   :  { %1494 = vmatpush.msra.mxu0 %v1397_v6 }
 0xe1f   :  { %2828 = vmatpush.xpose.msk.msra.mxu3 %vm222_vm8, %v1370_v9 }
 0xe20   :  { %1605 = vmatpush.msrb.mxu0 %v2845_v37  ;;  %v2873_v37 = vld [vmem:[%s4080_s7 + $0x248] sm:$0xff] }
 0xe22   :  { %2829 = vmatmul.msk.f32.vlgmr.msra.gmra.mxu3 %vm222_vm8, %v1340_v11  ;;  %1606 = vmatpush.msrb.mxu0 %v2844_v38  ;;  %v2879_v38 = vld [vmem:[%s4080_s7 + $0x2c0] sm:$0xff] }
 0xe23   :  { %1575 = vmatpush.msrb.mxu3 %v2838_v10  ;;  %v1399_v21 = vpop.f32.mrf.mxu2 }
 0xe24   :  { %v1400_v22 = vadd.f32 %v2981_v4, %v1399_v21  ;;  %1607 = vmatpush.msrb.mxu0 %v2843_v39  ;;  %v2872_v39 = vld [vmem:[%s4080_s7 + $0x240] sm:$0xff] }
 0xe25   :  { %1576 = vmatpush.msrb.mxu3 %v2837_v16 }
 0xe26   :  { %1517 = vmatpush.msrb.mxu1 %v1400_v22  ;;  %1608 = vmatpush.msrb.mxu0 %v2842_v40 }
 0xe27   :  { %1577 = vmatpush.msrb.mxu3 %v2836_v17 }
 0xe28   :  { %1635 = vmatpush.msra.mxu1 %v2852_v41 }
 0xe29   :  { %1578 = vmatpush.msrb.mxu3 %v2835_v23 }
 0xe2a   :  { %2840 = vmatmul.msk.f32.vlgmr.msrb.gmra.mxu3 %vm59_vm0, %v3656_v59  ;;  %1636 = vmatpush.msra.mxu1 %v2851_v42 }
 0xe2c   :  { %1637 = vmatpush.msra.mxu1 %v2850_v43 }
 0xe2e   :  { %1638 = vmatpush.msra.mxu1 %v2849_v44 }
 0xe32   :  { %2841 = vmatmul.msk.f32.gmra.mxu3 %vm59_vm0, %v3665_v0 }
 0xe97   :  { %v1425_v25 = vpop.f32.mrf.mxu0 }
 0xe98   :  { %v1426_v26 = vadd.f32 %v1425_v25, %v3305_v24 }
 0xe9a   :  { %v1454_v27 = vsel %vm222_vm8, %v1426_v26, -inf }
 0xe9b   :  { %1455 = vmax.xlane.f32.xlu1 %v1454_v27 }
 0xea5   :  { %v1451_v18 = vpop.f32.mrf.mxu3 }
 0xea6   :  { %v1452_v15 = vadd.f32 %v1451_v18, %v3309_v29 }
 0xea8   :  { %v1457_v12 = vsel %vm222_vm8, %v1452_v15, -inf }
 0xea9   :  { %1458 = vmax.xlane.f32.xlu2 %v1457_v12 }
 0xead   :  { %v1580_v54 = vpop.f32.mrf.mxu3 }
 0xeae   :  { %v1581_v3 = vadd.f32 %v2982_v14, %v1580_v54 }
 0xeb5   :  { %v1583_v60 = vpop.f32.mrf.mxu3 }
 0xeb6   :  { %v1584_v1 = vadd.f32 %v2982_v14, %v1583_v60 }
 0xf0e   :  { %v1456_v28 = vpop.xlane.xlu1 %1455 }
 0xf0f   :  { %v1460_v30 = vsub.f32 %v1426_v26, %v1456_v28 }
 0xf11   :  { %v1462_v31 = vmul.f32 1.442695, %v1460_v30 }
 0xf13   :  { %3043 = vpow2.f32 %v1462_v31 }
 0xf19   :  { %v3044_v20 = vpop.eup %3043 }
 0xf1a   :  { %v1466_v19 = vsel %vm222_vm8, %v3044_v20, 0.0 }
 0xf1b   :  { %1467 = vadd.xlane.f32.xlu0 %v1466_v19 }
 0xf1c   :  { %v1459_v32 = vpop.xlane.xlu2 %1458 }
 0xf1d   :  { %v1461_v33 = vsub.f32 %v1452_v15, %v1459_v32  ;;  %v2882_v32 = vld [vmem:[%s4080_s7 + $0x2d8] sm:$0xff] }
 0xf1f   :  { %v1464_v34 = vmul.f32 1.442695, %v1461_v33  ;;  %v2875_v33 = vld [vmem:[%s4080_s7 + $0x258] sm:$0xff] }
 0xf21   :  { %3045 = vpow2.f32 %v1464_v34  ;;  %v2881_v34 = vld [vmem:[%s4080_s7 + $0x2d0] sm:$0xff] }
 0xf27   :  { %v3046_v35 = vpop.eup %3045 }
 0xf28   :  { %v1469_v36 = vsel %vm222_vm8, %v3046_v35, 0.0 }
 0xf29   :  { %1470 = vadd.xlane.f32.xlu1 %v1469_v36  ;;  %v2880_v36 = vld [vmem:[%s4080_s7 + $0x2c8] sm:$0xff] }
 0xf8e   :  { %v1468_v45 = vpop.xlane.xlu0 %1467 }
 0xf8f   :  { %3047 = vrcp.f32 %v1468_v45 }
 0xf95   :  { %v3048_v46 = vpop.eup %3047 }
 0xf96   :  { %v1474_v47 = vmul.f32 %v3048_v46, %v3044_v20  ;;  %v2862_v46 = vld [vmem:[%s4083_s9 + $0x28] sm:$0xff] }
 0xf98   :  { %2830 = vmatmul.msk.f32.vlgmr.msra.gmra.mxu0 %vm222_vm8, %v1474_v47 }
 0xf9c   :  { %v1471_v48 = vpop.xlane.xlu1 %1470 }
 0xf9d   :  { %3049 = vrcp.f32 %v1471_v48 }
 0xfa0   :  { %2847 = vmatmul.msk.f32.vlgmr.msrb.gmra.mxu0 %vm59_vm0, %v3656_v59 }
 0xfa3   :  { %v3050_v49 = vpop.eup %3049 }
 0xfa4   :  { %v1475_v50 = vmul.f32 %v3050_v49, %v3046_v35  ;;  %v2874_v35 = vld [vmem:[%s4080_s7 + $0x250] sm:$0xff]  ;;  %v2986_v49 = vld [vmem:[%s4079_s8 + $0x1a] ss:$0 sm:$0xff] }
 0xfa6   :  { %2831 = vmatmul.msk.f32.vlgmr.msrb.gmra.mxu1 %vm222_vm8, %v1475_v50  ;;  %v2987_v50 = vld [vmem:[%s4079_s8 + $0x16] ss:$0 sm:$0xff] }
 0xfa8   :  { %2848 = vmatmul.msk.f32.gmra.mxu0 %vm59_vm0, %v3665_v0 }
 0xfae   :  { %2854 = vmatmul.msk.f32.vlgmr.msra.gmra.mxu1 %vm59_vm0, %v3656_v59 }
 0xfb6   :  { %2855 = vmatmul.msk.f32.gmra.mxu1 %vm59_vm0, %v3665_v0 }
0x1015   :  { %v1496_v52 = vpop.f32.mrf.mxu0 }
0x1016   :  { %2833 = vmatmul.msk.f32.vlgmr.msra.gmra.mxu2 %vm222_vm8, %v1496_v52 }
0x101d   :  { %v1610_v55 = vpop.f32.mrf.mxu0 }
0x101e   :  { %v1611_v56 = vadd.f32 %v2983_v53, %v1610_v55 }
0x1020   :  { %2856 = vmatpush.xpose.msk.msrb.mxu2 %vm222_vm8, %v1611_v56  ;;  %v2985_v56 = vld [vmem:[%s4079_s8 + $0x12] ss:$0 sm:$0xff] }
0x1023   :  { %v1519_v57 = vpop.f32.mrf.mxu1 }
0x1024   :  { %2834 = vmatmul.msk.f32.gmra.mxu2 %vm222_vm8, %v1519_v57 }
0x1025   :  { %v1613_v58 = vpop.f32.mrf.mxu0  ;;  %1789 = vmatpush.msra.mxu2 %v2862_v46 }
0x1026   :  { %v1614_v61 = vadd.f32 %v2983_v53, %v1613_v58 }
0x1028   :  { %2858 = vmatpush.xpose.msk.msra.mxu3 %vm222_vm8, %v1614_v61 }
0x102b   :  { %v1640_v4 = vpop.f32.mrf.mxu1  ;;  %2859 = vmatmul.msk.f32.vlgmr.msra.gmra.mxu3 %vm222_vm8, %v1584_v1 }
0x102c   :  { %1818 = vmatpush.msrb.mxu3 %v2868_v62  ;;  %v1641_v6 = vadd.f32 %v2984_v63, %v1640_v4  ;;  %2857 = vmatmul.msk.f32.vlgmr.msrb.gmra.mxu2 %vm222_vm8, %v1581_v3  ;;  %v2896_v3 = vld [vmem:[%s4080_s7 + $0x1e8] sm:$0xff]  ;;  %v2895_v4 = vld [vmem:[%s4080_s7 + $0x1e0] sm:$0xff] }
0x102e   :  { %1819 = vmatpush.msrb.mxu3 %v2867_v2  ;;  %1738 = vmatpush.msra.mxu0 %v1641_v6  ;;  %v2897_v2 = vld [vmem:[%s4080_s7 + $0x1f0] sm:$0xff] }
0x1030   :  { %1820 = vmatpush.msrb.mxu3 %v2866_v5  ;;  %1848 = vmatpush.msrb.mxu0 %v2875_v33  ;;  %v3857_v5 = vld [vmem:[%s4084_s10 + $0x8] sm:$0x3f]  ;;  %v2905_v33 = vld [vmem:[%s4080_s7 + $0x278] sm:$0xff] }
0x1031   :  { %v1553_v6 = vperm.slane %v3857_v5, 0 }
0x1032   :  { %1821 = vmatpush.msrb.mxu3 %v2865_v7  ;;  %1849 = vmatpush.msrb.mxu0 %v2874_v35  ;;  %v2903_v35 = vld [vmem:[%s4080_s7 + $0x268] sm:$0xff] }
0x1033   :  { %v1643_v8 = vpop.f32.mrf.mxu1  ;;  %2870 = vmatmul.msk.f32.vlgmr.msrb.gmra.mxu3 %vm59_vm0, %v3656_v59 }
0x1034   :  { %v1644_v9 = vadd.f32 %v2984_v63, %v1643_v8  ;;  %1850 = vmatpush.msrb.mxu0 %v2873_v37  ;;  %v2898_v63 = vld [vmem:[%s4080_s7 + $0x1f8] sm:$0xff]  ;;  %v2902_v37 = vld [vmem:[%s4080_s7 + $0x260] sm:$0xff] }
0x1036   :  { %1761 = vmatpush.msrb.mxu1 %v1644_v9  ;;  %1851 = vmatpush.msrb.mxu0 %v2872_v39  ;;  %v2910_v39 = vld [vmem:[%s4080_s7 + $0x2e8] sm:$0xff] }
0x1038   :  { %1878 = vmatpush.msra.mxu1 %v2882_v32 }
0x103a   :  { %1879 = vmatpush.msra.mxu1 %v2881_v34  ;;  %v2904_v34 = vld [vmem:[%s4080_s7 + $0x270] sm:$0xff] }
0x103b   :  { %2871 = vmatmul.msk.f32.gmra.mxu3 %vm59_vm0, %v3665_v0 }
0x103c   :  { %1880 = vmatpush.msra.mxu1 %v2880_v36  ;;  %v2912_v36 = vld [vmem:[%s4080_s7 + $0x2f8] sm:$0xff] }
0x103e   :  { %1881 = vmatpush.msra.mxu1 %v2879_v38  ;;  %v2911_v38 = vld [vmem:[%s4080_s7 + $0x2f0] sm:$0xff] }
0x1099   :  { %v3776_v10 = vpop.f32.mrf.mxu2 }
0x109a   :  { %v1554_v7 = vadd.f32 %v1553_v6, %v3776_v10 }
0x10a7   :  { %v3778_v11 = vpop.f32.mrf.mxu2 }
0x10ae   :  { %v1695_v16 = vpop.f32.mrf.mxu3 }
0x10af   :  { %v1696_v17 = vadd.f32 %v1695_v16, %v3309_v29  ;;  %v1669_v21 = vpop.f32.mrf.mxu2  ;;  %v1555_v16 = vadd.f32 %v1553_v6, %v3778_v11 }
0x10b0   :  { %v1670_v22 = vadd.f32 %v1669_v21, %v3305_v24 }
0x10b1   :  { %v1701_v23 = vsel %vm222_vm8, %v1696_v17, -inf }
0x10b2   :  { %1702 = vmax.xlane.f32.xlu0 %v1701_v23  ;;  %v1698_v25 = vsel %vm222_vm8, %v1670_v22, -inf }
0x10b3   :  { %1699 = vmax.xlane.f32.xlu2 %v1698_v25 }
0x10b6   :  { %v1823_v51 = vpop.f32.mrf.mxu3 }
0x10b7   :  { %v1824_v57 = vadd.f32 %v2985_v56, %v1823_v51 }
0x10be   :  { %v1826_v61 = vpop.f32.mrf.mxu3 }
0x10bf   :  { %v1827_v1 = vadd.f32 %v2985_v56, %v1826_v61 }
0x1125   :  { %v1703_v26 = vpop.xlane.xlu0 %1702 }
0x1126   :  { %v1705_v27 = vsub.f32 %v1696_v17, %v1703_v26  ;;  %v1700_v18 = vpop.xlane.xlu2 %1699 }
0x1127   :  { %v1704_v15 = vsub.f32 %v1670_v22, %v1700_v18 }
0x1128   :  { %v1708_v12 = vmul.f32 1.442695, %v1705_v27 }
0x1129   :  { %v1706_v28 = vmul.f32 1.442695, %v1704_v15 }
0x112a   :  { %3051 = vpow2.f32 %v1708_v12 }
0x112b   :  { %3053 = vpow2.f32 %v1706_v28 }
0x1130   :  { %v3052_v30 = vpop.eup %3051 }
0x1131   :  { %v3054_v31 = vpop.eup %3053  ;;  %v1713_v20 = vsel %vm222_vm8, %v3052_v30, 0.0 }
0x1132   :  { %1714 = vadd.xlane.f32.xlu2 %v1713_v20  ;;  %v1710_v19 = vsel %vm222_vm8, %v3054_v31, 0.0 }
0x1133   :  { %1711 = vadd.xlane.f32.xlu1 %v1710_v19 }
0x11a5   :  { %v1715_v40 = vpop.xlane.xlu2 %1714 }
0x11a6   :  { %3055 = vrcp.f32 %v1715_v40  ;;  %v1712_v41 = vpop.xlane.xlu1 %1711  ;;  %v2909_v40 = vld [vmem:[%s4080_s7 + $0x2e0] sm:$0xff] }
0x11a7   :  { %3057 = vrcp.f32 %v1712_v41 }
0x11ac   :  { %v3056_v42 = vpop.eup %3055 }
0x11ad   :  { %v3058_v43 = vpop.eup %3057  ;;  %v1719_v44 = vmul.f32 %v3056_v42, %v3052_v30 }
0x11ae   :  { %v1718_v45 = vmul.f32 %v3058_v43, %v3054_v31 }
0x11af   :  { %2861 = vmatmul.msk.f32.vlgmr.msrb.gmra.mxu1 %vm222_vm8, %v1719_v44 }
0x11b0   :  { %2860 = vmatmul.msk.f32.vlgmr.msra.gmra.mxu0 %vm222_vm8, %v1718_v45 }
0x11b7   :  { %2884 = vmatmul.msk.f32.vlgmr.msra.gmra.mxu1 %vm59_vm0, %v3656_v59 }
0x11b8   :  { %2877 = vmatmul.msk.f32.vlgmr.msrb.gmra.mxu0 %vm59_vm0, %v3656_v59 }
0x11bf   :  { %2885 = vmatmul.msk.f32.gmra.mxu1 %vm59_vm0, %v3665_v0 }
0x11c0   :  { %2878 = vmatmul.msk.f32.gmra.mxu0 %vm59_vm0, %v3665_v0 }
0x122c   :  { %v1763_v47 = vpop.f32.mrf.mxu1 }
0x122d   :  { %v1740_v48 = vpop.f32.mrf.mxu0 }
0x122e   :  { %2863 = vmatmul.msk.f32.vlgmr.msra.gmra.mxu2 %vm222_vm8, %v1740_v48 }
0x1234   :  { %v1883_v52 = vpop.f32.mrf.mxu1 }
0x1235   :  { %v1884_v53 = vadd.f32 %v2986_v49, %v1883_v52  ;;  %v1853_v54 = vpop.f32.mrf.mxu0 }
0x1236   :  { %v1854_v55 = vadd.f32 %v2987_v50, %v1853_v54  ;;  %2864 = vmatmul.msk.f32.gmra.mxu2 %vm222_vm8, %v1763_v47  ;;  %v2892_v47 = vld [vmem:[%s4083_s9 + $0x30] sm:$0xff]  ;;  %v2990_v54 = vld [vmem:[%s4079_s8 + $0x1b] ss:$0 sm:$0xff] }
0x1237   :  { %1981 = vmatpush.msra.mxu0 %v1884_v53 }
0x1238   :  { %2886 = vmatpush.xpose.msk.msrb.mxu2 %vm222_vm8, %v1854_v55  ;;  %v2988_v55 = vld [vmem:[%s4079_s8 + $0x13] ss:$0 sm:$0xff] }
0x1239   :  { %2091 = vmatpush.msrb.mxu0 %v2905_v33 }
0x123b   :  { %2092 = vmatpush.msrb.mxu0 %v2904_v34 }
0x123c   :  { %v1886_v58 = vpop.f32.mrf.mxu1  ;;  %2032 = vmatpush.msra.mxu2 %v2892_v47 }
0x123d   :  { %v1887_v14 = vadd.f32 %v2986_v49, %v1886_v58  ;;  %v1856_v60 = vpop.f32.mrf.mxu0  ;;  %2093 = vmatpush.msrb.mxu0 %v2903_v35 }
0x123e   :  { %v1857_v62 = vadd.f32 %v2987_v50, %v1856_v60  ;;  %2887 = vmatmul.msk.f32.vlgmr.msrb.gmra.mxu2 %vm222_vm8, %v1824_v57  ;;  %v2989_v50 = vld [vmem:[%s4079_s8 + $0x17] ss:$0 sm:$0xff] }
0x123f   :  { %2004 = vmatpush.msrb.mxu1 %v1887_v14  ;;  %2094 = vmatpush.msrb.mxu0 %v2902_v37 }
0x1240   :  { %2888 = vmatpush.xpose.msk.msra.mxu3 %vm222_vm8, %v1857_v62 }
0x1241   :  { %2121 = vmatpush.msra.mxu1 %v2912_v36 }
0x1243   :  { %2889 = vmatmul.msk.f32.vlgmr.msra.gmra.mxu3 %vm222_vm8, %v1827_v1  ;;  %2122 = vmatpush.msra.mxu1 %v2911_v38 }
0x1244   :  { %2061 = vmatpush.msrb.mxu3 %v2898_v63 }
0x1245   :  { %2123 = vmatpush.msra.mxu1 %v2910_v39 }
0x1246   :  { %2062 = vmatpush.msrb.mxu3 %v2897_v2 }
0x1247   :  { %2124 = vmatpush.msra.mxu1 %v2909_v40 }
0x1248   :  { %2063 = vmatpush.msrb.mxu3 %v2896_v3 }
0x124a   :  { %2064 = vmatpush.msrb.mxu3 %v2895_v4 }
0x124b   :  { %2900 = vmatmul.msk.f32.vlgmr.msrb.gmra.mxu3 %vm59_vm0, %v3656_v59 }
0x1253   :  { %2901 = vmatmul.msk.f32.gmra.mxu3 %vm59_vm0, %v3665_v0 }
0x12b1   :  { %v1791_v8 = vpop.f32.mrf.mxu2 }
0x12b2   :  { %v3861_v9 = vadd.f32 %v1791_v8, %v1554_v7 }
0x12b9   :  { %v1794_v17 = vpop.f32.mrf.mxu2 }
0x12ba   :  { %v3864_v21 = vadd.f32 %v1794_v17, %v1555_v16 }
0x12c1   :  { %v1912_v22 = vpop.f32.mrf.mxu2 }
0x12c2   :  { %v1913_v23 = vadd.f32 %v1912_v22, %v3305_v24 }
0x12c4   :  { %v1941_v25 = vsel %vm222_vm8, %v1913_v23, -inf }
0x12c5   :  { %1942 = vmax.xlane.f32.xlu0 %v1941_v25 }
0x12c6   :  { %v1938_v26 = vpop.f32.mrf.mxu3 }
0x12c7   :  { %v1939_v27 = vadd.f32 %v1938_v26, %v3309_v29 }
0x12c9   :  { %v1944_v18 = vsel %vm222_vm8, %v1939_v27, -inf }
0x12ca   :  { %1945 = vmax.xlane.f32.xlu1 %v1944_v18 }
0x12ce   :  { %v2066_v51 = vpop.f32.mrf.mxu3 }
0x12cf   :  { %v2067_v58 = vadd.f32 %v2988_v55, %v2066_v51  ;;  %v2927_v51 = vld [vmem:[%s4086_s11 + $0x30] sm:$0xff] }
0x12d6   :  { %v2069_v60 = vpop.f32.mrf.mxu3 }
0x12d7   :  { %v2070_v62 = vadd.f32 %v2988_v55, %v2069_v60 }
0x1338   :  { %v1943_v10 = vpop.xlane.xlu0 %1942 }
0x1339   :  { %v1947_v15 = vsub.f32 %v1913_v23, %v1943_v10 }
0x133b   :  { %v1949_v12 = vmul.f32 1.442695, %v1947_v15 }
0x133d   :  { %3059 = vpow2.f32 %v1949_v12  ;;  %v1946_v11 = vpop.xlane.xlu1 %1945 }
0x133e   :  { %v1948_v28 = vsub.f32 %v1939_v27, %v1946_v11 }
0x1340   :  { %v1951_v30 = vmul.f32 1.442695, %v1948_v28 }
0x1342   :  { %3061 = vpow2.f32 %v1951_v30 }
0x1343   :  { %v3060_v31 = vpop.eup %3059 }
0x1344   :  { %v1953_v20 = vsel %vm222_vm8, %v3060_v31, 0.0 }
0x1345   :  { %1954 = vadd.xlane.f32.xlu2 %v1953_v20 }
0x1348   :  { %v3062_v19 = vpop.eup %3061 }
0x1349   :  { %v1956_v32 = vsel %vm222_vm8, %v3062_v19, 0.0 }
0x134a   :  { %1957 = vadd.xlane.f32.xlu0 %v1956_v32 }
0x13b8   :  { %v1955_v41 = vpop.xlane.xlu2 %1954 }
0x13b9   :  { %3063 = vrcp.f32 %v1955_v41 }
0x13bd   :  { %v1958_v42 = vpop.xlane.xlu0 %1957 }
0x13be   :  { %3065 = vrcp.f32 %v1958_v42 }
0x13bf   :  { %v3064_v43 = vpop.eup %3063 }
0x13c0   :  { %v1961_v44 = vmul.f32 %v3064_v43, %v3060_v31 }
0x13c2   :  { %2890 = vmatmul.msk.f32.vlgmr.msra.gmra.mxu0 %vm222_vm8, %v1961_v44 }
0x13c4   :  { %v3066_v45 = vpop.eup %3065 }
0x13c5   :  { %v1962_v46 = vmul.f32 %v3066_v45, %v3062_v19  ;;  %v2922_v19 = vld [vmem:[%s4083_s9 + $0x38] sm:$0xff] }
0x13c7   :  { %2891 = vmatmul.msk.f32.vlgmr.msrb.gmra.mxu1 %vm222_vm8, %v1962_v46 }
0x13ca   :  { %2907 = vmatmul.msk.f32.vlgmr.msrb.gmra.mxu0 %vm59_vm0, %v3656_v59 }
0x13cf   :  { %2914 = vmatmul.msk.f32.vlgmr.msra.gmra.mxu1 %vm59_vm0, %v3656_v59 }
0x13d2   :  { %2908 = vmatmul.msk.f32.gmra.mxu0 %vm59_vm0, %v3665_v0 }
0x13d7   :  { %2915 = vmatmul.msk.f32.gmra.mxu1 %vm59_vm0, %v3665_v0 }
0x143f   :  { %v1983_v48 = vpop.f32.mrf.mxu0 }
0x1440   :  { %2893 = vmatmul.msk.f32.vlgmr.msra.gmra.mxu2 %vm222_vm8, %v1983_v48 }
0x1444   :  { %v2006_v49 = vpop.f32.mrf.mxu1 }
0x1447   :  { %v2096_v52 = vpop.f32.mrf.mxu0 }
0x1448   :  { %v2097_v53 = vadd.f32 %v2989_v50, %v2096_v52  ;;  %2894 = vmatmul.msk.f32.gmra.mxu2 %vm222_vm8, %v2006_v49  ;;  %v2926_v52 = vld [vmem:[%s4086_s11 + $0x28] sm:$0xff] }
0x144a   :  { %2916 = vmatpush.xpose.msk.msrb.mxu2 %vm222_vm8, %v2097_v53  ;;  %v2925_v53 = vld [vmem:[%s4086_s11 + $0x20] sm:$0xff] }
0x144c   :  { %v2126_v56 = vpop.f32.mrf.mxu1 }
0x144d   :  { %v2127_v57 = vadd.f32 %v2990_v54, %v2126_v56 }
0x144e   :  { %2275 = vmatpush.msra.mxu2 %v2922_v19 }
0x144f   :  { %v2099_v14 = vpop.f32.mrf.mxu0  ;;  %2224 = vmatpush.msra.mxu0 %v2127_v57 }
0x1450   :  { %v2100_v61 = vadd.f32 %v2989_v50, %v2099_v14  ;;  %2917 = vmatmul.msk.f32.vlgmr.msrb.gmra.mxu2 %vm222_vm8, %v2067_v58 }
0x1452   :  { %2918 = vmatpush.xpose.msk.msra.mxu3 %vm222_vm8, %v2100_v61 }
0x1454   :  { %v2129_v63 = vpop.f32.mrf.mxu1 }
0x1455   :  { %v2130_v1 = vadd.f32 %v2990_v54, %v2129_v63  ;;  %2919 = vmatmul.msk.f32.vlgmr.msra.gmra.mxu3 %vm222_vm8, %v2070_v62 }
0x1457   :  { %2247 = vmatpush.msrb.mxu1 %v2130_v1 }
0x14c3   :  { %v2034_v2 = vpop.f32.mrf.mxu2 }
0x14c4   :  { %v2040_v3 = vadd.f32 %v2034_v2, %v3861_v9 }
0x14cb   :  { %v2037_v4 = vpop.f32.mrf.mxu2 }
0x14cc   :  { %v2041_v6 = vadd.f32 %v2037_v4, %v3864_v21 }
0x14d3   :  { %v2155_v7 = vpop.f32.mrf.mxu2 }
0x14d4   :  { %v2156_v8 = vadd.f32 %v2155_v7, %v3305_v24 }
0x14d6   :  { %v2184_v16 = vsel %vm222_vm8, %v2156_v8, -inf }
0x14d7   :  { %2185 = vmax.xlane.f32.xlu1 %v2184_v16  ;;  %v2334_v16 = vperm.slane %v3857_v5, 2 }
0x14d8   :  { %v2181_v17 = vpop.f32.mrf.mxu3 }
0x14d9   :  { %v2182_v22 = vadd.f32 %v2181_v17, %v3309_v29 }
0x14db   :  { %v2187_v23 = vsel %vm222_vm8, %v2182_v22, -inf }
0x14dc   :  { %2188 = vmax.xlane.f32.xlu2 %v2187_v23 }
0x154a   :  { %v2186_v25 = vpop.xlane.xlu1 %2185 }
0x154b   :  { %v2190_v26 = vsub.f32 %v2156_v8, %v2186_v25 }
0x154d   :  { %v2192_v27 = vmul.f32 1.442695, %v2190_v26 }
0x154f   :  { %3067 = vpow2.f32 %v2192_v27  ;;  %v2189_v9 = vpop.xlane.xlu2 %2188 }
0x1550   :  { %v2191_v18 = vsub.f32 %v2182_v22, %v2189_v9 }
0x1552   :  { %v2194_v10 = vmul.f32 1.442695, %v2191_v18 }
0x1554   :  { %3069 = vpow2.f32 %v2194_v10 }
0x1555   :  { %v3068_v21 = vpop.eup %3067 }
0x1556   :  { %v2196_v24 = vsel %vm222_vm8, %v3068_v21, 0.0 }
0x1557   :  { %2197 = vadd.xlane.f32.xlu0 %v2196_v24  ;;  %v2939_v24 = vld [vmem:[%s4087_s13 + $0x78] sm:$0xff] }
0x1558   :  { %2418 = vmatpush.msrb.mxu0 %v2939_v24 }
0x155a   :  { %v3070_v15 = vpop.eup %3069 }
0x155b   :  { %v2199_v12 = vsel %vm222_vm8, %v3070_v15, 0.0 }
0x155c   :  { %2200 = vadd.xlane.f32.xlu1 %v2199_v12  ;;  %v2937_v12 = vld [vmem:[%s4087_s13 + $0x68] sm:$0xff] }
0x15ca   :  { %v2198_v29 = vpop.xlane.xlu0 %2197 }
0x15cb   :  { %3071 = vrcp.f32 %v2198_v29  ;;  %v2936_v29 = vld [vmem:[%s4087_s13 + $0x60] sm:$0xff] }
0x15cf   :  { %v2201_v11 = vpop.xlane.xlu1 %2200 }
0x15d0   :  { %3073 = vrcp.f32 %v2201_v11  ;;  %v2935_v11 = vld [vmem:[%s4087_s13 + $0x58] sm:$0xff] }
0x15d1   :  { %v3072_v28 = vpop.eup %3071 }
0x15d2   :  { %v2204_v30 = vmul.f32 %v3072_v28, %v3068_v21  ;;  %v2934_v28 = vld [vmem:[%s4087_s13 + $0x50] sm:$0xff] }
0x15d4   :  { %2920 = vmatmul.msk.f32.vlgmr.msra.gmra.mxu0 %vm222_vm8, %v2204_v30  ;;  %v2933_v30 = vld [vmem:[%s4087_s13 + $0x48] sm:$0xff] }
0x15d6   :  { %v3074_v31 = vpop.eup %3073 }
0x15d7   :  { %v2205_v20 = vmul.f32 %v3074_v31, %v3070_v15  ;;  %v2938_v15 = vld [vmem:[%s4087_s13 + $0x70] sm:$0xff]  ;;  %v2932_v31 = vld [vmem:[%s4087_s13 + $0x40] sm:$0xff] }
0x15d8   :  { %2419 = vmatpush.msrb.mxu0 %v2938_v15 }
0x15d9   :  { %2921 = vmatmul.msk.f32.vlgmr.msrb.gmra.mxu1 %vm222_vm8, %v2205_v20  ;;  %v2991_v20 = vld [vmem:[%s4085_s12 + $0x1] ss:$0 sm:$0xff] }
0x15da   :  { %2420 = vmatpush.msrb.mxu0 %v2937_v12 }
0x15dc   :  { %2421 = vmatpush.msrb.mxu0 %v2936_v29 }
0x15de   :  { %2422 = vmatpush.msrb.mxu0 %v2935_v11 }
0x15e0   :  { %2423 = vmatpush.msrb.mxu0 %v2934_v28 }
0x15e2   :  { %2424 = vmatpush.msrb.mxu0 %v2933_v30 }
0x15e4   :  { %2425 = vmatpush.msrb.mxu0 %v2932_v31 }
0x1651   :  { %v2226_v32 = vpop.f32.mrf.mxu0 }
0x1652   :  { %2923 = vmatmul.msk.f32.vlgmr.msra.gmra.mxu2 %vm222_vm8, %v2226_v32 }
0x1656   :  { %v2249_v33 = vpop.f32.mrf.mxu1 }
0x165a   :  { %2924 = vmatmul.msk.f32.gmra.mxu2 %vm222_vm8, %v2249_v33 }
0x16d5   :  { %v2277_v34 = vpop.f32.mrf.mxu2 }
0x16d6   :  { %v2283_v35 = vadd.f32 %v2277_v34, %v2040_v3 }
0x16d8   :  { %v2285_v36 = vadd.f32 %v2283_v35, %v3656_v59 }
0x16da   :  { %v2287_v37 = vsel %vm59_vm0, %v2285_v36, 0.0 }
0x16db   :  { %2288 = vadd.xlane.f32.xlu2 %v2287_v37 }
0x16dd   :  { %v2280_v38 = vpop.f32.mrf.mxu2 }
0x16de   :  { %v2284_v39 = vadd.f32 %v2280_v38, %v2041_v6  ;;  %v2331_v6 = vperm.slane %v3857_v5, 1 }
0x16e0   :  { %v2286_v40 = vadd.f32 %v2284_v39, %v3665_v0  ;;  %v2928_v0 = vld [vmem:[%s4086_s11 + $0x38] sm:$0xff] }
0x16e1   :  { %2365 = vmatpush.msrb.mxu3 %v2928_v0 }
0x16e2   :  { %v2290_v41 = vsel %vm59_vm0, %v2286_v40, 0.0 }
0x16e3   :  { %2291 = vadd.xlane.f32.xlu0 %v2290_v41  ;;  %2366 = vmatpush.msrb.mxu3 %v2927_v51  ;;  %v2487_v51 = vlaneseq }
0x16e5   :  { %2367 = vmatpush.msrb.mxu3 %v2926_v52  ;;  %v2488_v52 = vshrl.u32 %v2487_v51, 7 }
0x16e7   :  { %2368 = vmatpush.msrb.mxu3 %v2925_v53  ;;  %2962 = vset.pattern.permute.xlu2 %v2488_v52  ;;  %v2520_v53 = vld [vmem:[%s4088_s3] sm:$0x3] }
0x16e8   :  { %2963 = vset.pattern.permute.xlu0 %v2488_v52  ;;  %2961 = vset.pattern.permute.xlu1 %v2488_v52 }
0x174e   :  { %v2289_v42 = vpop.xlane.xlu2 %2288 }
0x174f   :  { %v2293_v43 = vmul.f32 %v2289_v42, %v3200_v13 }
0x1751   :  { %v2295_v44 = vsub.f32 %v2285_v36, %v2293_v43 }
0x1753   :  { %v2297_v45 = vmul.f32 %v2295_v44, %v2295_v44 }
0x1755   :  { %v2299_v46 = vsel %vm59_vm0, %v2297_v45, 0.0 }
0x1756   :  { %2300 = vadd.xlane.f32.xlu1 %v2299_v46  ;;  %v2292_v47 = vpop.xlane.xlu0 %2291 }
0x1757   :  { %v2294_v59 = vmul.f32 %v2292_v47, %v3200_v13 }
0x1759   :  { %v2296_v48 = vsub.f32 %v2286_v40, %v2294_v59 }
0x175b   :  { %v2298_v49 = vmul.f32 %v2296_v48, %v2296_v48 }
0x175d   :  { %v2302_v50 = vsel %vm59_vm0, %v2298_v49, 0.0 }
0x175e   :  { %2303 = vadd.xlane.f32.xlu2 %v2302_v50 }
0x17c9   :  { %v2301_v54 = vpop.xlane.xlu1 %2300 }
0x17ca   :  { %v2305_v55 = vmul.f32 %v2301_v54, %v3200_v13  ;;  %v2528_v54 = vperm.slane %v2520_v53, 1 }
0x17cc   :  { %v2307_v56 = vadd.f32 1e-12, %v2305_v55  ;;  %2533 = vperm.xlu2 %2962, %v2528_v54   ;;  %v2403_v55 = vperm.slane %v3857_v5, 3  ;;  %v2562_v54 = vld [vmem:[%s4090_s14 + $0x18] sm:$0xff] }
0x17ce   :  { %3075 = vrsqrt.f32 %v2307_v56  ;;  %vm2315_vm8 = vweird.f32 %v2307_v56 }
0x17d1   :  { %v2304_v57 = vpop.xlane.xlu2 %2303 }
0x17d2   :  { %v2306_v58 = vmul.f32 %v2304_v57, %v3200_v13 }
0x17d4   :  { %v3076_v14 = vpop.eup %3075  ;;  %v2308_v60 = vadd.f32 1e-12, %v2306_v58 }
0x17d5   :  { %v2310_v61 = vmul.f32 %v3076_v14, %v2307_v56  ;;  %vm2316_vm7 = vweird.f32 %v3076_v14 }
0x17d6   :  { %3077 = vrsqrt.f32 %v2308_v60  ;;  %vm2317_vm9 = vmor %vm2315_vm8, %vm2316_vm7  ;;  %vm2325_vm11 = vweird.f32 %v2308_v60  ;;  %vm2651_vm7 = vcmask 1024  }
0x17d7   :  { %v2311_v62 = vmul.f32 %v3076_v14, %v2310_v61 }
0x17d9   :  { %v2312_v63 = vmul.f32 0.5, %v2311_v62 }
0x17db   :  { %v2313_v1 = vsub.f32 1.5, %v2312_v63 }
0x17dc   :  { %v3078_v2 = vpop.eup %3077 }
0x17dd   :  { %v2314_v3 = vmul.f32 %v3076_v14, %v2313_v1  ;;  %v2320_v4 = vmul.f32 %v3078_v2, %v2308_v60  ;;  %vm2326_vm10 = vweird.f32 %v3078_v2 }
0x17de   :  { %vm2327_vm12 = vmor %vm2325_vm11, %vm2326_vm10  ;;  %vm2689_vm10 = vcmask 50224   ;;  %vm2691_vm11 = vcmask 58424  }
0x17df   :  { %v2318_v7 = vsel %vm2317_vm9, %v3076_v14, %v2314_v3  ;;  %v2321_v8 = vmul.f32 %v3078_v2, %v2320_v4  ;;  %vm2687_vm9 = vcmask 42024  }
0x17e0   :  { %v2329_v17 = vmul.f32 %v2318_v7, %v2295_v44 }
0x17e1   :  { %v2322_v22 = vmul.f32 0.5, %v2321_v8 }
0x17e2   :  { %v2332_v23 = vmul.f32 %v2331_v6, %v2329_v17 }
0x17e3   :  { %v2323_v25 = vsub.f32 1.5, %v2322_v22 }
0x17e4   :  { %v3963_v26 = vadd.f32 %v2334_v16, %v2332_v23 }
0x17e5   :  { %v2324_v27 = vmul.f32 %v3078_v2, %v2323_v25  ;;  %v2485_v25 = vld [vmem:[%s4089_s2] sm:$0x3] }
0x17e6   :  { %2930 = vmatmul.msk.f32.vlgmr.msrb.gmra.mxu3 %vm59_vm0, %v3963_v26 }
0x17e7   :  { %v2328_v9 = vsel %vm2327_vm12, %v3078_v2, %v2324_v27  ;;  %v2521_v2 = vperm.slane %v2520_v53, 0  ;;  %v2486_v27 = vperm.slane %v2485_v25, 0 }
0x17e8   :  { %v2330_v18 = vmul.f32 %v2328_v9, %v2296_v48 }
0x17ea   :  { %v2333_v10 = vmul.f32 %v2331_v6, %v2330_v18 }
0x17ec   :  { %v2336_v21 = vadd.f32 %v2334_v16, %v2333_v10 }
0x17ee   :  { %2931 = vmatmul.msk.f32.gmra.mxu3 %vm59_vm0, %v2336_v21 }
0x1826   :  { %v4012_v9 = vpop.permute.xlu2 %2533 }
0x1869   :  { %v2370_v19 = vpop.f32.mrf.mxu3 }
0x186a   :  { %v2371_v32 = vadd.f32 %v2991_v20, %v2370_v19 }
0x186c   :  { %v2376_v33 = vmul.f32 %v2371_v32, %v2371_v32 }
0x186e   :  { %v2378_v34 = vmul.f32 %v2376_v33, %v2371_v32  ;;  %v2479_v33 = vperm.slane %v3857_v5, 4 }
0x1870   :  { %v2380_v35 = vmul.f32 0.044715, %v2378_v34 }
0x1871   :  { %v2373_v36 = vpop.f32.mrf.mxu3 }
0x1872   :  { %v2382_v37 = vadd.f32 %v2380_v35, %v2371_v32  ;;  %v2374_v38 = vadd.f32 %v2991_v20, %v2373_v36  ;;  %v2482_v36 = vperm.slane %v3857_v5, 5  ;;  %v2947_v5 = vld [vmem:[%s4090_s14 + $0x28] sm:$0xff] }
0x1874   :  { %v2384_v39 = vmul.f32 0.7978846, %v2382_v37  ;;  %v2377_v40 = vmul.f32 %v2374_v38, %v2374_v38 }
0x1876   :  { %3079 = vtanh.f32 %v2384_v39  ;;  %v2379_v41 = vmul.f32 %v2377_v40, %v2374_v38  ;;  %v2949_v39 = vld [vmem:[%s4090_s14 + $0x38] sm:$0xff]  ;;  %v2948_v40 = vld [vmem:[%s4090_s14 + $0x30] sm:$0xff] }
0x1877   :  { %2586 = vmatpush.msra.mxu1 %v2949_v39 }
0x1878   :  { %v2381_v42 = vmul.f32 0.044715, %v2379_v41 }
0x1879   :  { %2587 = vmatpush.msra.mxu1 %v2948_v40 }
0x187a   :  { %v2383_v43 = vadd.f32 %v2381_v42, %v2374_v38 }
0x187b   :  { %2588 = vmatpush.msra.mxu1 %v2947_v5 }
0x187c   :  { %v3080_v44 = vpop.eup %3079  ;;  %v2385_v45 = vmul.f32 0.7978846, %v2383_v43 }
0x187d   :  { %v2388_v46 = vadd.f32 1.0, %v3080_v44 }
0x187e   :  { %3081 = vtanh.f32 %v2385_v45 }
0x187f   :  { %v2390_v47 = vmul.f32 0.5, %v2388_v46 }
0x1881   :  { %v2392_v59 = vmul.f32 %v2390_v47, %v2371_v32 }
0x1883   :  { %2940 = vmatmul.msk.f32.vlgmr.msrb.gmra.mxu0 %vm1221_vm15, %v2392_v59  ;;  %v2946_v59 = vld [vmem:[%s4090_s14 + $0x20] sm:$0xff] }
0x1884   :  { %v3082_v48 = vpop.eup %3081  ;;  %2589 = vmatpush.msra.mxu1 %v2946_v59 }
0x1885   :  { %v2389_v49 = vadd.f32 1.0, %v3082_v48 }
0x1886   :  { %2611 = vmatpush.msrb.mxu1 %v2562_v54  ;;  %v3103_v54 = vmov 0.0  }
0x1887   :  { %v2391_v50 = vmul.f32 0.5, %v2389_v49  ;;  %2685 = vst [vmem:[%s4093_s16] sm:$0x3] %v3103_v54 }
0x1889   :  { %v2393_v0 = vmul.f32 %v2391_v50, %v2374_v38 }
0x188b   :  { %2941 = vmatmul.msk.f32.gmra.mxu0 %vm1221_vm15, %v2393_v0 }
0x1900   :  { %v2427_v56 = vpop.f32.mrf.mxu0 }
0x1901   :  { %v2428_v57 = vadd.f32 %v2427_v56, %v2403_v55 }
0x1903   :  { %v2433_v58 = vadd.f32 %v2428_v57, %v3963_v26  ;;  %v2493_v26 = vperm.slane %v2485_v25, 1 }
0x1905   :  { %v2435_v14 = vsel %vm59_vm0, %v2433_v58, 0.0 }
0x1906   :  { %2436 = vadd.xlane.f32.xlu0 %v2435_v14  ;;  %v2560_v14 = vld [vmem:[%s4090_s14 + $0x8] sm:$0xff] }
0x1908   :  { %v2430_v60 = vpop.f32.mrf.mxu0 }
0x1909   :  { %v2431_v61 = vadd.f32 %v2430_v60, %v2403_v55  ;;  %v2561_v55 = vld [vmem:[%s4090_s14 + $0x10] sm:$0xff] }
0x190a   :  { %2612 = vmatpush.msrb.mxu1 %v2561_v55 }
0x190b   :  { %v2434_v62 = vadd.f32 %v2431_v61, %v2336_v21 }
0x190c   :  { %2613 = vmatpush.msrb.mxu1 %v2560_v14 }
0x190d   :  { %v2438_v63 = vsel %vm59_vm0, %v2434_v62, 0.0 }
0x190e   :  { %2439 = vadd.xlane.f32.xlu1 %v2438_v63 }
0x1927   :  { %2526 = vperm.xlu1 %2961, %v2521_v2   ;;  %v2559_v2 = vld [vmem:[%s4090_s14] sm:$0xff] }
0x1928   :  { %2614 = vmatpush.msrb.mxu1 %v2559_v2 }
0x1979   :  { %v2437_v1 = vpop.xlane.xlu0 %2436 }
0x197a   :  { %v2441_v3 = vmul.f32 %v2437_v1, %v3200_v13 }
0x197c   :  { %v2443_v4 = vsub.f32 %v2433_v58, %v2441_v3 }
0x197e   :  { %v2445_v6 = vmul.f32 %v2443_v4, %v2443_v4 }
0x1980   :  { %v2447_v7 = vsel %vm59_vm0, %v2445_v6, 0.0 }
0x1981   :  { %v2440_v8 = vpop.xlane.xlu1 %2439  ;;  %2448 = vadd.xlane.f32.xlu2 %v2447_v7 }
0x1982   :  { %v2442_v16 = vmul.f32 %v2440_v8, %v3200_v13 }
0x1984   :  { %v2444_v17 = vsub.f32 %v2434_v62, %v2442_v16 }
0x1986   :  { %v2446_v22 = vmul.f32 %v2444_v17, %v2444_v17 }
0x1988   :  { %v2450_v23 = vsel %vm59_vm0, %v2446_v22, 0.0  ;;  %v2638_v22 = vld [vmem:[%s4091_s4] sm:$0x3] }
0x1989   :  { %2451 = vadd.xlane.f32.xlu0 %v2450_v23 }
0x1999   :  { %2498 = vperm.xlu2 %2962, %v2493_v26   ;;  %v2527_v42 = vpop.permute.xlu1 %2526  ;;  %v3102_v26 = vmov 0  }
0x199d   :  { %2491 = vperm.xlu0 %2963, %v2486_v27  }
0x19a1   :  { %2964 = vset.pattern.permute.xlu2 %v3102_v26 }
0x19a2   :  { %2640 = vperm.xlu2 %2964, %v2638_v22  }
0x19a5   :  { %2965 = vset.pattern.permute.xlu0 %v3102_v26 }
0x19f4   :  { %v2449_v18 = vpop.xlane.xlu2 %2448 }
0x19f5   :  { %v2453_v10 = vmul.f32 %v2449_v18, %v3200_v13 }
0x19f7   :  { %v2455_v21 = vadd.f32 1e-12, %v2453_v10 }
0x19f9   :  { %3083 = vrsqrt.f32 %v2455_v21  ;;  %vm2463_vm14 = vweird.f32 %v2455_v21 }
0x19fc   :  { %v2452_v24 = vpop.xlane.xlu0 %2451  ;;  %v2499_v60 = vpop.permute.xlu2 %2498 }
0x19fd   :  { %v2454_v15 = vmul.f32 %v2452_v24, %v3200_v13 }
0x19ff   :  { %v3084_v12 = vpop.eup %3083  ;;  %v2456_v29 = vadd.f32 1e-12, %v2454_v15 }
0x1a00   :  { %v2458_v11 = vmul.f32 %v3084_v12, %v2455_v21  ;;  %vm2464_vm13 = vweird.f32 %v3084_v12 }
0x1a01   :  { %3085 = vrsqrt.f32 %v2456_v29  ;;  %vm2465_vm15 = vmor %vm2463_vm14, %vm2464_vm13  ;;  %vm2473_vm2 = vweird.f32 %v2456_v29 }
0x1a02   :  { %v2459_v28 = vmul.f32 %v3084_v12, %v2458_v11 }
0x1a04   :  { %v2460_v30 = vmul.f32 0.5, %v2459_v28  ;;  %v2641_v5 = vpop.permute.xlu2 %2640 }
0x1a06   :  { %v2461_v31 = vsub.f32 1.5, %v2460_v30 }
0x1a07   :  { %v3086_v20 = vpop.eup %3085 }
0x1a08   :  { %v2462_v19 = vmul.f32 %v3084_v12, %v2461_v31  ;;  %v2468_v32 = vmul.f32 %v3086_v20, %v2456_v29  ;;  %vm2474_vm1 = vweird.f32 %v3086_v20 }
0x1a09   :  { %vm2475_vm3 = vmor %vm2473_vm2, %vm2474_vm1 }
0x1a0a   :  { %v2469_v34 = vmul.f32 %v3086_v20, %v2468_v32  ;;  %v2466_v35 = vsel %vm2465_vm15, %v3084_v12, %v2462_v19 }
0x1a0b   :  { %v2477_v13 = vmul.f32 %v2466_v35, %v2443_v4 }
0x1a0c   :  { %v2470_v37 = vmul.f32 0.5, %v2469_v34 }
0x1a0d   :  { %v2480_v38 = vmul.f32 %v2479_v33, %v2477_v13 }
0x1a0e   :  { %v2471_v41 = vsub.f32 1.5, %v2470_v37 }
0x1a0f   :  { %v2483_v43 = vadd.f32 %v2482_v36, %v2480_v38  ;;  %v2492_v44 = vpop.permute.xlu0 %2491 }
0x1a10   :  { %v2472_v45 = vmul.f32 %v3086_v20, %v2471_v41 }
0x1a11   :  { %v2535_v46 = vmul.f32 %v2527_v42, %v2483_v43  ;;  %v2500_v47 = vmul.f32 %v2492_v44, %v2483_v43  ;;  %v2637_v43 = vand.u32 127, %v2487_v51  ;;  %v2992_v44 = vld [vmem:[%s4092_s15] ss:$0 sm:$0xff] }
0x1a12   :  { %v2476_v48 = vsel %vm2475_vm3, %v3086_v20, %v2472_v45 }
0x1a13   :  { %v2478_v49 = vmul.f32 %v2476_v48, %v2444_v17  ;;  %v2537_v50 = vadd.f32 1.0, %v2535_v46  ;;  %v2502_v0 = vadd.f32 1.0, %v2500_v47  ;;  %vm2642_vm5 = vcmp.eq.s32.totalorder %v2637_v43, %v2641_v5 }
0x1a15   :  { %v2481_v52 = vmul.f32 %v2479_v33, %v2478_v49  ;;  %v2539_v53 = vsel %vm59_vm0, %v2537_v50, -inf  ;;  %v2504_v57 = vsel %vm59_vm0, %v2502_v0, -inf }
0x1a16   :  { %v2540_v56 = vrot.slane %v2539_v53, 4  ;;  %v2505_v1 = vrot.slane %v2504_v57, 4 }
0x1a17   :  { %v2484_v58 = vadd.f32 %v2482_v36, %v2481_v52 }
0x1a18   :  { %v2541_v61 = vmax.f32 %v2539_v53, %v2540_v56  ;;  %v2506_v17 = vmax.f32 %v2504_v57, %v2505_v1 }
0x1a19   :  { %v2501_v62 = vmul.f32 %v2499_v60, %v2484_v58  ;;  %v2536_v63 = vmul.f32 %v4012_v9, %v2484_v58 }
0x1a1a   :  { %v2542_v3 = vrot.slane %v2541_v61, 2  ;;  %v2507_v10 = vrot.slane %v2506_v17, 2 }
0x1a1b   :  { %v2503_v4 = vadd.f32 1.0, %v2501_v62  ;;  %v2538_v6 = vadd.f32 1.0, %v2536_v63 }
0x1a1c   :  { %v2543_v7 = vmax.f32 %v2541_v61, %v2542_v3  ;;  %v2508_v11 = vmax.f32 %v2506_v17, %v2507_v10 }
0x1a1d   :  { %v2511_v8 = vsel %vm59_vm0, %v2503_v4, -inf  ;;  %v2546_v16 = vsel %vm59_vm0, %v2538_v6, -inf }
0x1a1e   :  { %v2512_v23 = vrot.slane %v2511_v8, 4  ;;  %v2547_v25 = vrot.slane %v2546_v16, 4  ;;  %v2544_v9 = vrot.slane %v2543_v7, 1  ;;  %v2509_v19 = vrot.slane %v2508_v11, 1 }
0x1a20   :  { %v2513_v27 = vmax.f32 %v2511_v8, %v2512_v23  ;;  %v2548_v18 = vmax.f32 %v2546_v16, %v2547_v25  ;;  %v2545_v12 = vmax.f32 %v2543_v7, %v2544_v9  ;;  %v2510_v34 = vmax.f32 %v2508_v11, %v2509_v19 }
0x1a22   :  { %v2514_v21 = vrot.slane %v2513_v27, 2  ;;  %v2549_v24 = vrot.slane %v2548_v18, 2  ;;  %v2944_v20 = vadd.f32 -1.0, %v2545_v12  ;;  %v2942_v36 = vadd.f32 -1.0, %v2510_v34 }
0x1a24   :  { %v2515_v15 = vmax.f32 %v2513_v27, %v2514_v21  ;;  %v2550_v29 = vmax.f32 %v2548_v18, %v2549_v24  ;;  %3087 = vtanh.f32 %v2944_v20 }
0x1a26   :  { %v2551_v28 = vrot.slane %v2550_v29, 1  ;;  %v2516_v30 = vrot.slane %v2515_v15, 1 }
0x1a28   :  { %v2552_v31 = vmax.f32 %v2550_v29, %v2551_v28  ;;  %v2517_v33 = vmax.f32 %v2515_v15, %v2516_v30 }
0x1a2a   :  { %v2945_v32 = vadd.f32 -1.0, %v2552_v31  ;;  %v2943_v35 = vadd.f32 -1.0, %v2517_v33  ;;  %v3088_v13 = vpop.eup %3087 }
0x1a2c   :  { %3089 = vtanh.f32 %v2945_v32 }
0x1a2d   :  { %3091 = vtanh.f32 %v2943_v35 }
0x1a2e   :  { %3093 = vtanh.f32 %v2942_v36 }
0x1a32   :  { %v3090_v37 = vpop.eup %3089 }
0x1a33   :  { %v2571_v38 = vsel %vm2570_vm4, %v3090_v37, %v3088_v13  ;;  %v3092_v39 = vpop.eup %3091 }
0x1a34   :  { %2950 = vmatmul.msk.f32.vlgmr.msra.gmra.mxu1 %vm59_vm0, %v2571_v38  ;;  %v3094_v40 = vpop.eup %3093 }
0x1a35   :  { %v2596_v41 = vsel %vm2570_vm4, %v3092_v39, %v3094_v40 }
0x1a3c   :  { %2951 = vmatmul.msk.f32.vlgmr.msrb.gmra.mxu1 %vm59_vm0, %v2596_v41 }
0x1ab1   :  { %v2591_v42 = vpop.f32.mrf.mxu1 }
0x1ab9   :  { %v2616_v45 = vpop.f32.mrf.mxu1 }
0x1aba   :  { %v2617_v46 = vadd.f32 %v2616_v45, %v2591_v42 }
0x1abc   :  { %v2623_v47 = vadd.f32 %v2992_v44, %v2617_v46 }
0x1abe   :  { %v2625_v59 = vsel %vm2624_vm6, %v2623_v47, -inf  ;;  %v2643_v48 = vsel %vm2642_vm5, %v2623_v47, 0.0 }
0x1abf   :  { %2626 = vmax.xlane.f32.xlu1 %v2625_v59  ;;  %v2644_v49 = vsel %vm2624_vm6, %v2643_v48, 0.0 }
0x1ac0   :  { %2645 = vadd.xlane.f32.xlu0 %v2644_v49 }
0x1b32   :  { %v2627_v50 = vpop.xlane.xlu1 %2626 }
0x1b33   :  { %v2628_v0 = vsub.f32 %v2623_v47, %v2627_v50  ;;  %vm2667_vm0 = vcmp.eq.f32.partialorder %v2623_v47, %v2627_v50  ;;  %v2646_v61 = vpop.xlane.xlu0 %2645 }
0x1b34   :  { %v2668_v62 = vsel %vm2667_vm0, %v2637_v43, 5 }
0x1b35   :  { %v2629_v51 = vmul.f32 1.442695, %v2628_v0  ;;  %v2669_v2 = vsel %vm2624_vm6, %v2668_v62, 2147483647 }
0x1b36   :  { %v2671_v3 = vshra.s32 %v2669_v2, 16  ;;  %v2670_v17 = vand.u32 65535, %v2669_v2 }
0x1b37   :  { %3095 = vpow2.f32 %v2629_v51 }
0x1b38   :  { %v2673_v4 = vcvt.s32.f32 %v2671_v3  ;;  %v2672_v26 = vcvt.s32.f32 %v2670_v17 }
0x1b3d   :  { %v3096_v52 = vpop.eup %3095 }
0x1b3e   :  { %v2631_v53 = vsel %vm2624_vm6, %v3096_v52, 0.0 }
0x1b3f   :  { %2632 = vadd.xlane.f32.xlu2 %v2631_v53 }
0x1bb2   :  { %v2633_v55 = vpop.xlane.xlu2 %2632 }
0x1bb3   :  { %3097 = vrcp.f32 %v2633_v55 }
0x1bb4   :  { %3099 = vlog2.f32 %v2633_v55 }
0x1bb9   :  { %v3098_v56 = vpop.eup %3097 }
0x1bba   :  { %v3100_v57 = vpop.eup %3099  ;;  %v2635_v58 = vmul.f32 %v3098_v56, %v3096_v52 }
0x1bbb   :  { %v2648_v14 = vmul.f32 0.6931472, %v3100_v57 }
0x1bbc   :  { %2686 = vst.msk [vmem:[%s4093_s16] sm:$0x3] %vm2624_vm6, %v2635_v58  ;;  %v2664_v6 = vsel %vm2624_vm6, %v2635_v58, -inf }
0x1bbd   :  { %v2649_v60 = vadd.f32 %v2648_v14, %v2627_v50 }
0x1bbf   :  { %v2650_v63 = vsub.f32 %v2649_v60, %v2646_v61 }
0x1bc1   :  { %v2652_v1 = vsel %vm2651_vm7, %v2650_v63, 0.0 }
0x1bc2   :  { %2653 = vadd.xlane.f32.xlu1 %v2652_v1 }
0x1bca   :  { %2674 = vmin.xlane.f32.xlu1 %v2673_v4 }
0x1bd2   :  { %2665 = vmax.xlane.f32.xlu1 %v2664_v6 }
0x1c35   :  { %v2654_v7 = vpop.xlane.xlu1 %2653 }
0x1c36   :  { %v2655_v8 = vrot.slane %v2654_v7, 4 }
0x1c38   :  { %v2656_v16 = vadd.f32 %v2655_v8, %v2654_v7 }
0x1c3a   :  { %v2657_v22 = vrot.slane %v2656_v16, 2 }
0x1c3c   :  { %v2658_v23 = vadd.f32 %v2657_v22, %v2656_v16 }
0x1c3d   :  { %v2675_v25 = vpop.xlane.xlu1 %2674 }
0x1c3e   :  { %vm2676_vm8 = vcmp.eq.f32.partialorder %v2673_v4, %v2675_v25  ;;  %v2659_v27 = vrot.slane %v2658_v23, 1  ;;  %v2681_v21 = vcvt.f32.s32 %v2675_v25 }
0x1c3f   :  { %v2677_v9 = vsel %vm2676_vm8, %v2672_v26, inf }
0x1c40   :  { %2678 = vmin.xlane.f32.xlu2 %v2677_v9  ;;  %v2660_v18 = vadd.f32 %v2659_v27, %v2658_v23  ;;  %v2682_v15 = vshll.u32 %v2681_v21, 16 }
0x1c42   :  { %2956 = vpush %v2660_v18 }
0x1c45   :  { %v2666_v10 = vpop.xlane.xlu1 %2665 }
0x1c46   :  { %2688 = vst.msk [vmem:[%s4093_s16] sm:$0x3] %vm2687_vm9, %v2666_v10 }
0x1c73   :  { %s2957_s12 = spop %2956 }
0x1c74   :  { %v2662_v29 = vstv %s2957_s12 }
0x1c75   :  { %v2663_v30 = vmul.f32 0.5, %v2662_v29 }
0x1cb3   :  { %v2679_v24 = vpop.xlane.xlu2 %2678 }
0x1cb4   :  { %v2680_v12 = vcvt.f32.s32 %v2679_v24 }
0x1cb6   :  { %v2683_v11 = vadd.s32 %v2682_v15, %v2680_v12 }
0x1cb8   :  { %v2684_v28 = vcvt.s32.f32 %v2683_v11 }
0x1cba   :  { %2690 = vst.msk [vmem:[%s4093_s16] sm:$0x3] %vm2689_vm10, %v2684_v28 }
0x1cbb   :  { %2692 = vst.msk [vmem:[%s4093_s16] sm:$0x3] %vm2691_vm11, %v2663_v30 }

</bundles_post_ra>
